<compile_context>
chip_gen: v5e
topology: v5e:2x2
jax: 0.10.0
libtpu: 0.0.40
codegen_flags: <defaults>
</compile_context>

<pallas_src>
import functools

import jax
import jax.numpy as jnp
from jax.experimental import pallas as pl
from jax.experimental.pallas import tpu as pltpu

EPS = 1e-5          # PyTorch BatchNorm1d default
H1, H2 = 1024, 256  # fixed by the module


def _round_up(n, m):
    return ((n + m - 1) // m) * m


def _choose_k_tiling(K, *, tk_default=512, single_step_max=2048):
    """256-aligned K tile (matches v6e/v7x MXU systolic depth).  When the whole
    padded contraction is small enough, collapse to a single grid step."""
    kp_single = _round_up(K, 256)
    if kp_single <= single_step_max:
        return kp_single, kp_single          # tk == Kp  ->  grid=(1,)
    tk = tk_default
    return tk, _round_up(K, tk)


def _bn_relu(h, gamma, beta):
    # training-mode BN over the batch axis, then ReLU (all in f32)
    mean = jnp.mean(h, axis=0, keepdims=True)
    var = jnp.mean((h - mean) * (h - mean), axis=0, keepdims=True)
    h = (h - mean) * jax.lax.rsqrt(var + EPS) * gamma + beta
    return jnp.maximum(h, 0.0)


def _mlp_kernel(x_ref,                 # (B, Kp)  bf16  resident, single-buffered
                w1_ref,                # (tk, H1) bf16  K-streamed
                g1_ref, be1_ref,       # (1, H1)  f32   resident
                w2_ref,                # (H1, H2) bf16  resident
                g2_ref, be2_ref,       # (1, H2)  f32   resident
                w3_ref,                # (H2, Cp) bf16  resident
                b3_ref,                # (1, Cp)  f32   resident
                o_ref,                 # (B, Cp)  f32   output (resident)
                acc_ref,               # (B, H1)  f32   VMEM scratch
                *, tk):
    k = pl.program_id(0)

    @pl.when(k == 0)
    def _():
        acc_ref[...] = jnp.zeros_like(acc_ref)

    # layer-1 partial product for this K tile (bf16 in, f32 MXU accumulate).
    # x is resident; slice the current tk-wide chunk out of VMEM.
    start = pl.multiple_of(k * tk, tk)
    xk = x_ref[:, pl.ds(start, tk)]
    acc_ref[...] += jnp.dot(xk, w1_ref[...],
                            preferred_element_type=jnp.float32)

    @pl.when(k == pl.num_programs(0) - 1)
    def _():
        # b1 omitted: training-mode BN's mean subtraction cancels it exactly.
        h1 = _bn_relu(acc_ref[...], g1_ref[...], be1_ref[...])

        # layer-2 (b2 also cancelled by bn2) -> bn2 -> relu
        h2 = jnp.dot(h1.astype(jnp.bfloat16), w2_ref[...],
                     preferred_element_type=jnp.float32)
        h2 = _bn_relu(h2, g2_ref[...], be2_ref[...])

        # layer-3 (bias kept), lane-dense padded output slab (unmasked stores)
        out = jnp.dot(h2.astype(jnp.bfloat16), w3_ref[...],
                      preferred_element_type=jnp.float32) + b3_ref[...]
        o_ref[...] = out.astype(o_ref.dtype)


def prepare_params(params):
    """One-time conversion of f32 training params into kernel-ready operands
    (bf16 cast + K/C padding).  Hoisted out of the per-call forward path so the
    dominant w1 tensor is not re-read/re-written through XLA on every call."""
    K = params["w1"].shape[0]
    C = params["w3"].shape[1]
    tk, Kp = _choose_k_tiling(K)
    Cp = _round_up(C, 128)       # lane-dense output slab

    # zero padding is exact (contributes nothing to the dots)
    w1_p = jnp.pad(params["w1"].astype(jnp.bfloat16), ((0, Kp - K), (0, 0)))
    w2_p = params["w2"].astype(jnp.bfloat16)
    w3_p = jnp.pad(params["w3"].astype(jnp.bfloat16), ((0, 0), (0, Cp - C)))
    b3_p = jnp.pad(params["b3"].astype(jnp.float32), ((0, 0), (0, Cp - C)))

    return {
        "K": K, "C": C, "tk": tk, "Kp": Kp, "Cp": Cp,
        "w1": w1_p, "w2": w2_p, "w3": w3_p, "b3": b3_p,
        "g1": params["g1"], "be1": params["be1"],
        "g2": params["g2"], "be2": params["be2"],
    }


def mlp_forward(x, prep):
    """x: (B, input_size) f32.  prep: output of prepare_params()."""
    B, K = x.shape
    assert K == prep["K"], "input feature size does not match prepared params"
    tk, Kp, Cp, C = prep["tk"], prep["Kp"], prep["Cp"], prep["C"]
    nk = Kp // tk

    # per-call input prep: cast + pad only the activations
    x_p = jnp.pad(x.astype(jnp.bfloat16), ((0, 0), (0, Kp - K)))

    # block-invariant operands: single-buffered (no pointless double buffer)
    def resident(shape):
        return pl.BlockSpec(shape, lambda k: (0,) * len(shape),
                            pipeline_mode=pl.Buffered(1))

    # only the K-streamed w1 tile needs pipelining buffers
    w1_spec = pl.BlockSpec((tk, H1), lambda k: (k, 0),
                           pipeline_mode=pl.Buffered(1 if nk == 1 else 2))

    # VMEM budget from the real footprint (single-buffered residents + w1
    # buffers + output + scratch), one 1.5x margin, capped at 48 MiB so it is
    # safe on v7x's 64 MiB physical VMEM.
    def nbytes(a):
        return a.size * a.dtype.itemsize
    single_buffered = (nbytes(x_p)
                       + sum(nbytes(prep[n]) for n in
                             ("w2", "w3", "b3", "g1", "be1", "g2", "be2"))
                       + B * Cp * 4          # output block
                       + B * H1 * 4)         # acc scratch
    streamed = (1 if nk == 1 else 2) * tk * H1 * 2
    vmem_limit = int(min(48 * 1024 * 1024,
                         max(16 * 1024 * 1024,
                             int(1.5 * (single_buffered + streamed)))))

    out = pl.pallas_call(
        functools.partial(_mlp_kernel, tk=tk),
        out_shape=jax.ShapeDtypeStruct((B, Cp), jnp.float32),
        grid_spec=pltpu.PrefetchScalarGridSpec(
            num_scalar_prefetch=0,
            grid=(nk,),
            in_specs=[
                resident((B, Kp)),            # x    (fully resident)
                w1_spec,                      # w1   (K-streamed)
                resident((1, H1)),            # g1
                resident((1, H1)),            # be1
                resident((H1, H2)),           # w2
                resident((1, H2)),            # g2
                resident((1, H2)),            # be2
                resident((H2, Cp)),           # w3
                resident((1, Cp)),            # b3
            ],
            out_specs=pl.BlockSpec((B, Cp), lambda k: (0, 0)),
            scratch_shapes=[pltpu.VMEM((B, H1), jnp.float32)],
        ),
        compiler_params=pltpu.CompilerParams(
            dimension_semantics=("arbitrary",),   # K is a reduction axis
            vmem_limit_bytes=vmem_limit,
        ),
    )(x_p, prep["w1"], prep["g1"], prep["be1"], prep["w2"],
      prep["g2"], prep["be2"], prep["w3"], prep["b3"])

    return out[:, :C]

    # TODO(synk): for training-size batches, add a B grid axis (256-aligned
    # tiles) with cross-tile sum/sum-sq accumulation so full-batch BN stats are
    # preserved, and mark it "parallel" to use v7x's second TensorCore.
    # TODO(synk): on v7x, w1/w2 could be streamed as fp8 with a per-column
    # scale folded into the f32 accumulate to halve the dominant weight DMA.


def init_params(key, input_size, num_classes, h1=H1, h2=H2):
    """Matches MLP.initialize_weights(): Linear weights ~ N(0, 0.01),
    biases = 0, BN gamma = 1, beta = 0.  Weights stored as (in, out)."""
    k1, k2, k3 = jax.random.split(key, 3)
    std = 0.01
    return {
        "w1": jax.random.normal(k1, (input_size, h1), jnp.float32) * std,
        "b1": jnp.zeros((1, h1), jnp.float32),
        "g1": jnp.ones((1, h1), jnp.float32),
        "be1": jnp.zeros((1, h1), jnp.float32),
        "w2": jax.random.normal(k2, (h1, h2), jnp.float32) * std,
        "b2": jnp.zeros((1, h2), jnp.float32),
        "g2": jnp.ones((1, h2), jnp.float32),
        "be2": jnp.zeros((1, h2), jnp.float32),
        "w3": jax.random.normal(k3, (h2, num_classes), jnp.float32) * std,
        "b3": jnp.zeros((1, num_classes), jnp.float32),
    }


def mlp_reference(x, params):
    """Pure-JAX reference mirroring the kernel's bf16 matmul numerics but the
    *full* PyTorch forward (including the pre-BN biases b1/b2, which the
    kernel omits because training-mode BN cancels them exactly)."""
    def bn_relu(h, g, b):
        m = jnp.mean(h, axis=0, keepdims=True)
        v = jnp.mean((h - m) ** 2, axis=0, keepdims=True)
        return jnp.maximum((h - m) * jax.lax.rsqrt(v + EPS) * g + b, 0.0)

    def bdot(a, w):
        return jnp.dot(a.astype(jnp.bfloat16), w.astype(jnp.bfloat16),
                       preferred_element_type=jnp.float32)

    h = bdot(x, params["w1"]) + params["b1"]
    h = bn_relu(h, params["g1"], params["be1"])
    h = bdot(h, params["w2"]) + params["b2"]
    h = bn_relu(h, params["g2"], params["be2"])
    return bdot(h, params["w3"]) + params["b3"]


def _randomize_affine(params, key):
    """Make biases / BN affine params non-trivial so the forward semantics
    (incl. the exact b1/b2 cancellation under training-mode BN) are really
    exercised by the checks below."""
    kb1, kb2, kb3, kg1, kg2, kbe1, kbe2 = jax.random.split(key, 7)
    params["b1"] = 0.1 * jax.random.normal(kb1, params["b1"].shape, jnp.float32)
    params["b2"] = 0.1 * jax.random.normal(kb2, params["b2"].shape, jnp.float32)
    params["b3"] = 0.1 * jax.random.normal(kb3, params["b3"].shape, jnp.float32)
    params["g1"] = 1.0 + 0.1 * jax.random.normal(kg1, params["g1"].shape, jnp.float32)
    params["g2"] = 1.0 + 0.1 * jax.random.normal(kg2, params["g2"].shape, jnp.float32)
    params["be1"] = 0.1 * jax.random.normal(kbe1, params["be1"].shape, jnp.float32)
    params["be2"] = 0.1 * jax.random.normal(kbe2, params["be2"].shape, jnp.float32)
    return params


if __name__ == "__main__":
    key = jax.random.PRNGKey(0)
    B = 8            # batch kept whole in one block -> exact full-batch BN
    num_classes = 10

    # case 1: K small enough that the grid collapses to a single step;
    # case 2: larger K exercising the multi-step K-streamed path (nk > 1).
    for case, input_size in enumerate((512, 3000)):
        kx, kp, kb, key = jax.random.split(key, 4)
        x = jax.random.normal(kx, (B, input_size), jnp.float32)
        params = _randomize_affine(init_params(kp, input_size, num_classes), kb)

        prep = prepare_params(params)          # one-time cast/pad (hoisted)
        out = jax.block_until_ready(mlp_forward(x, prep))
        ref = mlp_reference(x, params)

        assert out.shape == (B, num_classes)
        max_diff = float(jnp.max(jnp.abs(out - ref)))
        assert jnp.allclose(out, ref, atol=5e-3, rtol=5e-3), (
            f"case {case} (K={input_size}): mismatch vs reference, "
            f"max abs diff = {max_diff}")

    print("KERNEL_OK")
</pallas_src>

<mosaic_0001>
module attributes {stable_mosaic.version = 11 : i64} {
  func.func @_mlp_kernel(%arg0: i32, %arg1: memref<8x512xbf16, #tpu.memory_space<vmem>>, %arg2: memref<512x1024xbf16, #tpu.memory_space<vmem>>, %arg3: memref<1x1024xf32, #tpu.memory_space<vmem>>, %arg4: memref<1x1024xf32, #tpu.memory_space<vmem>>, %arg5: memref<1024x256xbf16, #tpu.memory_space<vmem>>, %arg6: memref<1x256xf32, #tpu.memory_space<vmem>>, %arg7: memref<1x256xf32, #tpu.memory_space<vmem>>, %arg8: memref<256x128xbf16, #tpu.memory_space<vmem>>, %arg9: memref<1x128xf32, #tpu.memory_space<vmem>>, %arg10: memref<8x128xf32, #tpu.memory_space<vmem>>, %arg11: memref<8x1024xf32, #tpu.memory_space<vmem>>) attributes {dimension_semantics = [#tpu.dimension_semantics<arbitrary>], iteration_bounds = array<i64: 1>, scalar_prefetch = 0 : i64, scratch_operands = 1 : i64, tpu.core_type = #tpu.core_type<tc>, window_params = [{pipeline_mode = #tpu.pipeline_mode<synchronous>, transform_indices = @transform_0, window_bounds = array<i64: 8, 512>}, {pipeline_mode = #tpu.pipeline_mode<synchronous>, transform_indices = @transform_1, window_bounds = array<i64: 512, 1024>}, {pipeline_mode = #tpu.pipeline_mode<synchronous>, transform_indices = @transform_2, window_bounds = array<i64: 1, 1024>}, {pipeline_mode = #tpu.pipeline_mode<synchronous>, transform_indices = @transform_3, window_bounds = array<i64: 1, 1024>}, {pipeline_mode = #tpu.pipeline_mode<synchronous>, transform_indices = @transform_4, window_bounds = array<i64: 1024, 256>}, {pipeline_mode = #tpu.pipeline_mode<synchronous>, transform_indices = @transform_5, window_bounds = array<i64: 1, 256>}, {pipeline_mode = #tpu.pipeline_mode<synchronous>, transform_indices = @transform_6, window_bounds = array<i64: 1, 256>}, {pipeline_mode = #tpu.pipeline_mode<synchronous>, transform_indices = @transform_7, window_bounds = array<i64: 256, 128>}, {pipeline_mode = #tpu.pipeline_mode<synchronous>, transform_indices = @transform_8, window_bounds = array<i64: 1, 128>}, {pipeline_mode = #tpu.pipeline_mode<synchronous>, transform_indices = @transform_9, window_bounds = array<i64: 8, 128>}]} {
    %c0_i32 = arith.constant 0 : i32
    %0 = arith.cmpi eq, %arg0, %c0_i32 : i32
    %1 = arith.extui %0 : i1 to i32
    %c0_i32_0 = arith.constant 0 : i32
    %2 = arith.cmpi ne, %1, %c0_i32_0 : i32
    scf.if %2 {
      %cst_9 = arith.constant 0.000000e+00 : f32
      %15 = vector.broadcast %cst_9 : f32 to vector<8x1024xf32>
      %c0_10 = arith.constant 0 : index
      %c0_11 = arith.constant 0 : index
      %16 = vector.load %arg11[%c0_10, %c0_11] : memref<8x1024xf32, #tpu.memory_space<vmem>>, vector<8x1024xf32>
      tpu.vector_store %arg11[%c0_10, %c0_11], %15 {strides = array<i32>} : memref<8x1024xf32, #tpu.memory_space<vmem>>, vector<8x1024xf32>,
    } else {
    }
    %c512_i32 = arith.constant 512 : i32
    %3 = arith.muli %arg0, %c512_i32 : i32
    %4 = tpu.assume_multiple %3, 512 : i32
    %c0 = arith.constant 0 : index
    %5 = arith.index_cast %4 : i32 to index
    %6 = vector.load %arg1[%c0, %5] : memref<8x512xbf16, #tpu.memory_space<vmem>>, vector<8x512xbf16>
    %c0_1 = arith.constant 0 : index
    %c0_2 = arith.constant 0 : index
    %7 = vector.load %arg11[%c0_1, %c0_2] : memref<8x1024xf32, #tpu.memory_space<vmem>>, vector<8x1024xf32>
    %c0_3 = arith.constant 0 : index
    %c0_4 = arith.constant 0 : index
    %8 = vector.load %arg2[%c0_3, %c0_4] : memref<512x1024xbf16, #tpu.memory_space<vmem>>, vector<512x1024xbf16>
    %cst = arith.constant dense<0.000000e+00> : vector<8x1024xf32>
    %9 = tpu.matmul %6, %8, %cst {dimension_numbers = #tpu.dot_dimension_numbers<[1], [0], [0], [1], [0, 0, 1, 1], [], []>} : vector<8x512xbf16>, vector<512x1024xbf16>, vector<8x1024xf32> -> vector<8x1024xf32>
    %10 = arith.addf %7, %9 : vector<8x1024xf32>
    %c0_5 = arith.constant 0 : index
    %c0_6 = arith.constant 0 : index
    %11 = vector.load %arg11[%c0_5, %c0_6] : memref<8x1024xf32, #tpu.memory_space<vmem>>, vector<8x1024xf32>
    tpu.vector_store %arg11[%c0_5, %c0_6], %10 {strides = array<i32>} : memref<8x1024xf32, #tpu.memory_space<vmem>>, vector<8x1024xf32>,
    %c0_i32_7 = arith.constant 0 : i32
    %12 = arith.cmpi eq, %arg0, %c0_i32_7 : i32
    %13 = arith.extui %12 : i1 to i32
    %c0_i32_8 = arith.constant 0 : i32
    %14 = arith.cmpi ne, %13, %c0_i32_8 : i32
    scf.if %14 {
      %c0_9 = arith.constant 0 : index
      %c0_10 = arith.constant 0 : index
      %15 = vector.load %arg11[%c0_9, %c0_10] : memref<8x1024xf32, #tpu.memory_space<vmem>>, vector<8x1024xf32>
      %c0_11 = arith.constant 0 : index
      %c0_12 = arith.constant 0 : index
      %16 = vector.load %arg3[%c0_11, %c0_12] : memref<1x1024xf32, #tpu.memory_space<vmem>>, vector<1x1024xf32>
      %c0_13 = arith.constant 0 : index
      %c0_14 = arith.constant 0 : index
      %17 = vector.load %arg4[%c0_13, %c0_14] : memref<1x1024xf32, #tpu.memory_space<vmem>>, vector<1x1024xf32>
      %cst_15 = arith.constant dense<0.000000e+00> : vector<1024xf32>
      %18 = vector.multi_reduction <add>, %15, %cst_15 [0] : vector<8x1024xf32> to vector<1024xf32>
      %19 = vector.shape_cast %18 : vector<1024xf32> to vector<1x1024xf32>
      %cst_16 = arith.constant 8.000000e+00 : f32
      %20 = vector.broadcast %cst_16 : f32 to vector<1x1024xf32>
      %21 = arith.divf %19, %20 : vector<1x1024xf32>
      %22 = vector.broadcast %21 : vector<1x1024xf32> to vector<8x1024xf32>
      %23 = arith.subf %15, %22 : vector<8x1024xf32>
      %24 = vector.broadcast %21 : vector<1x1024xf32> to vector<8x1024xf32>
      %25 = arith.subf %15, %24 : vector<8x1024xf32>
      %26 = arith.mulf %23, %25 : vector<8x1024xf32>
      %cst_17 = arith.constant dense<0.000000e+00> : vector<1024xf32>
      %27 = vector.multi_reduction <add>, %26, %cst_17 [0] : vector<8x1024xf32> to vector<1024xf32>
      %28 = vector.shape_cast %27 : vector<1024xf32> to vector<1x1024xf32>
      %cst_18 = arith.constant 8.000000e+00 : f32
      %29 = vector.broadcast %cst_18 : f32 to vector<1x1024xf32>
      %30 = arith.divf %28, %29 : vector<1x1024xf32>
      %31 = vector.broadcast %21 : vector<1x1024xf32> to vector<8x1024xf32>
      %32 = arith.subf %15, %31 : vector<8x1024xf32>
      %cst_19 = arith.constant 9.99999974E-6 : f32
      %33 = vector.broadcast %cst_19 : f32 to vector<1x1024xf32>
      %34 = arith.addf %30, %33 : vector<1x1024xf32>
      %35 = math.rsqrt %34 : vector<1x1024xf32>
      %36 = vector.broadcast %35 : vector<1x1024xf32> to vector<8x1024xf32>
      %37 = arith.mulf %32, %36 : vector<8x1024xf32>
      %38 = vector.broadcast %16 : vector<1x1024xf32> to vector<8x1024xf32>
      %39 = arith.mulf %37, %38 : vector<8x1024xf32>
      %40 = vector.broadcast %17 : vector<1x1024xf32> to vector<8x1024xf32>
      %41 = arith.addf %39, %40 : vector<8x1024xf32>
      %cst_20 = arith.constant 0.000000e+00 : f32
      %42 = vector.broadcast %cst_20 : f32 to vector<8x1024xf32>
      %43 = arith.maximumf %41, %42 : vector<8x1024xf32>
      %44 = arith.truncf %43 : vector<8x1024xf32> to vector<8x1024xbf16>
      %c0_21 = arith.constant 0 : index
      %c0_22 = arith.constant 0 : index
      %45 = vector.load %arg5[%c0_21, %c0_22] : memref<1024x256xbf16, #tpu.memory_space<vmem>>, vector<1024x256xbf16>
      %cst_23 = arith.constant dense<0.000000e+00> : vector<8x256xf32>
      %46 = tpu.matmul %44, %45, %cst_23 {dimension_numbers = #tpu.dot_dimension_numbers<[1], [0], [0], [1], [0, 0, 1, 1], [], []>} : vector<8x1024xbf16>, vector<1024x256xbf16>, vector<8x256xf32> -> vector<8x256xf32>
      %c0_24 = arith.constant 0 : index
      %c0_25 = arith.constant 0 : index
      %47 = vector.load %arg6[%c0_24, %c0_25] : memref<1x256xf32, #tpu.memory_space<vmem>>, vector<1x256xf32>
      %c0_26 = arith.constant 0 : index
      %c0_27 = arith.constant 0 : index
      %48 = vector.load %arg7[%c0_26, %c0_27] : memref<1x256xf32, #tpu.memory_space<vmem>>, vector<1x256xf32>
      %cst_28 = arith.constant dense<0.000000e+00> : vector<256xf32>
      %49 = vector.multi_reduction <add>, %46, %cst_28 [0] : vector<8x256xf32> to vector<256xf32>
      %50 = vector.shape_cast %49 : vector<256xf32> to vector<1x256xf32>
      %cst_29 = arith.constant 8.000000e+00 : f32
      %51 = vector.broadcast %cst_29 : f32 to vector<1x256xf32>
      %52 = arith.divf %50, %51 : vector<1x256xf32>
      %53 = vector.broadcast %52 : vector<1x256xf32> to vector<8x256xf32>
      %54 = arith.subf %46, %53 : vector<8x256xf32>
      %55 = vector.broadcast %52 : vector<1x256xf32> to vector<8x256xf32>
      %56 = arith.subf %46, %55 : vector<8x256xf32>
      %57 = arith.mulf %54, %56 : vector<8x256xf32>
      %cst_30 = arith.constant dense<0.000000e+00> : vector<256xf32>
      %58 = vector.multi_reduction <add>, %57, %cst_30 [0] : vector<8x256xf32> to vector<256xf32>
      %59 = vector.shape_cast %58 : vector<256xf32> to vector<1x256xf32>
      %cst_31 = arith.constant 8.000000e+00 : f32
      %60 = vector.broadcast %cst_31 : f32 to vector<1x256xf32>
      %61 = arith.divf %59, %60 : vector<1x256xf32>
      %62 = vector.broadcast %52 : vector<1x256xf32> to vector<8x256xf32>
      %63 = arith.subf %46, %62 : vector<8x256xf32>
      %cst_32 = arith.constant 9.99999974E-6 : f32
      %64 = vector.broadcast %cst_32 : f32 to vector<1x256xf32>
      %65 = arith.addf %61, %64 : vector<1x256xf32>
      %66 = math.rsqrt %65 : vector<1x256xf32>
      %67 = vector.broadcast %66 : vector<1x256xf32> to vector<8x256xf32>
      %68 = arith.mulf %63, %67 : vector<8x256xf32>
      %69 = vector.broadcast %47 : vector<1x256xf32> to vector<8x256xf32>
      %70 = arith.mulf %68, %69 : vector<8x256xf32>
      %71 = vector.broadcast %48 : vector<1x256xf32> to vector<8x256xf32>
      %72 = arith.addf %70, %71 : vector<8x256xf32>
      %cst_33 = arith.constant 0.000000e+00 : f32
      %73 = vector.broadcast %cst_33 : f32 to vector<8x256xf32>
      %74 = arith.maximumf %72, %73 : vector<8x256xf32>
      %75 = arith.truncf %74 : vector<8x256xf32> to vector<8x256xbf16>
      %c0_34 = arith.constant 0 : index
      %c0_35 = arith.constant 0 : index
      %76 = vector.load %arg8[%c0_34, %c0_35] : memref<256x128xbf16, #tpu.memory_space<vmem>>, vector<256x128xbf16>
      %cst_36 = arith.constant dense<0.000000e+00> : vector<8x128xf32>
      %77 = tpu.matmul %75, %76, %cst_36 {dimension_numbers = #tpu.dot_dimension_numbers<[1], [0], [0], [1], [0, 0, 1, 1], [], []>} : vector<8x256xbf16>, vector<256x128xbf16>, vector<8x128xf32> -> vector<8x128xf32>
      %c0_37 = arith.constant 0 : index
      %c0_38 = arith.constant 0 : index
      %78 = vector.load %arg9[%c0_37, %c0_38] : memref<1x128xf32, #tpu.memory_space<vmem>>, vector<1x128xf32>
      %79 = vector.broadcast %78 : vector<1x128xf32> to vector<8x128xf32>
      %80 = arith.addf %77, %79 : vector<8x128xf32>
      %c0_39 = arith.constant 0 : index
      %c0_40 = arith.constant 0 : index
      %81 = vector.load %arg10[%c0_39, %c0_40] : memref<8x128xf32, #tpu.memory_space<vmem>>, vector<8x128xf32>
      tpu.vector_store %arg10[%c0_39, %c0_40], %80 {strides = array<i32>} : memref<8x128xf32, #tpu.memory_space<vmem>>, vector<8x128xf32>,
    } else {
    }
    return
  }
  func.func @transform_0(%arg0: i32) -> (i32, i32) {
    %c0_i32 = arith.constant 0 : i32
    %c0_i32_0 = arith.constant 0 : i32
    %c0_i32_1 = arith.constant 0 : i32
    return %c0_i32, %c0_i32_0 : i32, i32
  }
  func.func @transform_1(%arg0: i32) -> (i32, i32) {
    %c0_i32 = arith.constant 0 : i32
    %c0_i32_0 = arith.constant 0 : i32
    return %arg0, %c0_i32 : i32, i32
  }
  func.func @transform_2(%arg0: i32) -> (i32, i32) {
    %c0_i32 = arith.constant 0 : i32
    %c0_i32_0 = arith.constant 0 : i32
    %c0_i32_1 = arith.constant 0 : i32
    return %c0_i32, %c0_i32_0 : i32, i32
  }
  func.func @transform_3(%arg0: i32) -> (i32, i32) {
    %c0_i32 = arith.constant 0 : i32
    %c0_i32_0 = arith.constant 0 : i32
    %c0_i32_1 = arith.constant 0 : i32
    return %c0_i32, %c0_i32_0 : i32, i32
  }
  func.func @transform_4(%arg0: i32) -> (i32, i32) {
    %c0_i32 = arith.constant 0 : i32
    %c0_i32_0 = arith.constant 0 : i32
    %c0_i32_1 = arith.constant 0 : i32
    return %c0_i32, %c0_i32_0 : i32, i32
  }
  func.func @transform_5(%arg0: i32) -> (i32, i32) {
    %c0_i32 = arith.constant 0 : i32
    %c0_i32_0 = arith.constant 0 : i32
    %c0_i32_1 = arith.constant 0 : i32
    return %c0_i32, %c0_i32_0 : i32, i32
  }
  func.func @transform_6(%arg0: i32) -> (i32, i32) {
    %c0_i32 = arith.constant 0 : i32
    %c0_i32_0 = arith.constant 0 : i32
    %c0_i32_1 = arith.constant 0 : i32
    return %c0_i32, %c0_i32_0 : i32, i32
  }
  func.func @transform_7(%arg0: i32) -> (i32, i32) {
    %c0_i32 = arith.constant 0 : i32
    %c0_i32_0 = arith.constant 0 : i32
    %c0_i32_1 = arith.constant 0 : i32
    return %c0_i32, %c0_i32_0 : i32, i32
  }
  func.func @transform_8(%arg0: i32) -> (i32, i32) {
    %c0_i32 = arith.constant 0 : i32
    %c0_i32_0 = arith.constant 0 : i32
    %c0_i32_1 = arith.constant 0 : i32
    return %c0_i32, %c0_i32_0 : i32, i32
  }
  func.func @transform_9(%arg0: i32) -> (i32, i32) {
    %c0_i32 = arith.constant 0 : i32
    %c0_i32_0 = arith.constant 0 : i32
    %c0_i32_1 = arith.constant 0 : i32
    return %c0_i32, %c0_i32_0 : i32, i32
  }
}

</mosaic_0001>

<bundles_post_ra>
// kernel: tpu_custom_call.1
= control target key start
LH: loop header
LB: loop body
LE: loop exit
PB: predicated region body
PF: predicated region fallthrough
CT: control target
= control target key end

     0   :  { %14 = vsyncpa [#allocation4], 0  ;;  %s6239_s0 = inlined_call_operand.hbm [shape: bf16[8,512], index: 0, kind: input, shape index: {}]   ;;  %s6240_s1 = inlined_call_operand.hbm [shape: bf16[512,1024], index: 1, kind: input, shape index: {}]   ;;  %s6241_s2 = inlined_call_operand.hbm [shape: f32[1,1024], index: 2, kind: input, shape index: {}]   ;;  %s6242_s3 = inlined_call_operand.hbm [shape: f32[1,1024], index: 3, kind: input, shape index: {}]   ;;  %s6243_s4 = inlined_call_operand.hbm [shape: bf16[1024,256], index: 4, kind: input, shape index: {}]   ;;  %s6244_s5 = inlined_call_operand.vmem [shape: f32[1,256], index: 5, kind: input, shape index: {}]   ;;  %s6245_s6 = inlined_call_operand.vmem [shape: f32[1,256], index: 6, kind: input, shape index: {}]   ;;  %s6246_s7 = inlined_call_operand.hbm [shape: bf16[256,128], index: 7, kind: input, shape index: {}]   ;;  %s6247_s8 = inlined_call_operand.vmem [shape: f32[1,128], index: 8, kind: input, shape index: {}]   ;;  %s6248_s9 = inlined_call_operand.hbm [shape: f32[8,128], index: 9, kind: output, shape index: {}]  }
   0x1   :  { %15 = vsyncpa [#allocation7], 0 }
   0x2   :  { %16 = vsyncpa [#allocation10], 0 }
   0x3   :  { %17 = vsyncpa [#allocation13], 0  ;;  %s34_s11 = sshll.u32 %s6240_s1, 4  ;;  %s35_s11 = int_to_ptr.hbm [resolvable:$true] %s34_s11 }
   0x4   :  { %18 = vsyncpa [#allocation5], 0  ;;  %s5890_s12 = smov [#allocation6]   ;;  %s59_s16 = sshll.u32 %s6242_s3, 4  ;;  %s60_s16 = int_to_ptr.hbm [resolvable:$true] %s59_s16 }
   0x5   :  { %s36_s13 = sshll.u32 %s5890_s12, 4  ;;  %s5891_s17 = smov 512   ;;  %s37_s13 = int_to_ptr.vmem [resolvable:$true] %s36_s13 }
   0x6   :  { %s5892_s18 = smov 32   ;;  %s5893_s19 = smov [#allocation9]  }
   0x7   :  { %42 = dma.hbm_to_vmem [thread:$0]  %s35_s11, 32768, %s37_s13, [#allocation7], %s5891_s17, %s5891_s17, %s5892_s18  }
   0x8   :  { %s61_s20 = sshll.u32 %s5893_s19, 4  ;;  %s24_s23 = sshll.u32 %s6239_s0, 4  ;;  %s62_s20 = int_to_ptr.vmem [resolvable:$true] %s61_s20  ;;  %s25_s23 = int_to_ptr.hbm [resolvable:$true] %s24_s23 }
   0x9   :  { %64 = dma.hbm_to_vmem [thread:$0]  %s60_s16, 128, %s62_s20, [#allocation10]  }
   0xa   :  { %s48_s25 = sshll.u32 %s6241_s2, 4  ;;  %s5894_s26 = smov [#allocation3]   ;;  %s49_s25 = int_to_ptr.hbm [resolvable:$true] %s48_s25 }
   0xb   :  { %s26_s27 = sshll.u32 %s5894_s26, 4  ;;  %s5895_s3 = smov [#allocation8]   ;;  %s27_s27 = int_to_ptr.vmem [resolvable:$true] %s26_s27 }
   0xc   :  { %29 = dma.hbm_to_vmem [thread:$0]  %s25_s23, 256, %s27_s27, [#allocation4]  }
   0xd   :  { %s50_s28 = sshll.u32 %s5895_s3, 4  ;;  %s69_s10 = sshll.u32 %s6243_s4, 4  ;;  %s51_s28 = int_to_ptr.vmem [resolvable:$true] %s50_s28  ;;  %s70_s10 = int_to_ptr.hbm [resolvable:$true] %s69_s10 }
   0xe   :  { %53 = dma.hbm_to_vmem [thread:$0]  %s49_s25, 128, %s51_s28, [#allocation7]  }
   0xf   :  { %s5896_s0 = smov [#allocation11]   ;;  %s86_s2 = sshll.u32 %s6246_s7, 4  ;;  %s87_s2 = int_to_ptr.hbm [resolvable:$true] %s86_s2 }
  0x10   :  { %s71_s11 = sshll.u32 %s5896_s0, 4  ;;  %s5897_s14 = smov 128   ;;  %s72_s11 = int_to_ptr.vmem [resolvable:$true] %s71_s11 }
  0x11   :  { %s5898_s15 = smov 8   ;;  %s5899_s16 = smov [#allocation12]  }
  0x12   :  { %77 = dma.hbm_to_vmem [thread:$0]  %s70_s10, 16384, %s72_s11, [#allocation10], %s5897_s14, %s5897_s14, %s5898_s15  }
  0x13   :  { %s88_s17 = sshll.u32 %s5899_s16, 4  ;;  %s5900_s18 = smov 64   ;;  %s89_s17 = int_to_ptr.vmem [resolvable:$true] %s88_s17 }
  0x14   :  { %s5901_s19 = smov 4  }
  0x15   :  { %94 = dma.hbm_to_vmem [thread:$0]  %s87_s2, 2048, %s89_s17, [#allocation13], %s5900_s18, %s5900_s18, %s5901_s19  }
  0x16   :  { %5880 = dma.done.wait [#allocation4], 256  }
  0x17   :  { %5881 = vsyncadd [#allocation4], 4294967040 }
  0x18   :  { %5882 = dma.done.wait [#allocation7], 32896  }
  0x19   :  { %5883 = vsyncadd [#allocation7], 4294934400 }
  0x1a   :  { %5884 = dma.done.wait [#allocation10], 16512  }
  0x1b   :  { %5885 = vsyncadd [#allocation10], 4294950784 }
  0x1c   :  { %5886 = dma.done.wait [#allocation13], 2048  }
  0x1d   :  { %5887 = vsyncadd [#allocation13], 4294965248  ;;  %v3899_v0 = vld [vmem:[#allocation6 + $0x1c0] sm:$0xf]  ;;  %s5903_s22 = smov [#allocation14]   ;;  %s3658_s25 = sshll.u32 %s6248_s9, 4  ;;  %s3659_s25 = int_to_ptr.hbm [resolvable:$true] %s3658_s25 }
  0x1e   :  { %v5333_v1 = vld [vmem:[#allocation6 + $0x1dc] sm:$0xf0]  ;;  %s3656_s23 = sshll.u32 %s5903_s22, 4  ;;  %s3657_s23 = int_to_ptr.vmem [resolvable:$true] %s3656_s23 }
  0x1f   :  { %v4155_v2 = vld [vmem:[#allocation6 + $0x3c0] sm:$0xf]  ;;  %v3900_v3 = vor.u32 %v5333_v1, %v3899_v0 }
  0x20   :  { %v5397_v4 = vld [vmem:[#allocation6 + $0x3dc] sm:$0xf0] }
  0x21   :  { %v4411_v5 = vld [vmem:[#allocation6 + $0x5c0] sm:$0xf]  ;;  %v4156_v7 = vor.u32 %v5397_v4, %v4155_v2  ;;  %1698 = vmatpush.bf16.msra.mxu0 %v3900_v3 }
  0x22   :  { %v5461_v6 = vld [vmem:[#allocation6 + $0x5dc] sm:$0xf0] }
  0x23   :  { %v4412_v8 = vor.u32 %v5461_v6, %v4411_v5  ;;  %v4667_v9 = vld [vmem:[#allocation6 + $0x7c0] sm:$0xf]  ;;  %1711 = vmatpush.bf16.msra.mxu1 %v4156_v7 }
  0x24   :  { %v5525_v10 = vld [vmem:[#allocation6 + $0x7dc] sm:$0xf0] }
  0x25   :  { %v3867_v11 = vld [vmem:[#allocation6 + $0x180] sm:$0xf]  ;;  %v4668_v12 = vor.u32 %v5525_v10, %v4667_v9  ;;  %1724 = vmatpush.bf16.msra.mxu2 %v4412_v8 }
  0x26   :  { %v5325_v13 = vld [vmem:[#allocation6 + $0x19c] sm:$0xf0] }
  0x27   :  { %v4123_v14 = vld [vmem:[#allocation6 + $0x380] sm:$0xf]  ;;  %v3868_v16 = vor.u32 %v5325_v13, %v3867_v11  ;;  %1737 = vmatpush.bf16.msra.mxu3 %v4668_v12 }
  0x28   :  { %v5389_v15 = vld [vmem:[#allocation6 + $0x39c] sm:$0xf0] }
  0x29   :  { %v4124_v17 = vor.u32 %v5389_v15, %v4123_v14  ;;  %v4379_v18 = vld [vmem:[#allocation6 + $0x580] sm:$0xf]  ;;  %1699 = vmatpush.bf16.msra.mxu0 %v3868_v16 }
  0x2a   :  { %v5453_v19 = vld [vmem:[#allocation6 + $0x59c] sm:$0xf0] }
  0x2b   :  { %v4635_v20 = vld [vmem:[#allocation6 + $0x780] sm:$0xf]  ;;  %v4380_v21 = vor.u32 %v5453_v19, %v4379_v18  ;;  %1712 = vmatpush.bf16.msra.mxu1 %v4124_v17 }
  0x2c   :  { %v5517_v22 = vld [vmem:[#allocation6 + $0x79c] sm:$0xf0] }
  0x2d   :  { %v3835_v23 = vld [vmem:[#allocation6 + $0x140] sm:$0xf]  ;;  %v4636_v25 = vor.u32 %v5517_v22, %v4635_v20  ;;  %1725 = vmatpush.bf16.msra.mxu2 %v4380_v21 }
  0x2e   :  { %v5317_v24 = vld [vmem:[#allocation6 + $0x15c] sm:$0xf0] }
  0x2f   :  { %v4091_v26 = vld [vmem:[#allocation6 + $0x340] sm:$0xf]  ;;  %v3836_v29 = vor.u32 %v5317_v24, %v3835_v23  ;;  %1738 = vmatpush.bf16.msra.mxu3 %v4636_v25  ;;  %v139_v25 = vld [vmem:[#allocation3 + $0x8] sm:$0xff] }
  0x30   :  { %v5381_v27 = vld [vmem:[#allocation6 + $0x35c] sm:$0xf0] }
  0x31   :  { %v4347_v28 = vld [vmem:[#allocation6 + $0x540] sm:$0xf]  ;;  %v4092_v33 = vor.u32 %v5381_v27, %v4091_v26  ;;  %1700 = vmatpush.bf16.msra.mxu0 %v3836_v29  ;;  %v5329_v29 = vld [vmem:[#allocation6 + $0x1c4] sm:$0xf] }
  0x32   :  { %v5445_v30 = vld [vmem:[#allocation6 + $0x55c] sm:$0xf0] }
  0x33   :  { %v4603_v31 = vld [vmem:[#allocation6 + $0x740] sm:$0xf]  ;;  %v4348_v34 = vor.u32 %v5445_v30, %v4347_v28  ;;  %1713 = vmatpush.bf16.msra.mxu1 %v4092_v33  ;;  %v3901_v30 = vld [vmem:[#allocation6 + $0x1e0] sm:$0xf0] }
  0x34   :  { %v5509_v32 = vld [vmem:[#allocation6 + $0x75c] sm:$0xf0] }
  0x35   :  { %v3803_v35 = vld [vmem:[#allocation6 + $0x100] sm:$0xf]  ;;  %v4604_v38 = vor.u32 %v5509_v32, %v4603_v31  ;;  %1726 = vmatpush.bf16.msra.mxu2 %v4348_v34  ;;  %v5393_v31 = vld [vmem:[#allocation6 + $0x3c4] sm:$0xf] }
  0x36   :  { %v5309_v36 = vld [vmem:[#allocation6 + $0x11c] sm:$0xf0]  ;;  %v4157_v32 = vld [vmem:[#allocation6 + $0x3e0] sm:$0xf0] }
  0x37   :  { %v4059_v37 = vld [vmem:[#allocation6 + $0x300] sm:$0xf]  ;;  %v3804_v44 = vor.u32 %v5309_v36, %v3803_v35  ;;  %1739 = vmatpush.bf16.msra.mxu3 %v4604_v38  ;;  %v5457_v34 = vld [vmem:[#allocation6 + $0x5c4] sm:$0xf]  ;;  %v408_v36 = vunpack.c.l.b16 %v139_v25 }
  0x38   :  { %v5373_v39 = vld [vmem:[#allocation6 + $0x31c] sm:$0xf0]  ;;  %v4413_v35 = vld [vmem:[#allocation6 + $0x5e0] sm:$0xf0] }
  0x39   :  { %v4315_v40 = vld [vmem:[#allocation6 + $0x500] sm:$0xf]  ;;  %v4060_v45 = vor.u32 %v5373_v39, %v4059_v37  ;;  %1701 = vmatpush.bf16.msra.mxu0 %v3804_v44  ;;  %v138_v37 = vld [vmem:[#allocation3] sm:$0xff] }
  0x3a   :  { %v5437_v41 = vld [vmem:[#allocation6 + $0x51c] sm:$0xf0] }
  0x3b   :  { %v4571_v42 = vld [vmem:[#allocation6 + $0x700] sm:$0xf]  ;;  %v4316_v46 = vor.u32 %v5437_v41, %v4315_v40  ;;  %1714 = vmatpush.bf16.msra.mxu1 %v4060_v45  ;;  %v5521_v40 = vld [vmem:[#allocation6 + $0x7c4] sm:$0xf]  ;;  %v3904_v45 = vor.u32 %v5329_v29, %v3901_v30 }
  0x3c   :  { %v5501_v43 = vld [vmem:[#allocation6 + $0x71c] sm:$0xf0]  ;;  %v4669_v41 = vld [vmem:[#allocation6 + $0x7e0] sm:$0xf0] }
  0x3d   :  { %v3771_v47 = vld [vmem:[#allocation6 + $0xc0] sm:$0xf]  ;;  %v4572_v50 = vor.u32 %v5501_v43, %v4571_v42  ;;  %1727 = vmatpush.bf16.msra.mxu2 %v4316_v46  ;;  %v409_v42 = vunpack.c.h.b16 %v139_v25  ;;  %v406_v43 = vunpack.c.l.b16 %v138_v37  ;;  %v407_v46 = vunpack.c.h.b16 %v138_v37  ;;  %v5297_v25 = vld [vmem:[#allocation6 + $0xc4] sm:$0xf] }
  0x3e   :  { %v5301_v48 = vld [vmem:[#allocation6 + $0xdc] sm:$0xf0]  ;;  %v4029_v29 = vld [vmem:[#allocation6 + $0x2e0] sm:$0xf0] }
  0x3f   :  { %v4027_v49 = vld [vmem:[#allocation6 + $0x2c0] sm:$0xf]  ;;  %v3772_v56 = vor.u32 %v5301_v48, %v3771_v47  ;;  %1740 = vmatpush.bf16.msra.mxu3 %v4572_v50  ;;  %v4160_v47 = vor.u32 %v5393_v31, %v4157_v32  ;;  %v4416_v48 = vor.u32 %v5457_v34, %v4413_v35  ;;  %v3869_v50 = vld [vmem:[#allocation6 + $0x1a0] sm:$0xf0] }
  0x40   :  { %v5365_v51 = vld [vmem:[#allocation6 + $0x2dc] sm:$0xf0]  ;;  %v5425_v30 = vld [vmem:[#allocation6 + $0x4c4] sm:$0xf] }
  0x41   :  { %v4283_v52 = vld [vmem:[#allocation6 + $0x4c0] sm:$0xf]  ;;  %v4028_v57 = vor.u32 %v5365_v51, %v4027_v49  ;;  %1702 = vmatpush.bf16.msra.mxu0 %v3772_v56  ;;  %v5321_v49 = vld [vmem:[#allocation6 + $0x184] sm:$0xf] }
  0x42   :  { %v5429_v53 = vld [vmem:[#allocation6 + $0x4dc] sm:$0xf0]  ;;  %v5385_v51 = vld [vmem:[#allocation6 + $0x384] sm:$0xf] }
  0x43   :  { %v4539_v54 = vld [vmem:[#allocation6 + $0x6c0] sm:$0xf]  ;;  %v4284_v58 = vor.u32 %v5429_v53, %v4283_v52  ;;  %1715 = vmatpush.bf16.msra.mxu1 %v4028_v57  ;;  %v4672_v52 = vor.u32 %v5521_v40, %v4669_v41  ;;  %v5972_v53 = vpack.c.b16 %v408_v36, %v408_v36  ;;  %v4381_v56 = vld [vmem:[#allocation6 + $0x5a0] sm:$0xf0]  ;;  %v5974_v57 = vpack.c.b16 %v409_v42, %v409_v42 }
  0x44   :  { %v5493_v55 = vld [vmem:[#allocation6 + $0x6dc] sm:$0xf0]  ;;  %v4285_v31 = vld [vmem:[#allocation6 + $0x4e0] sm:$0xf0] }
  0x45   :  { %v3739_v59 = vld [vmem:[#allocation6 + $0x80] sm:$0xf]  ;;  %v4540_v62 = vor.u32 %v5493_v55, %v4539_v54  ;;  %1728 = vmatpush.bf16.msra.mxu2 %v4284_v58  ;;  %v4125_v54 = vld [vmem:[#allocation6 + $0x3a0] sm:$0xf0]  ;;  %v4288_v36 = vor.u32 %v5425_v30, %v4285_v31  ;;  %v4387_v30 = vld [vmem:[#allocation6 + $0x588] sm:$0xf] }
  0x46   :  { %v5293_v60 = vld [vmem:[#allocation6 + $0x9c] sm:$0xf0]  ;;  %v5449_v55 = vld [vmem:[#allocation6 + $0x584] sm:$0xf]  ;;  %v5454_v31 = vld [vmem:[#allocation6 + $0x5a4] sm:$0xf0] }
  0x47   :  { %v3995_v61 = vld [vmem:[#allocation6 + $0x280] sm:$0xf]  ;;  %v3740_v4 = vor.u32 %v5293_v60, %v3739_v59  ;;  %1741 = vmatpush.bf16.msra.mxu3 %v4540_v62  ;;  %v5513_v58 = vld [vmem:[#allocation6 + $0x784] sm:$0xf]  ;;  %v5976_v60 = vpack.c.b16 %v406_v43, %v406_v43  ;;  %v5978_v62 = vpack.c.b16 %v407_v46, %v407_v46 }
  0x48   :  { %v5357_v63 = vld [vmem:[#allocation6 + $0x29c] sm:$0xf0]  ;;  %v4637_v59 = vld [vmem:[#allocation6 + $0x7a0] sm:$0xf0] }
  0x49   :  { %v4251_v0 = vld [vmem:[#allocation6 + $0x480] sm:$0xf]  ;;  %v3996_v5 = vor.u32 %v5357_v63, %v3995_v61  ;;  %1703 = vmatpush.bf16.msra.mxu0 %v3740_v4  ;;  %v3872_v61 = vor.u32 %v5321_v49, %v3869_v50  ;;  %v4128_v63 = vor.u32 %v5385_v51, %v4125_v54  ;;  %v4640_v4 = vor.u32 %v5513_v58, %v4637_v59  ;;  %v5489_v32 = vld [vmem:[#allocation6 + $0x6c4] sm:$0xf] }
  0x4a   :  { %v5421_v1 = vld [vmem:[#allocation6 + $0x49c] sm:$0xf0]  ;;  %v5289_v37 = vld [vmem:[#allocation6 + $0x84] sm:$0xf] }
  0x4b   :  { %v4507_v2 = vld [vmem:[#allocation6 + $0x680] sm:$0xf]  ;;  %v4252_v6 = vor.u32 %v5421_v1, %v4251_v0  ;;  %1716 = vmatpush.bf16.msra.mxu1 %v3996_v5  ;;  %v4384_v0 = vor.u32 %v5449_v55, %v4381_v56  ;;  %v5313_v1 = vld [vmem:[#allocation6 + $0x144] sm:$0xf] }
  0x4c   :  { %v5485_v3 = vld [vmem:[#allocation6 + $0x69c] sm:$0xf0]  ;;  %v4093_v5 = vld [vmem:[#allocation6 + $0x360] sm:$0xf0] }
  0x4d   :  { %v3707_v7 = vld [vmem:[#allocation6 + $0x40] sm:$0xf]  ;;  %v4508_v10 = vor.u32 %v5485_v3, %v4507_v2  ;;  %1729 = vmatpush.bf16.msra.mxu2 %v4252_v6  ;;  %v3837_v2 = vld [vmem:[#allocation6 + $0x160] sm:$0xf0] }
  0x4e   :  { %v5285_v8 = vld [vmem:[#allocation6 + $0x5c] sm:$0xf0]  ;;  %v5377_v3 = vld [vmem:[#allocation6 + $0x344] sm:$0xf] }
  0x4f   :  { %v3963_v9 = vld [vmem:[#allocation6 + $0x240] sm:$0xf]  ;;  %v3708_v17 = vor.u32 %v5285_v8, %v3707_v7  ;;  %1742 = vmatpush.bf16.msra.mxu3 %v4508_v10  ;;  %v5441_v6 = vld [vmem:[#allocation6 + $0x544] sm:$0xf]  ;;  %v3840_v10 = vor.u32 %v5313_v1, %v3837_v2 }
  0x50   :  { %v5349_v11 = vld [vmem:[#allocation6 + $0x25c] sm:$0xf0]  ;;  %v4349_v7 = vld [vmem:[#allocation6 + $0x560] sm:$0xf0] }
  0x51   :  { %v4219_v12 = vld [vmem:[#allocation6 + $0x440] sm:$0xf]  ;;  %v3964_v21 = vor.u32 %v5349_v11, %v3963_v9  ;;  %1704 = vmatpush.bf16.msra.mxu0 %v3708_v17  ;;  %v5505_v8 = vld [vmem:[#allocation6 + $0x744] sm:$0xf]  ;;  %v4096_v11 = vor.u32 %v5377_v3, %v4093_v5 }
  0x52   :  { %v5413_v13 = vld [vmem:[#allocation6 + $0x45c] sm:$0xf0]  ;;  %v4605_v9 = vld [vmem:[#allocation6 + $0x760] sm:$0xf0] }
  0x53   :  { %v4475_v14 = vld [vmem:[#allocation6 + $0x640] sm:$0xf]  ;;  %v4220_v22 = vor.u32 %v5413_v13, %v4219_v12  ;;  %1717 = vmatpush.bf16.msra.mxu1 %v3964_v21  ;;  %v4352_v12 = vor.u32 %v5441_v6, %v4349_v7  ;;  %v5305_v13 = vld [vmem:[#allocation6 + $0x104] sm:$0xf] }
  0x54   :  { %v5477_v15 = vld [vmem:[#allocation6 + $0x65c] sm:$0xf0]  ;;  %v4061_v17 = vld [vmem:[#allocation6 + $0x320] sm:$0xf0] }
  0x55   :  { %v3675_v16 = vld [vmem:[#allocation6] sm:$0xf]  ;;  %v4476_v26 = vor.u32 %v5477_v15, %v4475_v14  ;;  %1730 = vmatpush.bf16.msra.mxu2 %v4220_v22  ;;  %v3805_v14 = vld [vmem:[#allocation6 + $0x120] sm:$0xf0] }
  0x56   :  { %v5277_v18 = vld [vmem:[#allocation6 + $0x1c] sm:$0xf0]  ;;  %v5369_v15 = vld [vmem:[#allocation6 + $0x304] sm:$0xf]  ;;  %v3808_v22 = vor.u32 %v5305_v13, %v3805_v14  ;;  %v5398_v14 = vld [vmem:[#allocation6 + $0x3e4] sm:$0xf0] }
  0x57   :  { %v3931_v19 = vld [vmem:[#allocation6 + $0x200] sm:$0xf]  ;;  %v3676_v33 = vor.u32 %v5277_v18, %v3675_v16  ;;  %1743 = vmatpush.bf16.msra.mxu3 %v4476_v26  ;;  %v4608_v16 = vor.u32 %v5505_v8, %v4605_v9  ;;  %v5433_v18 = vld [vmem:[#allocation6 + $0x504] sm:$0xf] }
  0x58   :  { %v5341_v20 = vld [vmem:[#allocation6 + $0x21c] sm:$0xf0]  ;;  %v4573_v21 = vld [vmem:[#allocation6 + $0x720] sm:$0xf0] }
  0x59   :  { %v4187_v23 = vld [vmem:[#allocation6 + $0x400] sm:$0xf]  ;;  %v3932_v38 = vor.u32 %v5341_v20, %v3931_v19  ;;  %1705 = vmatpush.bf16.msra.mxu0 %v3676_v33  ;;  %v4317_v19 = vld [vmem:[#allocation6 + $0x520] sm:$0xf0] }
  0x5a   :  { %v5405_v24 = vld [vmem:[#allocation6 + $0x41c] sm:$0xf0]  ;;  %v5497_v20 = vld [vmem:[#allocation6 + $0x704] sm:$0xf] }
  0x5b   :  { %v4443_v27 = vld [vmem:[#allocation6 + $0x600] sm:$0xf]  ;;  %v4188_v39 = vor.u32 %v5405_v24, %v4187_v23  ;;  %1718 = vmatpush.bf16.msra.mxu1 %v3932_v38  ;;  %v4064_v23 = vor.u32 %v5369_v15, %v4061_v17  ;;  %v4320_v24 = vor.u32 %v5433_v18, %v4317_v19  ;;  %v3773_v26 = vld [vmem:[#allocation6 + $0xe0] sm:$0xf0]  ;;  %v4419_v15 = vld [vmem:[#allocation6 + $0x5c8] sm:$0xf] }
  0x5c   :  { %v5469_v28 = vld [vmem:[#allocation6 + $0x61c] sm:$0xf0]  ;;  %1706 = vmatmul.bf16.vlgmr.msra.gmra.mxu0 %v5976_v60  ;;  %v4541_v33 = vld [vmem:[#allocation6 + $0x6e0] sm:$0xf0]  ;;  %v3776_v34 = vor.u32 %v5297_v25, %v3773_v26  ;;  %v4675_v19 = vld [vmem:[#allocation6 + $0x7c8] sm:$0xf] }
  0x5d   :  { %v4444_v44 = vor.u32 %v5469_v28, %v4443_v27  ;;  %1731 = vmatpush.bf16.msra.mxu2 %v4188_v39  ;;  %1750 = vmatpush.bf16.msrb.mxu0 %v3904_v45  ;;  %v5361_v27 = vld [vmem:[#allocation6 + $0x2c4] sm:$0xf]  ;;  %v4576_v28 = vor.u32 %v5497_v20, %v4573_v21  ;;  %v4544_v40 = vor.u32 %v5489_v32, %v4541_v33  ;;  %v5526_v20 = vld [vmem:[#allocation6 + $0x7e4] sm:$0xf0] }
  0x5e   :  { %1719 = vmatmul.bf16.vlgmr.msra.gmra.mxu1 %v5978_v62  ;;  %v4032_v35 = vor.u32 %v5361_v27, %v4029_v29  ;;  %v3741_v38 = vld [vmem:[#allocation6 + $0xa0] sm:$0xf0]  ;;  %v3875_v25 = vld [vmem:[#allocation6 + $0x188] sm:$0xf] }
  0x5f   :  { %1744 = vmatpush.bf16.msra.mxu3 %v4444_v44  ;;  %1763 = vmatpush.bf16.msrb.mxu1 %v4160_v47  ;;  %v5353_v39 = vld [vmem:[#allocation6 + $0x284] sm:$0xf]  ;;  %v3744_v46 = vor.u32 %v5289_v37, %v3741_v38  ;;  %v5326_v26 = vld [vmem:[#allocation6 + $0x1a4] sm:$0xf0] }
  0x60   :  { %1732 = vmatmul.bf16.vlgmr.msra.gmra.mxu2 %v5972_v53  ;;  %v3997_v41 = vld [vmem:[#allocation6 + $0x2a0] sm:$0xf0]  ;;  %v4131_v27 = vld [vmem:[#allocation6 + $0x388] sm:$0xf] }
  0x61   :  { %1776 = vmatpush.bf16.msrb.mxu2 %v4416_v48  ;;  %1751 = vmatpush.bf16.msrb.mxu0 %v3872_v61  ;;  %v5417_v42 = vld [vmem:[#allocation6 + $0x484] sm:$0xf]  ;;  %v4000_v47 = vor.u32 %v5353_v39, %v3997_v41  ;;  %v5390_v29 = vld [vmem:[#allocation6 + $0x3a4] sm:$0xf0] }
  0x62   :  { %1745 = vmatmul.bf16.vlgmr.msra.gmra.mxu3 %v5974_v57  ;;  %v4253_v43 = vld [vmem:[#allocation6 + $0x4a0] sm:$0xf0]  ;;  %v4643_v32 = vld [vmem:[#allocation6 + $0x788] sm:$0xf] }
  0x63   :  { %1789 = vmatpush.bf16.msrb.mxu3 %v4672_v52  ;;  %1764 = vmatpush.bf16.msrb.mxu1 %v4128_v63  ;;  %v5481_v44 = vld [vmem:[#allocation6 + $0x684] sm:$0xf]  ;;  %v4256_v48 = vor.u32 %v5417_v42, %v4253_v43  ;;  %v5518_v33 = vld [vmem:[#allocation6 + $0x7a4] sm:$0xf0] }
  0x64   :  { %v4509_v45 = vld [vmem:[#allocation6 + $0x6a0] sm:$0xf0]  ;;  %v3843_v37 = vld [vmem:[#allocation6 + $0x148] sm:$0xf] }
  0x65   :  { %1777 = vmatpush.bf16.msrb.mxu2 %v4384_v0  ;;  %1752 = vmatpush.bf16.msrb.mxu0 %v3840_v10  ;;  %v5281_v49 = vld [vmem:[#allocation6 + $0x44] sm:$0xf]  ;;  %v4512_v52 = vor.u32 %v5481_v44, %v4509_v45  ;;  %v3907_v10 = vld [vmem:[#allocation6 + $0x1c8] sm:$0xf] }
  0x66   :  { %v3709_v50 = vld [vmem:[#allocation6 + $0x60] sm:$0xf0]  ;;  %v5318_v38 = vld [vmem:[#allocation6 + $0x164] sm:$0xf0] }
  0x67   :  { %1790 = vmatpush.bf16.msrb.mxu3 %v4640_v4  ;;  %1765 = vmatpush.bf16.msrb.mxu1 %v4096_v11  ;;  %v5345_v51 = vld [vmem:[#allocation6 + $0x244] sm:$0xf]  ;;  %v3712_v61 = vor.u32 %v5281_v49, %v3709_v50  ;;  %v5334_v11 = vld [vmem:[#allocation6 + $0x1e4] sm:$0xf0] }
  0x68   :  { %v3965_v54 = vld [vmem:[#allocation6 + $0x260] sm:$0xf0]  ;;  %v4099_v39 = vld [vmem:[#allocation6 + $0x348] sm:$0xf] }
  0x69   :  { %1778 = vmatpush.bf16.msrb.mxu2 %v4352_v12  ;;  %1753 = vmatpush.bf16.msrb.mxu0 %v3808_v22  ;;  %v5409_v55 = vld [vmem:[#allocation6 + $0x444] sm:$0xf]  ;;  %v3968_v1 = vor.u32 %v5345_v51, %v3965_v54  ;;  %v4163_v12 = vld [vmem:[#allocation6 + $0x3c8] sm:$0xf]  ;;  %v3908_v22 = vor.u32 %v5334_v11, %v3907_v10 }
  0x6a   :  { %v4221_v56 = vld [vmem:[#allocation6 + $0x460] sm:$0xf0]  ;;  %v5382_v41 = vld [vmem:[#allocation6 + $0x364] sm:$0xf0] }
  0x6b   :  { %1791 = vmatpush.bf16.msrb.mxu3 %v4608_v16  ;;  %1766 = vmatpush.bf16.msrb.mxu1 %v4064_v23  ;;  %v5473_v58 = vld [vmem:[#allocation6 + $0x644] sm:$0xf]  ;;  %v4224_v2 = vor.u32 %v5409_v55, %v4221_v56  ;;  %v5462_v16 = vld [vmem:[#allocation6 + $0x5e4] sm:$0xf0]  ;;  %v4164_v23 = vor.u32 %v5398_v14, %v4163_v12 }
  0x6c   :  { %v4477_v59 = vld [vmem:[#allocation6 + $0x660] sm:$0xf0]  ;;  %v4355_v42 = vld [vmem:[#allocation6 + $0x548] sm:$0xf] }
  0x6d   :  { %1779 = vmatpush.bf16.msrb.mxu2 %v4320_v24  ;;  %1754 = vmatpush.bf16.msrb.mxu0 %v3776_v34  ;;  %v5273_v63 = vld [vmem:[#allocation6 + $0x4] sm:$0xf]  ;;  %v4480_v6 = vor.u32 %v5473_v58, %v4477_v59  ;;  %v4420_v24 = vor.u32 %v5462_v16, %v4419_v15  ;;  %v3876_v34 = vor.u32 %v5326_v26, %v3875_v25  ;;  %v5446_v43 = vld [vmem:[#allocation6 + $0x564] sm:$0xf0] }
  0x6e   :  { %v3677_v0 = vld [vmem:[#allocation6 + $0x20] sm:$0xf0]  ;;  %v4611_v44 = vld [vmem:[#allocation6 + $0x748] sm:$0xf] }
  0x6f   :  { %1792 = vmatpush.bf16.msrb.mxu3 %v4576_v28  ;;  %1767 = vmatpush.bf16.msrb.mxu1 %v4032_v35  ;;  %v5337_v3 = vld [vmem:[#allocation6 + $0x204] sm:$0xf]  ;;  %v3680_v13 = vor.u32 %v5273_v63, %v3677_v0  ;;  %v4676_v28 = vor.u32 %v5526_v20, %v4675_v19  ;;  %v4132_v35 = vor.u32 %v5390_v29, %v4131_v27  ;;  %v5510_v45 = vld [vmem:[#allocation6 + $0x764] sm:$0xf0] }
  0x70   :  { %v3933_v4 = vld [vmem:[#allocation6 + $0x220] sm:$0xf0]  ;;  %v3811_v49 = vld [vmem:[#allocation6 + $0x108] sm:$0xf] }
  0x71   :  { %1780 = vmatpush.bf16.msrb.mxu2 %v4288_v36  ;;  %1755 = vmatpush.bf16.msrb.mxu0 %v3744_v46  ;;  %v5401_v5 = vld [vmem:[#allocation6 + $0x404] sm:$0xf]  ;;  %v3936_v17 = vor.u32 %v5337_v3, %v3933_v4  ;;  %v4388_v36 = vor.u32 %v5454_v31, %v4387_v30  ;;  %v3844_v46 = vor.u32 %v5318_v38, %v3843_v37  ;;  %v5310_v50 = vld [vmem:[#allocation6 + $0x124] sm:$0xf0] }
  0x72   :  { %v4189_v7 = vld [vmem:[#allocation6 + $0x420] sm:$0xf0]  ;;  %v4067_v51 = vld [vmem:[#allocation6 + $0x308] sm:$0xf] }
  0x73   :  { %1793 = vmatpush.bf16.msrb.mxu3 %v4544_v40  ;;  %1768 = vmatpush.bf16.msrb.mxu1 %v4000_v47  ;;  %v5465_v8 = vld [vmem:[#allocation6 + $0x604] sm:$0xf]  ;;  %v4192_v18 = vor.u32 %v5401_v5, %v4189_v7  ;;  %v4644_v40 = vor.u32 %v5518_v33, %v4643_v32  ;;  %v4100_v47 = vor.u32 %v5382_v41, %v4099_v39  ;;  %v5374_v54 = vld [vmem:[#allocation6 + $0x324] sm:$0xf0] }
  0x74   :  { %v4445_v9 = vld [vmem:[#allocation6 + $0x620] sm:$0xf0]  ;;  %v4323_v55 = vld [vmem:[#allocation6 + $0x508] sm:$0xf]  ;;  %v4068_v63 = vor.u32 %v5374_v54, %v4067_v51  ;;  %v5458_v51 = vld [vmem:[#allocation6 + $0x5cc] sm:$0xf] }
  0x75   :  { %1781 = vmatpush.bf16.msrb.mxu2 %v4256_v48  ;;  %1756 = vmatpush.bf16.msrb.mxu0 %v3712_v61  ;;  %v4448_v21 = vor.u32 %v5465_v8, %v4445_v9  ;;  %v4356_v48 = vor.u32 %v5446_v43, %v4355_v42  ;;  %v5438_v56 = vld [vmem:[#allocation6 + $0x524] sm:$0xf0]  ;;  %v3812_v61 = vor.u32 %v5310_v50, %v3811_v49  ;;  %v4165_v50 = vld [vmem:[#allocation6 + $0x3e8] sm:$0xf0] }
  0x76   :  { %v4579_v58 = vld [vmem:[#allocation6 + $0x708] sm:$0xf]  ;;  %v4324_v0 = vor.u32 %v5438_v56, %v4323_v55  ;;  %v5522_v56 = vld [vmem:[#allocation6 + $0x7cc] sm:$0xf] }
  0x77   :  { %1794 = vmatpush.bf16.msrb.mxu3 %v4512_v52  ;;  %1769 = vmatpush.bf16.msrb.mxu1 %v3968_v1  ;;  %v4612_v52 = vor.u32 %v5510_v45, %v4611_v44  ;;  %v5502_v59 = vld [vmem:[#allocation6 + $0x724] sm:$0xf0] }
  0x78   :  { %v3779_v1 = vld [vmem:[#allocation6 + $0xc8] sm:$0xf]  ;;  %v4580_v4 = vor.u32 %v5502_v59, %v4579_v58  ;;  %v4677_v58 = vld [vmem:[#allocation6 + $0x7e8] sm:$0xf0] }
  0x79   :  { %1782 = vmatpush.bf16.msrb.mxu2 %v4224_v2  ;;  %1757 = vmatpush.bf16.msrb.mxu0 %v3680_v13  ;;  %v5302_v2 = vld [vmem:[#allocation6 + $0xe4] sm:$0xf0] }
  0x7a   :  { %v4035_v3 = vld [vmem:[#allocation6 + $0x2c8] sm:$0xf]  ;;  %v3780_v10 = vor.u32 %v5302_v2, %v3779_v1  ;;  %v5322_v1 = vld [vmem:[#allocation6 + $0x18c] sm:$0xf] }
  0x7b   :  { %1795 = vmatpush.bf16.msrb.mxu3 %v4480_v6  ;;  %1770 = vmatpush.bf16.msrb.mxu1 %v3936_v17  ;;  %v5366_v5 = vld [vmem:[#allocation6 + $0x2e4] sm:$0xf0]  ;;  %v3877_v2 = vld [vmem:[#allocation6 + $0x1a8] sm:$0xf0] }
  0x7c   :  { %1758 = vmatmul.bf16.vlgmr.msrb.gmra.mxu0 %v5976_v60  ;;  %v4291_v6 = vld [vmem:[#allocation6 + $0x4c8] sm:$0xf]  ;;  %v4036_v11 = vor.u32 %v5366_v5, %v4035_v3  ;;  %v5386_v3 = vld [vmem:[#allocation6 + $0x38c] sm:$0xf] }
  0x7d   :  { %1783 = vmatpush.bf16.msrb.mxu2 %v4192_v18  ;;  %1802 = vmatpush.bf16.msra.mxu0 %v3908_v22  ;;  %v5430_v7 = vld [vmem:[#allocation6 + $0x4e4] sm:$0xf0]  ;;  %v4133_v5 = vld [vmem:[#allocation6 + $0x3a8] sm:$0xf0] }
  0x7e   :  { %1771 = vmatmul.bf16.vlgmr.msrb.gmra.mxu1 %v5978_v62  ;;  %v4547_v8 = vld [vmem:[#allocation6 + $0x6c8] sm:$0xf]  ;;  %v4292_v12 = vor.u32 %v5430_v7, %v4291_v6  ;;  %v5450_v6 = vld [vmem:[#allocation6 + $0x58c] sm:$0xf] }
  0x7f   :  { %1796 = vmatpush.bf16.msrb.mxu3 %v4448_v21  ;;  %1815 = vmatpush.bf16.msra.mxu1 %v4164_v23  ;;  %v5494_v9 = vld [vmem:[#allocation6 + $0x6e4] sm:$0xf0]  ;;  %v4389_v7 = vld [vmem:[#allocation6 + $0x5a8] sm:$0xf0] }
  0x80   :  { %1784 = vmatmul.bf16.vlgmr.msrb.gmra.mxu2 %v5972_v53  ;;  %v3747_v13 = vld [vmem:[#allocation6 + $0x88] sm:$0xf]  ;;  %v4548_v16 = vor.u32 %v5494_v9, %v4547_v8  ;;  %v5514_v8 = vld [vmem:[#allocation6 + $0x78c] sm:$0xf] }
  0x81   :  { %1828 = vmatpush.bf16.msra.mxu2 %v4420_v24  ;;  %1803 = vmatpush.bf16.msra.mxu0 %v3876_v34  ;;  %v5294_v14 = vld [vmem:[#allocation6 + $0xa4] sm:$0xf0]  ;;  %v4645_v9 = vld [vmem:[#allocation6 + $0x7a8] sm:$0xf0] }
  0x82   :  { %1797 = vmatmul.bf16.vlgmr.msrb.gmra.mxu3 %v5974_v57  ;;  %v4003_v15 = vld [vmem:[#allocation6 + $0x288] sm:$0xf]  ;;  %v3748_v22 = vor.u32 %v5294_v14, %v3747_v13  ;;  %v5314_v13 = vld [vmem:[#allocation6 + $0x14c] sm:$0xf] }
  0x83   :  { %1841 = vmatpush.bf16.msra.mxu3 %v4676_v28  ;;  %1816 = vmatpush.bf16.msra.mxu1 %v4132_v35  ;;  %v5358_v17 = vld [vmem:[#allocation6 + $0x2a4] sm:$0xf0]  ;;  %v3845_v14 = vld [vmem:[#allocation6 + $0x168] sm:$0xf0] }
  0x84   :  { %v4259_v18 = vld [vmem:[#allocation6 + $0x488] sm:$0xf]  ;;  %v4004_v23 = vor.u32 %v5358_v17, %v4003_v15  ;;  %v5378_v15 = vld [vmem:[#allocation6 + $0x34c] sm:$0xf] }
  0x85   :  { %1829 = vmatpush.bf16.msra.mxu2 %v4388_v36  ;;  %1804 = vmatpush.bf16.msra.mxu0 %v3844_v46  ;;  %v5422_v19 = vld [vmem:[#allocation6 + $0x4a4] sm:$0xf0]  ;;  %v5330_v46 = vld [vmem:[#allocation6 + $0x1cc] sm:$0xf] }
  0x86   :  { %v4515_v20 = vld [vmem:[#allocation6 + $0x688] sm:$0xf]  ;;  %v4260_v24 = vor.u32 %v5422_v19, %v4259_v18  ;;  %v4101_v17 = vld [vmem:[#allocation6 + $0x368] sm:$0xf0] }
  0x87   :  { %1842 = vmatpush.bf16.msra.mxu3 %v4644_v40  ;;  %1817 = vmatpush.bf16.msra.mxu1 %v4100_v47  ;;  %v5486_v21 = vld [vmem:[#allocation6 + $0x6a4] sm:$0xf0]  ;;  %v3909_v47 = vld [vmem:[#allocation6 + $0x1e8] sm:$0xf0] }
  0x88   :  { %v3715_v25 = vld [vmem:[#allocation6 + $0x48] sm:$0xf]  ;;  %v4516_v28 = vor.u32 %v5486_v21, %v4515_v20  ;;  %v5442_v18 = vld [vmem:[#allocation6 + $0x54c] sm:$0xf] }
  0x89   :  { %1830 = vmatpush.bf16.msra.mxu2 %v4356_v48  ;;  %1805 = vmatpush.bf16.msra.mxu0 %v3812_v61  ;;  %v5286_v26 = vld [vmem:[#allocation6 + $0x64] sm:$0xf0]  ;;  %v5394_v48 = vld [vmem:[#allocation6 + $0x3cc] sm:$0xf]  ;;  %v3912_v61 = vor.u32 %v5330_v46, %v3909_v47 }
  0x8a   :  { %v3971_v27 = vld [vmem:[#allocation6 + $0x248] sm:$0xf]  ;;  %v3716_v34 = vor.u32 %v5286_v26, %v3715_v25  ;;  %v4357_v19 = vld [vmem:[#allocation6 + $0x568] sm:$0xf0] }
  0x8b   :  { %1843 = vmatpush.bf16.msra.mxu3 %v4612_v52  ;;  %1818 = vmatpush.bf16.msra.mxu1 %v4068_v63  ;;  %v5350_v29 = vld [vmem:[#allocation6 + $0x264] sm:$0xf0]  ;;  %v4421_v52 = vld [vmem:[#allocation6 + $0x5e8] sm:$0xf0]  ;;  %v4168_v63 = vor.u32 %v5394_v48, %v4165_v50 }
  0x8c   :  { %v4227_v30 = vld [vmem:[#allocation6 + $0x448] sm:$0xf]  ;;  %v3972_v37 = vor.u32 %v5350_v29, %v3971_v27  ;;  %v5506_v20 = vld [vmem:[#allocation6 + $0x74c] sm:$0xf] }
  0x8d   :  { %1831 = vmatpush.bf16.msra.mxu2 %v4324_v0  ;;  %1806 = vmatpush.bf16.msra.mxu0 %v3780_v10  ;;  %v5414_v31 = vld [vmem:[#allocation6 + $0x464] sm:$0xf0]  ;;  %v4424_v0 = vor.u32 %v5458_v51, %v4421_v52  ;;  %v3880_v10 = vor.u32 %v5322_v1, %v3877_v2  ;;  %v4613_v21 = vld [vmem:[#allocation6 + $0x768] sm:$0xf0] }
  0x8e   :  { %v4483_v32 = vld [vmem:[#allocation6 + $0x648] sm:$0xf]  ;;  %v4228_v38 = vor.u32 %v5414_v31, %v4227_v30  ;;  %v5306_v25 = vld [vmem:[#allocation6 + $0x10c] sm:$0xf] }
  0x8f   :  { %1844 = vmatpush.bf16.msra.mxu3 %v4580_v4  ;;  %1819 = vmatpush.bf16.msra.mxu1 %v4036_v11  ;;  %v5478_v33 = vld [vmem:[#allocation6 + $0x664] sm:$0xf0]  ;;  %v4680_v4 = vor.u32 %v5522_v56, %v4677_v58  ;;  %v4136_v11 = vor.u32 %v5386_v3, %v4133_v5  ;;  %v3813_v26 = vld [vmem:[#allocation6 + $0x128] sm:$0xf0] }
  0x90   :  { %v3683_v35 = vld [vmem:[#allocation6 + $0x8] sm:$0xf]  ;;  %v4484_v42 = vor.u32 %v5478_v33, %v4483_v32  ;;  %v5370_v27 = vld [vmem:[#allocation6 + $0x30c] sm:$0xf] }
  0x91   :  { %1832 = vmatpush.bf16.msra.mxu2 %v4292_v12  ;;  %1807 = vmatpush.bf16.msra.mxu0 %v3748_v22  ;;  %v5278_v36 = vld [vmem:[#allocation6 + $0x24] sm:$0xf0]  ;;  %v4392_v12 = vor.u32 %v5450_v6, %v4389_v7  ;;  %v3848_v22 = vor.u32 %v5314_v13, %v3845_v14  ;;  %v4069_v29 = vld [vmem:[#allocation6 + $0x328] sm:$0xf0] }
  0x92   :  { %v3939_v39 = vld [vmem:[#allocation6 + $0x208] sm:$0xf]  ;;  %v3684_v49 = vor.u32 %v5278_v36, %v3683_v35  ;;  %v5434_v30 = vld [vmem:[#allocation6 + $0x50c] sm:$0xf]  ;;  %v4072_v35 = vor.u32 %v5370_v27, %v4069_v29  ;;  %v4427_v27 = vld [vmem:[#allocation6 + $0x5d0] sm:$0xf] }
  0x93   :  { %1845 = vmatpush.bf16.msra.mxu3 %v4548_v16  ;;  %1820 = vmatpush.bf16.msra.mxu1 %v4004_v23  ;;  %v5342_v40 = vld [vmem:[#allocation6 + $0x224] sm:$0xf0]  ;;  %v4648_v16 = vor.u32 %v5514_v8, %v4645_v9  ;;  %v4104_v23 = vor.u32 %v5378_v15, %v4101_v17  ;;  %v4325_v31 = vld [vmem:[#allocation6 + $0x528] sm:$0xf0] }
  0x94   :  { %v4195_v41 = vld [vmem:[#allocation6 + $0x408] sm:$0xf]  ;;  %v3940_v54 = vor.u32 %v5342_v40, %v3939_v39  ;;  %v5498_v32 = vld [vmem:[#allocation6 + $0x70c] sm:$0xf]  ;;  %v4328_v36 = vor.u32 %v5434_v30, %v4325_v31  ;;  %v4683_v31 = vld [vmem:[#allocation6 + $0x7d0] sm:$0xf] }
  0x95   :  { %1833 = vmatpush.bf16.msra.mxu2 %v4260_v24  ;;  %v5406_v43 = vld [vmem:[#allocation6 + $0x424] sm:$0xf0]  ;;  %1808 = vmatpush.bf16.msra.mxu0 %v3716_v34  ;;  %v4360_v24 = vor.u32 %v5442_v18, %v4357_v19  ;;  %v4581_v33 = vld [vmem:[#allocation6 + $0x728] sm:$0xf0]  ;;  %v3816_v34 = vor.u32 %v5306_v25, %v3813_v26  ;;  %v5399_v26 = vld [vmem:[#allocation6 + $0x3ec] sm:$0xf0] }
  0x96   :  { %v4451_v44 = vld [vmem:[#allocation6 + $0x608] sm:$0xf]  ;;  %v4196_v55 = vor.u32 %v5406_v43, %v4195_v41  ;;  %v5362_v39 = vld [vmem:[#allocation6 + $0x2cc] sm:$0xf]  ;;  %v4584_v40 = vor.u32 %v5498_v32, %v4581_v33  ;;  %v5527_v32 = vld [vmem:[#allocation6 + $0x7ec] sm:$0xf0] }
  0x97   :  { %1846 = vmatpush.bf16.msra.mxu3 %v4516_v28  ;;  %v5470_v45 = vld [vmem:[#allocation6 + $0x624] sm:$0xf0]  ;;  %1821 = vmatpush.bf16.msra.mxu1 %v3972_v37  ;;  %v4616_v28 = vor.u32 %v5506_v20, %v4613_v21  ;;  %v5298_v37 = vld [vmem:[#allocation6 + $0xcc] sm:$0xf] }
  0x98   :  { %v4452_v59 = vor.u32 %v5470_v45, %v4451_v44  ;;  %v4037_v41 = vld [vmem:[#allocation6 + $0x2e8] sm:$0xf0] }
  0x99   :  { %1834 = vmatpush.bf16.msra.mxu2 %v4228_v38  ;;  %1809 = vmatpush.bf16.msra.mxu0 %v3684_v49  ;;  %v3781_v38 = vld [vmem:[#allocation6 + $0xe8] sm:$0xf0]  ;;  %v4040_v47 = vor.u32 %v5362_v39, %v4037_v41  ;;  %v4139_v39 = vld [vmem:[#allocation6 + $0x390] sm:$0xf] }
  0x9a   :  { %v4293_v43 = vld [vmem:[#allocation6 + $0x4e8] sm:$0xf0]  ;;  %v3784_v46 = vor.u32 %v5298_v37, %v3781_v38  ;;  %v3883_v37 = vld [vmem:[#allocation6 + $0x190] sm:$0xf] }
  0x9b   :  { %1847 = vmatpush.bf16.msra.mxu3 %v4484_v42  ;;  %1822 = vmatpush.bf16.msra.mxu1 %v3940_v54  ;;  %v5426_v42 = vld [vmem:[#allocation6 + $0x4cc] sm:$0xf]  ;;  %v5327_v38 = vld [vmem:[#allocation6 + $0x1ac] sm:$0xf0] }
  0x9c   :  { %1810 = vmatmul.bf16.vlgmr.msra.gmra.mxu0 %v5976_v60  ;;  %v5490_v44 = vld [vmem:[#allocation6 + $0x6cc] sm:$0xf]  ;;  %v4296_v48 = vor.u32 %v5426_v42, %v4293_v43  ;;  %v5391_v41 = vld [vmem:[#allocation6 + $0x3ac] sm:$0xf0] }
  0x9d   :  { %1835 = vmatpush.bf16.msra.mxu2 %v4196_v55  ;;  %1854 = vmatpush.bf16.msrb.mxu0 %v3912_v61  ;;  %v4549_v45 = vld [vmem:[#allocation6 + $0x6e8] sm:$0xf0]  ;;  %v4395_v42 = vld [vmem:[#allocation6 + $0x590] sm:$0xf] }
  0x9e   :  { %1823 = vmatmul.bf16.vlgmr.msra.gmra.mxu1 %v5978_v62  ;;  %v5290_v49 = vld [vmem:[#allocation6 + $0x8c] sm:$0xf]  ;;  %v4552_v52 = vor.u32 %v5490_v44, %v4549_v45  ;;  %v5455_v43 = vld [vmem:[#allocation6 + $0x5ac] sm:$0xf0] }
  0x9f   :  { %1848 = vmatpush.bf16.msra.mxu3 %v4452_v59  ;;  %1867 = vmatpush.bf16.msrb.mxu1 %v4168_v63  ;;  %v3749_v50 = vld [vmem:[#allocation6 + $0xa8] sm:$0xf0]  ;;  %v4651_v44 = vld [vmem:[#allocation6 + $0x790] sm:$0xf] }
  0xa0   :  { %1836 = vmatmul.bf16.vlgmr.msra.gmra.mxu2 %v5972_v53  ;;  %v5354_v51 = vld [vmem:[#allocation6 + $0x28c] sm:$0xf]  ;;  %v3752_v61 = vor.u32 %v5290_v49, %v3749_v50  ;;  %v5519_v45 = vld [vmem:[#allocation6 + $0x7ac] sm:$0xf0] }
  0xa1   :  { %1880 = vmatpush.bf16.msrb.mxu2 %v4424_v0  ;;  %1855 = vmatpush.bf16.msrb.mxu0 %v3880_v10  ;;  %v4005_v54 = vld [vmem:[#allocation6 + $0x2a8] sm:$0xf0]  ;;  %v3851_v49 = vld [vmem:[#allocation6 + $0x150] sm:$0xf] }
  0xa2   :  { %1849 = vmatmul.bf16.vlgmr.msra.gmra.mxu3 %v5974_v57  ;;  %v5418_v55 = vld [vmem:[#allocation6 + $0x48c] sm:$0xf]  ;;  %v4008_v63 = vor.u32 %v5354_v51, %v4005_v54  ;;  %v5319_v50 = vld [vmem:[#allocation6 + $0x16c] sm:$0xf0] }
  0xa3   :  { %1893 = vmatpush.bf16.msrb.mxu3 %v4680_v4  ;;  %1868 = vmatpush.bf16.msrb.mxu1 %v4136_v11  ;;  %v4261_v56 = vld [vmem:[#allocation6 + $0x4a8] sm:$0xf0]  ;;  %v4107_v51 = vld [vmem:[#allocation6 + $0x350] sm:$0xf] }
  0xa4   :  { %v5482_v58 = vld [vmem:[#allocation6 + $0x68c] sm:$0xf]  ;;  %v4264_v0 = vor.u32 %v5418_v55, %v4261_v56  ;;  %v5383_v54 = vld [vmem:[#allocation6 + $0x36c] sm:$0xf0] }
  0xa5   :  { %1881 = vmatpush.bf16.msrb.mxu2 %v4392_v12  ;;  %1856 = vmatpush.bf16.msrb.mxu0 %v3848_v22  ;;  %v4517_v59 = vld [vmem:[#allocation6 + $0x6a8] sm:$0xf0]  ;;  %v3915_v22 = vld [vmem:[#allocation6 + $0x1d0] sm:$0xf] }
  0xa6   :  { %v5282_v1 = vld [vmem:[#allocation6 + $0x4c] sm:$0xf]  ;;  %v4520_v4 = vor.u32 %v5482_v58, %v4517_v59  ;;  %v4363_v55 = vld [vmem:[#allocation6 + $0x550] sm:$0xf] }
  0xa7   :  { %1894 = vmatpush.bf16.msrb.mxu3 %v4648_v16  ;;  %1869 = vmatpush.bf16.msrb.mxu1 %v4104_v23  ;;  %v3717_v2 = vld [vmem:[#allocation6 + $0x68] sm:$0xf0]  ;;  %v5335_v23 = vld [vmem:[#allocation6 + $0x1ec] sm:$0xf0] }
  0xa8   :  { %v5346_v3 = vld [vmem:[#allocation6 + $0x24c] sm:$0xf]  ;;  %v3720_v10 = vor.u32 %v5282_v1, %v3717_v2  ;;  %v5447_v56 = vld [vmem:[#allocation6 + $0x56c] sm:$0xf0] }
  0xa9   :  { %1882 = vmatpush.bf16.msrb.mxu2 %v4360_v24  ;;  %1857 = vmatpush.bf16.msrb.mxu0 %v3816_v34  ;;  %v3973_v5 = vld [vmem:[#allocation6 + $0x268] sm:$0xf0]  ;;  %v4171_v24 = vld [vmem:[#allocation6 + $0x3d0] sm:$0xf]  ;;  %v3916_v34 = vor.u32 %v5335_v23, %v3915_v22 }
  0xaa   :  { %v5410_v6 = vld [vmem:[#allocation6 + $0x44c] sm:$0xf]  ;;  %v3976_v13 = vor.u32 %v5346_v3, %v3973_v5  ;;  %v4619_v58 = vld [vmem:[#allocation6 + $0x750] sm:$0xf] }
  0xab   :  { %1895 = vmatpush.bf16.msrb.mxu3 %v4616_v28  ;;  %1870 = vmatpush.bf16.msrb.mxu1 %v4072_v35  ;;  %v4229_v7 = vld [vmem:[#allocation6 + $0x468] sm:$0xf0]  ;;  %v5463_v28 = vld [vmem:[#allocation6 + $0x5ec] sm:$0xf0]  ;;  %v4172_v35 = vor.u32 %v5399_v26, %v4171_v24 }
  0xac   :  { %v5474_v8 = vld [vmem:[#allocation6 + $0x64c] sm:$0xf]  ;;  %v4232_v14 = vor.u32 %v5410_v6, %v4229_v7  ;;  %v5511_v59 = vld [vmem:[#allocation6 + $0x76c] sm:$0xf0] }
  0xad   :  { %1883 = vmatpush.bf16.msrb.mxu2 %v4328_v36  ;;  %1858 = vmatpush.bf16.msrb.mxu0 %v3784_v46  ;;  %v4485_v9 = vld [vmem:[#allocation6 + $0x668] sm:$0xf0]  ;;  %v4428_v36 = vor.u32 %v5463_v28, %v4427_v27  ;;  %v3884_v46 = vor.u32 %v5327_v38, %v3883_v37  ;;  %v3819_v1 = vld [vmem:[#allocation6 + $0x110] sm:$0xf] }
  0xae   :  { %v5274_v11 = vld [vmem:[#allocation6 + $0xc] sm:$0xf]  ;;  %v4488_v18 = vor.u32 %v5474_v8, %v4485_v9  ;;  %v5311_v2 = vld [vmem:[#allocation6 + $0x12c] sm:$0xf0] }
  0xaf   :  { %1896 = vmatpush.bf16.msrb.mxu3 %v4584_v40  ;;  %1871 = vmatpush.bf16.msrb.mxu1 %v4040_v47  ;;  %v3685_v12 = vld [vmem:[#allocation6 + $0x28] sm:$0xf0]  ;;  %v4684_v40 = vor.u32 %v5527_v32, %v4683_v31  ;;  %v4140_v47 = vor.u32 %v5391_v41, %v4139_v39  ;;  %v4075_v3 = vld [vmem:[#allocation6 + $0x310] sm:$0xf] }
  0xb0   :  { %v5338_v15 = vld [vmem:[#allocation6 + $0x20c] sm:$0xf]  ;;  %v3688_v25 = vor.u32 %v5274_v11, %v3685_v12  ;;  %v5375_v5 = vld [vmem:[#allocation6 + $0x32c] sm:$0xf0] }
  0xb1   :  { %1884 = vmatpush.bf16.msrb.mxu2 %v4296_v48  ;;  %1859 = vmatpush.bf16.msrb.mxu0 %v3752_v61  ;;  %v3941_v16 = vld [vmem:[#allocation6 + $0x228] sm:$0xf0]  ;;  %v4396_v48 = vor.u32 %v5455_v43, %v4395_v42  ;;  %v3852_v61 = vor.u32 %v5319_v50, %v3851_v49  ;;  %v4331_v6 = vld [vmem:[#allocation6 + $0x510] sm:$0xf]  ;;  %v4076_v11 = vor.u32 %v5375_v5, %v4075_v3  ;;  %v5459_v3 = vld [vmem:[#allocation6 + $0x5d4] sm:$0xf] }
  0xb2   :  { %v5402_v17 = vld [vmem:[#allocation6 + $0x40c] sm:$0xf]  ;;  %v3944_v29 = vor.u32 %v5338_v15, %v3941_v16  ;;  %v5439_v7 = vld [vmem:[#allocation6 + $0x52c] sm:$0xf0] }
  0xb3   :  { %1897 = vmatpush.bf16.msrb.mxu3 %v4552_v52  ;;  %1872 = vmatpush.bf16.msrb.mxu1 %v4008_v63  ;;  %v4197_v19 = vld [vmem:[#allocation6 + $0x428] sm:$0xf0]  ;;  %v4652_v52 = vor.u32 %v5519_v45, %v4651_v44  ;;  %v4108_v63 = vor.u32 %v5383_v54, %v4107_v51  ;;  %v4587_v8 = vld [vmem:[#allocation6 + $0x710] sm:$0xf]  ;;  %v4332_v12 = vor.u32 %v5439_v7, %v4331_v6  ;;  %v5523_v7 = vld [vmem:[#allocation6 + $0x7d4] sm:$0xf] }
  0xb4   :  { %v5466_v20 = vld [vmem:[#allocation6 + $0x60c] sm:$0xf]  ;;  %v4200_v30 = vor.u32 %v5402_v17, %v4197_v19  ;;  %v5503_v9 = vld [vmem:[#allocation6 + $0x72c] sm:$0xf0] }
  0xb5   :  { %1885 = vmatpush.bf16.msrb.mxu2 %v4264_v0  ;;  %v4453_v21 = vld [vmem:[#allocation6 + $0x628] sm:$0xf0]  ;;  %1860 = vmatpush.bf16.msrb.mxu0 %v3720_v10  ;;  %v4364_v0 = vor.u32 %v5447_v56, %v4363_v55  ;;  %v3820_v10 = vor.u32 %v5311_v2, %v3819_v1  ;;  %v4043_v15 = vld [vmem:[#allocation6 + $0x2d0] sm:$0xf]  ;;  %v4588_v16 = vor.u32 %v5503_v9, %v4587_v8  ;;  %v4173_v2 = vld [vmem:[#allocation6 + $0x3f0] sm:$0xf0] }
  0xb6   :  { %v4456_v33 = vor.u32 %v5466_v20, %v4453_v21  ;;  %v5367_v17 = vld [vmem:[#allocation6 + $0x2ec] sm:$0xf0]  ;;  %v4685_v8 = vld [vmem:[#allocation6 + $0x7f0] sm:$0xf0] }
  0xb7   :  { %1898 = vmatpush.bf16.msrb.mxu3 %v4520_v4  ;;  %1873 = vmatpush.bf16.msrb.mxu1 %v3976_v13  ;;  %v4620_v4 = vor.u32 %v5511_v59, %v4619_v58  ;;  %v3787_v13 = vld [vmem:[#allocation6 + $0xd0] sm:$0xf]  ;;  %v4044_v23 = vor.u32 %v5367_v17, %v4043_v15  ;;  %v5387_v15 = vld [vmem:[#allocation6 + $0x394] sm:$0xf] }
  0xb8   :  { %v5431_v19 = vld [vmem:[#allocation6 + $0x4ec] sm:$0xf0]  ;;  %v4141_v17 = vld [vmem:[#allocation6 + $0x3b0] sm:$0xf0] }
  0xb9   :  { %1886 = vmatpush.bf16.msrb.mxu2 %v4232_v14  ;;  %1861 = vmatpush.bf16.msrb.mxu0 %v3688_v25  ;;  %v5303_v14 = vld [vmem:[#allocation6 + $0xec] sm:$0xf0] }
  0xba   :  { %v4555_v20 = vld [vmem:[#allocation6 + $0x6d0] sm:$0xf]  ;;  %v3788_v22 = vor.u32 %v5303_v14, %v3787_v13  ;;  %v5323_v13 = vld [vmem:[#allocation6 + $0x194] sm:$0xf] }
  0xbb   :  { %1899 = vmatpush.bf16.msrb.mxu3 %v4488_v18  ;;  %1874 = vmatpush.bf16.msrb.mxu1 %v3944_v29  ;;  %v4299_v18 = vld [vmem:[#allocation6 + $0x4d0] sm:$0xf]  ;;  %v3885_v14 = vld [vmem:[#allocation6 + $0x1b0] sm:$0xf0] }
  0xbc   :  { %1862 = vmatmul.bf16.vlgmr.msrb.gmra.mxu0 %v5976_v60  ;;  %v5495_v21 = vld [vmem:[#allocation6 + $0x6ec] sm:$0xf0]  ;;  %v4300_v24 = vor.u32 %v5431_v19, %v4299_v18  ;;  %v5451_v18 = vld [vmem:[#allocation6 + $0x594] sm:$0xf] }
  0xbd   :  { %1887 = vmatpush.bf16.msrb.mxu2 %v4200_v30  ;;  %1906 = vmatpush.bf16.msra.mxu0 %v3916_v34  ;;  %v3755_v25 = vld [vmem:[#allocation6 + $0x90] sm:$0xf]  ;;  %v4556_v28 = vor.u32 %v5495_v21, %v4555_v20  ;;  %v4397_v19 = vld [vmem:[#allocation6 + $0x5b0] sm:$0xf0] }
  0xbe   :  { %1875 = vmatmul.bf16.vlgmr.msrb.gmra.mxu1 %v5978_v62  ;;  %v5295_v26 = vld [vmem:[#allocation6 + $0xac] sm:$0xf0]  ;;  %v5515_v20 = vld [vmem:[#allocation6 + $0x794] sm:$0xf] }
  0xbf   :  { %1900 = vmatpush.bf16.msrb.mxu3 %v4456_v33  ;;  %1919 = vmatpush.bf16.msra.mxu1 %v4172_v35  ;;  %v4011_v27 = vld [vmem:[#allocation6 + $0x290] sm:$0xf]  ;;  %v3756_v34 = vor.u32 %v5295_v26, %v3755_v25  ;;  %v4653_v21 = vld [vmem:[#allocation6 + $0x7b0] sm:$0xf0] }
  0xc0   :  { %1888 = vmatmul.bf16.vlgmr.msrb.gmra.mxu2 %v5972_v53  ;;  %v5359_v29 = vld [vmem:[#allocation6 + $0x2ac] sm:$0xf0]  ;;  %v5315_v25 = vld [vmem:[#allocation6 + $0x154] sm:$0xf] }
  0xc1   :  { %1932 = vmatpush.bf16.msra.mxu2 %v4428_v36  ;;  %1907 = vmatpush.bf16.msra.mxu0 %v3884_v46  ;;  %v4267_v30 = vld [vmem:[#allocation6 + $0x490] sm:$0xf]  ;;  %v4012_v35 = vor.u32 %v5359_v29, %v4011_v27  ;;  %v3853_v26 = vld [vmem:[#allocation6 + $0x170] sm:$0xf0] }
  0xc2   :  { %1901 = vmatmul.bf16.vlgmr.msrb.gmra.mxu3 %v5974_v57  ;;  %v5423_v31 = vld [vmem:[#allocation6 + $0x4ac] sm:$0xf0]  ;;  %v5379_v27 = vld [vmem:[#allocation6 + $0x354] sm:$0xf] }
  0xc3   :  { %1945 = vmatpush.bf16.msra.mxu3 %v4684_v40  ;;  %1920 = vmatpush.bf16.msra.mxu1 %v4140_v47  ;;  %v4523_v32 = vld [vmem:[#allocation6 + $0x690] sm:$0xf]  ;;  %v4268_v36 = vor.u32 %v5423_v31, %v4267_v30  ;;  %v4109_v29 = vld [vmem:[#allocation6 + $0x370] sm:$0xf0] }
  0xc4   :  { %v5487_v33 = vld [vmem:[#allocation6 + $0x6ac] sm:$0xf0]  ;;  %v5443_v30 = vld [vmem:[#allocation6 + $0x554] sm:$0xf] }
  0xc5   :  { %1933 = vmatpush.bf16.msra.mxu2 %v4396_v48  ;;  %1908 = vmatpush.bf16.msra.mxu0 %v3852_v61  ;;  %v3723_v37 = vld [vmem:[#allocation6 + $0x50] sm:$0xf]  ;;  %v4524_v40 = vor.u32 %v5487_v33, %v4523_v32  ;;  %v5331_v61 = vld [vmem:[#allocation6 + $0x1d4] sm:$0xf]  ;;  %v5902_v32 = vmov 8.0  }
  0xc6   :  { %v5287_v38 = vld [vmem:[#allocation6 + $0x6c] sm:$0xf0]  ;;  %v4365_v31 = vld [vmem:[#allocation6 + $0x570] sm:$0xf0]  ;;  %5688 = vrcp.f32 %v5902_v32 }
  0xc7   :  { %1946 = vmatpush.bf16.msra.mxu3 %v4652_v52  ;;  %1921 = vmatpush.bf16.msra.mxu1 %v4108_v63  ;;  %v3979_v39 = vld [vmem:[#allocation6 + $0x250] sm:$0xf]  ;;  %v3724_v46 = vor.u32 %v5287_v38, %v3723_v37  ;;  %v3917_v63 = vld [vmem:[#allocation6 + $0x1f0] sm:$0xf0]  ;;  %v4368_v37 = vor.u32 %v5443_v30, %v4365_v31 }
  0xc8   :  { %v5351_v41 = vld [vmem:[#allocation6 + $0x26c] sm:$0xf0]  ;;  %v5507_v33 = vld [vmem:[#allocation6 + $0x754] sm:$0xf] }
  0xc9   :  { %1934 = vmatpush.bf16.msra.mxu2 %v4364_v0  ;;  %1909 = vmatpush.bf16.msra.mxu0 %v3820_v10  ;;  %v4235_v42 = vld [vmem:[#allocation6 + $0x450] sm:$0xf]  ;;  %v3980_v49 = vor.u32 %v5351_v41, %v3979_v39  ;;  %v5395_v0 = vld [vmem:[#allocation6 + $0x3d4] sm:$0xf]  ;;  %v3920_v10 = vor.u32 %v5331_v61, %v3917_v63 }
  0xca   :  { %v5415_v43 = vld [vmem:[#allocation6 + $0x46c] sm:$0xf0]  ;;  %v5307_v38 = vld [vmem:[#allocation6 + $0x114] sm:$0xf] }
  0xcb   :  { %1947 = vmatpush.bf16.msra.mxu3 %v4620_v4  ;;  %1922 = vmatpush.bf16.msra.mxu1 %v4076_v11  ;;  %v4491_v44 = vld [vmem:[#allocation6 + $0x650] sm:$0xf]  ;;  %v4236_v50 = vor.u32 %v5415_v43, %v4235_v42  ;;  %v4429_v4 = vld [vmem:[#allocation6 + $0x5f0] sm:$0xf0]  ;;  %v4176_v11 = vor.u32 %v5395_v0, %v4173_v2 }
  0xcc   :  { %v5479_v45 = vld [vmem:[#allocation6 + $0x66c] sm:$0xf0]  ;;  %v3821_v39 = vld [vmem:[#allocation6 + $0x130] sm:$0xf0] }
  0xcd   :  { %1935 = vmatpush.bf16.msra.mxu2 %v4332_v12  ;;  %1910 = vmatpush.bf16.msra.mxu0 %v3788_v22  ;;  %v3691_v47 = vld [vmem:[#allocation6 + $0x10] sm:$0xf]  ;;  %v4492_v55 = vor.u32 %v5479_v45, %v4491_v44  ;;  %v4432_v12 = vor.u32 %v5459_v3, %v4429_v4  ;;  %v3888_v22 = vor.u32 %v5323_v13, %v3885_v14  ;;  %v4077_v42 = vld [vmem:[#allocation6 + $0x330] sm:$0xf0] }
  0xce   :  { %v5279_v48 = vld [vmem:[#allocation6 + $0x2c] sm:$0xf0]  ;;  %v5435_v43 = vld [vmem:[#allocation6 + $0x514] sm:$0xf] }
  0xcf   :  { %1948 = vmatpush.bf16.msra.mxu3 %v4588_v16  ;;  %1923 = vmatpush.bf16.msra.mxu1 %v4044_v23  ;;  %v3947_v51 = vld [vmem:[#allocation6 + $0x210] sm:$0xf]  ;;  %v3692_v1 = vor.u32 %v5279_v48, %v3691_v47  ;;  %v4688_v16 = vor.u32 %v5523_v7, %v4685_v8  ;;  %v4144_v23 = vor.u32 %v5387_v15, %v4141_v17  ;;  %v4333_v44 = vld [vmem:[#allocation6 + $0x530] sm:$0xf0]  ;;  %v6000_v47 = vpop.eup %5688 }
  0xd0   :  { %v5343_v52 = vld [vmem:[#allocation6 + $0x22c] sm:$0xf0]  ;;  %v5499_v45 = vld [vmem:[#allocation6 + $0x714] sm:$0xf]  ;;  %v3824_v48 = vor.u32 %v5307_v38, %v3821_v39  ;;  %v2192_v3 = vmul.f32 8.0, %v6000_v47  ;;  %vm2196_vm0 = vweird.f32 %v6000_v47 }
  0xd1   :  { %1936 = vmatpush.bf16.msra.mxu2 %v4300_v24  ;;  %1911 = vmatpush.bf16.msra.mxu0 %v3756_v34  ;;  %v4203_v54 = vld [vmem:[#allocation6 + $0x410] sm:$0xf]  ;;  %v3948_v5 = vor.u32 %v5343_v52, %v3947_v51  ;;  %v4400_v24 = vor.u32 %v5451_v18, %v4397_v19  ;;  %v4621_v34 = vld [vmem:[#allocation6 + $0x770] sm:$0xf0]  ;;  %v4336_v51 = vor.u32 %v5435_v43, %v4333_v44 }
  0xd2   :  { %v5407_v56 = vld [vmem:[#allocation6 + $0x42c] sm:$0xf0]  ;;  %v4624_v41 = vor.u32 %v5507_v33, %v4621_v34  ;;  %v4045_v61 = vld [vmem:[#allocation6 + $0x2f0] sm:$0xf0]  ;;  %v2193_v17 = vsub.f32 1.0, %v2192_v3 }
  0xd3   :  { %1949 = vmatpush.bf16.msra.mxu3 %v4556_v28  ;;  %1924 = vmatpush.bf16.msra.mxu1 %v4012_v35  ;;  %v4459_v58 = vld [vmem:[#allocation6 + $0x610] sm:$0xf]  ;;  %v4204_v6 = vor.u32 %v5407_v56, %v4203_v54  ;;  %v4656_v28 = vor.u32 %v5515_v20, %v4653_v21  ;;  %v3856_v35 = vor.u32 %v5315_v25, %v3853_v26  ;;  %v5299_v54 = vld [vmem:[#allocation6 + $0xd4] sm:$0xf] }
  0xd4   :  { %v5471_v59 = vld [vmem:[#allocation6 + $0x62c] sm:$0xf0]  ;;  %v5363_v56 = vld [vmem:[#allocation6 + $0x2d4] sm:$0xf]  ;;  %v2194_v34 = vmul.f32 %v6000_v47, %v2193_v17 }
  0xd5   :  { %1937 = vmatpush.bf16.msra.mxu2 %v4268_v36  ;;  %1912 = vmatpush.bf16.msra.mxu0 %v3724_v46  ;;  %v4460_v9 = vor.u32 %v5471_v59, %v4459_v58  ;;  %v4112_v36 = vor.u32 %v5379_v27, %v4109_v29  ;;  %v4589_v46 = vld [vmem:[#allocation6 + $0x730] sm:$0xf0] }
  0xd6   :  { %v4592_v58 = vor.u32 %v5499_v45, %v4589_v46  ;;  %v5427_v63 = vld [vmem:[#allocation6 + $0x4d4] sm:$0xf] }
  0xd7   :  { %1950 = vmatpush.bf16.msra.mxu3 %v4524_v40  ;;  %1925 = vmatpush.bf16.msra.mxu1 %v3980_v49  ;;  %v5371_v40 = vld [vmem:[#allocation6 + $0x314] sm:$0xf] }
  0xd8   :  { %v4301_v0 = vld [vmem:[#allocation6 + $0x4f0] sm:$0xf0] }
  0xd9   :  { %1938 = vmatpush.bf16.msra.mxu2 %v4236_v50  ;;  %1913 = vmatpush.bf16.msra.mxu0 %v3692_v1  ;;  %v1707_v49 = vpop.f32.mrf.mxu0  ;;  %v4080_v50 = vor.u32 %v5371_v40, %v4077_v42  ;;  %v5491_v1 = vld [vmem:[#allocation6 + $0x6d4] sm:$0xf] }
  0xda   :  { %v4557_v2 = vld [vmem:[#allocation6 + $0x6f0] sm:$0xf0] }
  0xdb   :  { %1951 = vmatpush.bf16.msra.mxu3 %v4492_v55  ;;  %1926 = vmatpush.bf16.msra.mxu1 %v3948_v5  ;;  %v1720_v52 = vpop.f32.mrf.mxu1  ;;  %v3789_v55 = vld [vmem:[#allocation6 + $0xf0] sm:$0xf0]  ;;  %v4048_v5 = vor.u32 %v5363_v56, %v4045_v61  ;;  %v3923_v56 = vld [vmem:[#allocation6 + $0x1d8] sm:$0xf] }
  0xdc   :  { %1914 = vmatmul.bf16.vlgmr.msra.gmra.mxu0 %v5976_v60  ;;  %v1721_v59 = vadd.f32 %v1720_v52, %v1707_v49  ;;  %v3792_v4 = vor.u32 %v5299_v54, %v3789_v55  ;;  %v5291_v8 = vld [vmem:[#allocation6 + $0x94] sm:$0xf]  ;;  %v2195_v55 = vadd.f32 %v6000_v47, %v2194_v34  ;;  %v5448_v34 = vld [vmem:[#allocation6 + $0x574] sm:$0xf0] }
  0xdd   :  { %1939 = vmatpush.bf16.msra.mxu2 %v4204_v6  ;;  %1958 = vmatpush.bf16.msrb.mxu0 %v3920_v10  ;;  %v4304_v6 = vor.u32 %v5427_v63, %v4301_v0  ;;  %v5355_v10 = vld [vmem:[#allocation6 + $0x294] sm:$0xf]  ;;  %v5400_v0 = vld [vmem:[#allocation6 + $0x3f4] sm:$0xf0] }
  0xde   :  { %1927 = vmatmul.bf16.vlgmr.msra.gmra.mxu1 %v5978_v62  ;;  %v4013_v14 = vld [vmem:[#allocation6 + $0x2b0] sm:$0xf0] }
  0xdf   :  { %1952 = vmatpush.bf16.msra.mxu3 %v4460_v9  ;;  %1971 = vmatpush.bf16.msrb.mxu1 %v4176_v11  ;;  %v3757_v9 = vld [vmem:[#allocation6 + $0xb0] sm:$0xf0]  ;;  %v4560_v11 = vor.u32 %v5491_v1, %v4557_v2  ;;  %v4435_v1 = vld [vmem:[#allocation6 + $0x5d8] sm:$0xf] }
  0xe0   :  { %1940 = vmatmul.bf16.vlgmr.msra.gmra.mxu2 %v5972_v53  ;;  %v5419_v15 = vld [vmem:[#allocation6 + $0x494] sm:$0xf]  ;;  %v3760_v21 = vor.u32 %v5291_v8, %v3757_v9  ;;  %v5464_v2 = vld [vmem:[#allocation6 + $0x5f4] sm:$0xf0] }
  0xe1   :  { %1984 = vmatpush.bf16.msrb.mxu2 %v4432_v12  ;;  %1959 = vmatpush.bf16.msrb.mxu0 %v3888_v22  ;;  %v5483_v18 = vld [vmem:[#allocation6 + $0x694] sm:$0xf] }
  0xe2   :  { %1953 = vmatmul.bf16.vlgmr.msra.gmra.mxu3 %v5974_v57  ;;  %v4525_v19 = vld [vmem:[#allocation6 + $0x6b0] sm:$0xf0] }
  0xe3   :  { %1997 = vmatpush.bf16.msrb.mxu3 %v4688_v16  ;;  %1972 = vmatpush.bf16.msrb.mxu1 %v4144_v23  ;;  %v1733_v7 = vpop.f32.mrf.mxu2  ;;  %v4269_v16 = vld [vmem:[#allocation6 + $0x4b0] sm:$0xf0]  ;;  %v1709_v23 = vpop.f32.mrf.mxu0  ;;  %v4528_v31 = vor.u32 %v5483_v18, %v4525_v19  ;;  %v5392_v18 = vld [vmem:[#allocation6 + $0x3b4] sm:$0xf0] }
  0xe4   :  { %v1734_v12 = vadd.f32 %v1733_v7, %v1721_v59  ;;  %v5283_v22 = vld [vmem:[#allocation6 + $0x54] sm:$0xf]  ;;  %v4272_v25 = vor.u32 %v5419_v15, %v4269_v16  ;;  %v1722_v29 = vpop.f32.mrf.mxu1  ;;  %v4179_v59 = vld [vmem:[#allocation6 + $0x3d8] sm:$0xf] }
  0xe5   :  { %1985 = vmatpush.bf16.msrb.mxu2 %v4400_v24  ;;  %1960 = vmatpush.bf16.msrb.mxu0 %v3856_v35  ;;  %v1746_v13 = vpop.f32.mrf.mxu3  ;;  %v4016_v24 = vor.u32 %v5355_v10, %v4013_v14  ;;  %v3725_v26 = vld [vmem:[#allocation6 + $0x70] sm:$0xf0]  ;;  %v6013_v10 = vsel %vm2196_vm0, %v6000_v47, %v2195_v55  ;;  %v5328_v14 = vld [vmem:[#allocation6 + $0x1b4] sm:$0xf0] }
  0xe6   :  { %v6003_v20 = vadd.f32 %v1746_v13, %v1734_v12  ;;  %v5347_v27 = vld [vmem:[#allocation6 + $0x254] sm:$0xf]  ;;  %v3728_v38 = vor.u32 %v5283_v22, %v3725_v26  ;;  %v4436_v12 = vor.u32 %v5464_v2, %v4435_v1  ;;  %v3891_v13 = vld [vmem:[#allocation6 + $0x198] sm:$0xf] }
  0xe7   :  { %1998 = vmatpush.bf16.msrb.mxu3 %v4656_v28  ;;  %1973 = vmatpush.bf16.msrb.mxu1 %v4112_v36  ;;  %v3981_v28 = vld [vmem:[#allocation6 + $0x270] sm:$0xf0]  ;;  %v4147_v15 = vld [vmem:[#allocation6 + $0x398] sm:$0xf]  ;;  %v3892_v47 = vor.u32 %v5328_v14, %v3891_v13 }
  0xe8   :  { %v2143_v30 = vrot.slane %v6003_v20, 4  ;;  %v5411_v32 = vld [vmem:[#allocation6 + $0x454] sm:$0xf]  ;;  %v3984_v42 = vor.u32 %v5347_v27, %v3981_v28  ;;  %v4403_v19 = vld [vmem:[#allocation6 + $0x598] sm:$0xf] }
  0xe9   :  { %1986 = vmatpush.bf16.msrb.mxu2 %v4368_v37  ;;  %1961 = vmatpush.bf16.msrb.mxu0 %v3824_v48  ;;  %v4237_v33 = vld [vmem:[#allocation6 + $0x470] sm:$0xf0]  ;;  %v4659_v22 = vld [vmem:[#allocation6 + $0x798] sm:$0xf] }
  0xea   :  { %v5475_v35 = vld [vmem:[#allocation6 + $0x654] sm:$0xf]  ;;  %v2144_v37 = vadd.f32 %v2143_v30, %v6003_v20  ;;  %v4240_v43 = vor.u32 %v5411_v32, %v4237_v33  ;;  %v5520_v23 = vld [vmem:[#allocation6 + $0x7b4] sm:$0xf0] }
  0xeb   :  { %1999 = vmatpush.bf16.msrb.mxu3 %v4624_v41  ;;  %1974 = vmatpush.bf16.msrb.mxu1 %v4080_v50  ;;  %v4493_v36 = vld [vmem:[#allocation6 + $0x670] sm:$0xf0]  ;;  %v1735_v48 = vpop.f32.mrf.mxu2  ;;  %v3859_v27 = vld [vmem:[#allocation6 + $0x158] sm:$0xf] }
  0xec   :  { %v5275_v39 = vld [vmem:[#allocation6 + $0x14] sm:$0xf]  ;;  %v2145_v49 = vrot.slane %v2144_v37, 2  ;;  %v4496_v50 = vor.u32 %v5475_v35, %v4493_v36  ;;  %v5320_v28 = vld [vmem:[#allocation6 + $0x174] sm:$0xf0] }
  0xed   :  { %1987 = vmatpush.bf16.msrb.mxu2 %v4336_v51  ;;  %1962 = vmatpush.bf16.msrb.mxu0 %v3792_v4  ;;  %v3693_v40 = vld [vmem:[#allocation6 + $0x30] sm:$0xf0]  ;;  %v1748_v54 = vpop.f32.mrf.mxu3  ;;  %v4115_v29 = vld [vmem:[#allocation6 + $0x358] sm:$0xf] }
  0xee   :  { %v5339_v41 = vld [vmem:[#allocation6 + $0x214] sm:$0xf]  ;;  %v2146_v61 = vadd.f32 %v2145_v49, %v2144_v37  ;;  %v3696_v63 = vor.u32 %v5275_v39, %v3693_v40  ;;  %v5384_v32 = vld [vmem:[#allocation6 + $0x374] sm:$0xf0]  ;;  %v3860_v37 = vor.u32 %v5320_v28, %v3859_v27 }
  0xef   :  { %2000 = vmatpush.bf16.msrb.mxu3 %v4592_v58  ;;  %1975 = vmatpush.bf16.msrb.mxu1 %v4048_v5  ;;  %v3949_v44 = vld [vmem:[#allocation6 + $0x230] sm:$0xf0]  ;;  %v5336_v58 = vld [vmem:[#allocation6 + $0x1f4] sm:$0xf0] }
  0xf0   :  { %v5403_v45 = vld [vmem:[#allocation6 + $0x414] sm:$0xf]  ;;  %v3952_v3 = vor.u32 %v5339_v41, %v3949_v44  ;;  %v4691_v5 = vld [vmem:[#allocation6 + $0x7d8] sm:$0xf]  ;;  %v2147_v7 = vrot.slane %v2146_v61, 1  ;;  %v3924_v9 = vor.u32 %v5336_v58, %v3923_v56 }
  0xf1   :  { %1988 = vmatpush.bf16.msrb.mxu2 %v4304_v6  ;;  %1963 = vmatpush.bf16.msrb.mxu0 %v3760_v21  ;;  %v4205_v46 = vld [vmem:[#allocation6 + $0x430] sm:$0xf0]  ;;  %v5528_v6 = vld [vmem:[#allocation6 + $0x7f4] sm:$0xf0] }
  0xf2   :  { %v5467_v51 = vld [vmem:[#allocation6 + $0x614] sm:$0xf]  ;;  %v4208_v4 = vor.u32 %v5403_v45, %v4205_v46  ;;  %v2148_v16 = vadd.f32 %v2147_v7, %v2146_v61  ;;  %v4692_v17 = vor.u32 %v5528_v6, %v4691_v5  ;;  %v5456_v21 = vld [vmem:[#allocation6 + $0x5b4] sm:$0xf0] }
  0xf3   :  { %2001 = vmatpush.bf16.msrb.mxu3 %v4560_v11  ;;  %1976 = vmatpush.bf16.msrb.mxu1 %v4016_v24  ;;  %v4461_v52 = vld [vmem:[#allocation6 + $0x630] sm:$0xf0]  ;;  %v4180_v11 = vor.u32 %v5400_v0, %v4179_v59  ;;  %v4404_v26 = vor.u32 %v5456_v21, %v4403_v19  ;;  %v4371_v33 = vld [vmem:[#allocation6 + $0x558] sm:$0xf] }
  0xf4   :  { %v4464_v8 = vor.u32 %v5467_v51, %v4461_v52  ;;  %v2198_v24 = vmul.f32 %v6013_v10, %v2148_v16  ;;  %v4627_v35 = vld [vmem:[#allocation6 + $0x758] sm:$0xf]  ;;  %v4372_v39 = vor.u32 %v5448_v34, %v4371_v33 }
  0xf5   :  { %1989 = vmatpush.bf16.msrb.mxu2 %v4272_v25  ;;  %1964 = vmatpush.bf16.msrb.mxu0 %v3728_v38  ;;  %v4148_v25 = vor.u32 %v5392_v18, %v4147_v15  ;;  %v5512_v36 = vld [vmem:[#allocation6 + $0x774] sm:$0xf0]  ;;  %v4116_v38 = vor.u32 %v5384_v32, %v4115_v29 }
  0xf6   :  { %v6017_v30 = vsub.f32 %v6003_v20, %v2198_v24  ;;  %v3827_v40 = vld [vmem:[#allocation6 + $0x118] sm:$0xf] }
  0xf7   :  { %2002 = vmatpush.bf16.msrb.mxu3 %v4528_v31  ;;  %1977 = vmatpush.bf16.msrb.mxu1 %v3984_v42  ;;  %v4660_v31 = vor.u32 %v5520_v23, %v4659_v22  ;;  %v5312_v41 = vld [vmem:[#allocation6 + $0x134] sm:$0xf0] }
  0xf8   :  { %v2214_v20 = vmul.f32 %v6017_v30, %v6017_v30  ;;  %v4083_v42 = vld [vmem:[#allocation6 + $0x318] sm:$0xf] }
  0xf9   :  { %1990 = vmatpush.bf16.msrb.mxu2 %v4240_v43  ;;  %1965 = vmatpush.bf16.msrb.mxu0 %v3696_v63  ;;  %v4628_v43 = vor.u32 %v5512_v36, %v4627_v35  ;;  %v5376_v44 = vld [vmem:[#allocation6 + $0x334] sm:$0xf0]  ;;  %v1759_v51 = vpop.f32.mrf.mxu0 }
  0xfa   :  { %v4339_v45 = vld [vmem:[#allocation6 + $0x518] sm:$0xf]  ;;  %v2222_v54 = vrot.slane %v2214_v20, 4  ;;  %v4084_v55 = vor.u32 %v5376_v44, %v4083_v42 }
  0xfb   :  { %2003 = vmatpush.bf16.msrb.mxu3 %v4496_v50  ;;  %1978 = vmatpush.bf16.msrb.mxu1 %v3952_v3  ;;  %v5440_v46 = vld [vmem:[#allocation6 + $0x534] sm:$0xf0]  ;;  %v3828_v50 = vor.u32 %v5312_v41, %v3827_v40  ;;  %v1772_v58 = vpop.f32.mrf.mxu1 }
  0xfc   :  { %1966 = vmatmul.bf16.vlgmr.msrb.gmra.mxu0 %v5976_v60  ;;  %v4595_v48 = vld [vmem:[#allocation6 + $0x718] sm:$0xf]  ;;  %v4340_v56 = vor.u32 %v5440_v46, %v4339_v45  ;;  %v1773_v0 = vadd.f32 %v1772_v58, %v1759_v51  ;;  %v2223_v7 = vadd.f32 %v2222_v54, %v2214_v20 }
  0xfd   :  { %1991 = vmatpush.bf16.msrb.mxu2 %v4208_v4  ;;  %2010 = vmatpush.bf16.msra.mxu0 %v3924_v9  ;;  %v5504_v49 = vld [vmem:[#allocation6 + $0x734] sm:$0xf0] }
  0xfe   :  { %1979 = vmatmul.bf16.vlgmr.msrb.gmra.mxu1 %v5978_v62  ;;  %v3795_v52 = vld [vmem:[#allocation6 + $0xd8] sm:$0xf]  ;;  %v4596_v63 = vor.u32 %v5504_v49, %v4595_v48  ;;  %v2224_v28 = vrot.slane %v2223_v7, 2 }
  0xff   :  { %2004 = vmatpush.bf16.msrb.mxu3 %v4464_v8  ;;  %2023 = vmatpush.bf16.msra.mxu1 %v4180_v11  ;;  %v5304_v59 = vld [vmem:[#allocation6 + $0xf4] sm:$0xf0] }
 0x100   :  { %1992 = vmatmul.bf16.vlgmr.msrb.gmra.mxu2 %v5972_v53  ;;  %v4051_v61 = vld [vmem:[#allocation6 + $0x2d8] sm:$0xf]  ;;  %v3796_v6 = vor.u32 %v5304_v59, %v3795_v52  ;;  %v2225_v45 = vadd.f32 %v2224_v28, %v2223_v7  ;;  %v4661_v28 = vld [vmem:[#allocation6 + $0x7b8] sm:$0xf0] }
 0x101   :  { %2036 = vmatpush.bf16.msra.mxu2 %v4436_v12  ;;  %2011 = vmatpush.bf16.msra.mxu0 %v3892_v47  ;;  %v5368_v1 = vld [vmem:[#allocation6 + $0x2f4] sm:$0xf0]  ;;  %v1761_v27 = vpop.f32.mrf.mxu0 }
 0x102   :  { %2005 = vmatmul.bf16.vlgmr.msrb.gmra.mxu3 %v5974_v57  ;;  %v4307_v2 = vld [vmem:[#allocation6 + $0x4d8] sm:$0xf]  ;;  %v4052_v8 = vor.u32 %v5368_v1, %v4051_v61  ;;  %v5332_v61 = vld [vmem:[#allocation6 + $0x1dc] sm:$0xf] }
 0x103   :  { %2049 = vmatpush.bf16.msra.mxu3 %v4692_v17  ;;  %2024 = vmatpush.bf16.msra.mxu1 %v4148_v25  ;;  %v5432_v3 = vld [vmem:[#allocation6 + $0x4f4] sm:$0xf0]  ;;  %v1785_v11 = vpop.f32.mrf.mxu2  ;;  %v1774_v34 = vpop.f32.mrf.mxu1  ;;  %v5516_v27 = vld [vmem:[#allocation6 + $0x79c] sm:$0xf] }
 0x104   :  { %v4563_v4 = vld [vmem:[#allocation6 + $0x6d8] sm:$0xf]  ;;  %v4308_v9 = vor.u32 %v5432_v3, %v4307_v2  ;;  %v1786_v16 = vadd.f32 %v1785_v11, %v1773_v0  ;;  %v5396_v0 = vld [vmem:[#allocation6 + $0x3dc] sm:$0xf] }
 0x105   :  { %2037 = vmatpush.bf16.msra.mxu2 %v4404_v26  ;;  %2012 = vmatpush.bf16.msra.mxu0 %v3860_v37  ;;  %v5496_v5 = vld [vmem:[#allocation6 + $0x6f4] sm:$0xf0]  ;;  %v1798_v17 = vpop.f32.mrf.mxu3  ;;  %v4181_v3 = vld [vmem:[#allocation6 + $0x3f8] sm:$0xf0] }
 0x106   :  { %v3763_v12 = vld [vmem:[#allocation6 + $0x98] sm:$0xf]  ;;  %v4564_v15 = vor.u32 %v5496_v5, %v4563_v4  ;;  %v6025_v24 = vadd.f32 %v1798_v17, %v1786_v16  ;;  %v5460_v4 = vld [vmem:[#allocation6 + $0x5dc] sm:$0xf] }
 0x107   :  { %2050 = vmatpush.bf16.msra.mxu3 %v4660_v31  ;;  %2025 = vmatpush.bf16.msra.mxu1 %v4116_v38  ;;  %v5296_v13 = vld [vmem:[#allocation6 + $0xb4] sm:$0xf0]  ;;  %v4437_v5 = vld [vmem:[#allocation6 + $0x5f8] sm:$0xf0] }
 0x108   :  { %v4019_v14 = vld [vmem:[#allocation6 + $0x298] sm:$0xf]  ;;  %v3764_v47 = vor.u32 %v5296_v13, %v3763_v12  ;;  %v2149_v35 = vrot.slane %v6025_v24, 4  ;;  %v4693_v11 = vld [vmem:[#allocation6 + $0x7f8] sm:$0xf0]  ;;  %v4440_v16 = vor.u32 %v5460_v4, %v4437_v5 }
 0x109   :  { %2038 = vmatpush.bf16.msra.mxu2 %v4372_v39  ;;  %2013 = vmatpush.bf16.msra.mxu0 %v3828_v50  ;;  %v5360_v18 = vld [vmem:[#allocation6 + $0x2b4] sm:$0xf0]  ;;  %v5324_v17 = vld [vmem:[#allocation6 + $0x19c] sm:$0xf] }
 0x10a   :  { %v4275_v19 = vld [vmem:[#allocation6 + $0x498] sm:$0xf]  ;;  %v4020_v29 = vor.u32 %v5360_v18, %v4019_v14  ;;  %v2150_v40 = vadd.f32 %v2149_v35, %v6025_v24  ;;  %v3893_v18 = vld [vmem:[#allocation6 + $0x1b8] sm:$0xf0] }
 0x10b   :  { %2051 = vmatpush.bf16.msra.mxu3 %v4628_v43  ;;  %2026 = vmatpush.bf16.msra.mxu1 %v4084_v55  ;;  %v5424_v21 = vld [vmem:[#allocation6 + $0x4b4] sm:$0xf0]  ;;  %v1787_v52 = vpop.f32.mrf.mxu2  ;;  %v5316_v34 = vld [vmem:[#allocation6 + $0x15c] sm:$0xf] }
 0x10c   :  { %v4531_v22 = vld [vmem:[#allocation6 + $0x698] sm:$0xf]  ;;  %v4276_v31 = vor.u32 %v5424_v21, %v4275_v19  ;;  %v2151_v54 = vrot.slane %v2150_v40, 2  ;;  %v5388_v19 = vld [vmem:[#allocation6 + $0x39c] sm:$0xf] }
 0x10d   :  { %2039 = vmatpush.bf16.msra.mxu2 %v4340_v56  ;;  %v5488_v23 = vld [vmem:[#allocation6 + $0x6b4] sm:$0xf0]  ;;  %2014 = vmatpush.bf16.msra.mxu0 %v3796_v6  ;;  %v1800_v59 = vpop.f32.mrf.mxu3  ;;  %v2226_v6 = vrot.slane %v2225_v45, 1  ;;  %v3861_v35 = vld [vmem:[#allocation6 + $0x178] sm:$0xf0] }
 0x10e   :  { %v3731_v25 = vld [vmem:[#allocation6 + $0x58] sm:$0xf]  ;;  %v4532_v36 = vor.u32 %v5488_v23, %v4531_v22  ;;  %v2152_v1 = vadd.f32 %v2151_v54, %v2150_v40  ;;  %v4149_v23 = vld [vmem:[#allocation6 + $0x3b8] sm:$0xf0] }
 0x10f   :  { %2052 = vmatpush.bf16.msra.mxu3 %v4596_v63  ;;  %v5288_v26 = vld [vmem:[#allocation6 + $0x74] sm:$0xf0]  ;;  %2027 = vmatpush.bf16.msra.mxu1 %v4052_v8  ;;  %v3925_v63 = vld [vmem:[#allocation6 + $0x1f8] sm:$0xf0] }
 0x110   :  { %v3987_v32 = vld [vmem:[#allocation6 + $0x258] sm:$0xf]  ;;  %v3732_v41 = vor.u32 %v5288_v26, %v3731_v25  ;;  %v2153_v12 = vrot.slane %v2152_v1, 1  ;;  %v3928_v14 = vor.u32 %v5332_v61, %v3925_v63  ;;  %v4405_v25 = vld [vmem:[#allocation6 + $0x5b8] sm:$0xf0]  ;;  %v2227_v26 = vadd.f32 %v2226_v6, %v2225_v45 }
 0x111   :  { %2040 = vmatpush.bf16.msra.mxu2 %v4308_v9  ;;  %v5352_v33 = vld [vmem:[#allocation6 + $0x274] sm:$0xf0]  ;;  %2015 = vmatpush.bf16.msra.mxu0 %v3764_v47  ;;  %v5524_v9 = vld [vmem:[#allocation6 + $0x7dc] sm:$0xf] }
 0x112   :  { %v4243_v37 = vld [vmem:[#allocation6 + $0x458] sm:$0xf]  ;;  %v3988_v46 = vor.u32 %v5352_v33, %v3987_v32  ;;  %v2154_v21 = vadd.f32 %v2153_v12, %v2152_v1  ;;  %v4696_v22 = vor.u32 %v5524_v9, %v4693_v11  ;;  %v5452_v47 = vld [vmem:[#allocation6 + $0x59c] sm:$0xf]  ;;  %v4152_v32 = vor.u32 %v5388_v19, %v4149_v23 }
 0x113   :  { %2053 = vmatpush.bf16.msra.mxu3 %v4564_v15  ;;  %v5416_v20 = vld [vmem:[#allocation6 + $0x474] sm:$0xf0]  ;;  %2028 = vmatpush.bf16.msra.mxu1 %v4020_v29  ;;  %v4184_v15 = vor.u32 %v5396_v0, %v4181_v3  ;;  %v4408_v33 = vor.u32 %v5452_v47, %v4405_v25  ;;  %v4373_v40 = vld [vmem:[#allocation6 + $0x578] sm:$0xf0] }
 0x114   :  { %v4499_v38 = vld [vmem:[#allocation6 + $0x658] sm:$0xf]  ;;  %v4244_v48 = vor.u32 %v5416_v20, %v4243_v37  ;;  %v2199_v29 = vmul.f32 %v6013_v10, %v2154_v21  ;;  %v4664_v20 = vor.u32 %v5516_v27, %v4661_v28  ;;  %v5308_v45 = vld [vmem:[#allocation6 + $0x11c] sm:$0xf] }
 0x115   :  { %v5480_v39 = vld [vmem:[#allocation6 + $0x674] sm:$0xf0]  ;;  %2041 = vmatpush.bf16.msra.mxu2 %v4276_v31  ;;  %2016 = vmatpush.bf16.msra.mxu0 %v3732_v41  ;;  %v3896_v31 = vor.u32 %v5324_v17, %v3893_v18  ;;  %v2270_v41 = vmul.f32 %v2227_v26, %v6013_v10  ;;  %v5500_v59 = vld [vmem:[#allocation6 + $0x71c] sm:$0xf] }
 0x116   :  { %v3699_v42 = vld [vmem:[#allocation6 + $0x18] sm:$0xf]  ;;  %v4500_v55 = vor.u32 %v5480_v39, %v4499_v38  ;;  %v6031_v37 = vsub.f32 %v6025_v24, %v2199_v29  ;;  %v4117_v38 = vld [vmem:[#allocation6 + $0x378] sm:$0xf0]  ;;  %v3864_v24 = vor.u32 %v5316_v34, %v3861_v35 }
 0x117   :  { %v5280_v43 = vld [vmem:[#allocation6 + $0x34] sm:$0xf0]  ;;  %2054 = vmatpush.bf16.msra.mxu3 %v4532_v36  ;;  %2029 = vmatpush.bf16.msra.mxu1 %v3988_v46  ;;  %v5380_v36 = vld [vmem:[#allocation6 + $0x35c] sm:$0xf] }
 0x118   :  { %v3955_v44 = vld [vmem:[#allocation6 + $0x218] sm:$0xf]  ;;  %v3700_v2 = vor.u32 %v5280_v43, %v3699_v42  ;;  %v5444_v39 = vld [vmem:[#allocation6 + $0x55c] sm:$0xf]  ;;  %v4120_v46 = vor.u32 %v5380_v36, %v4117_v38 }
 0x119   :  { %v5344_v49 = vld [vmem:[#allocation6 + $0x234] sm:$0xf0]  ;;  %2042 = vmatpush.bf16.msra.mxu2 %v4244_v48  ;;  %v5508_v42 = vld [vmem:[#allocation6 + $0x75c] sm:$0xf]  ;;  %v4376_v48 = vor.u32 %v5444_v39, %v4373_v40  ;;  %v1811_v1 = vpop.f32.mrf.mxu0 }
 0x11a   :  { %v4211_v50 = vld [vmem:[#allocation6 + $0x418] sm:$0xf]  ;;  %v3956_v7 = vor.u32 %v5344_v49, %v3955_v44  ;;  %2017 = vmatpush.bf16.msra.mxu0 %v3700_v2  ;;  %v4629_v43 = vld [vmem:[#allocation6 + $0x778] sm:$0xf0]  ;;  %v2215_v44 = vmul.f32 %v6031_v37, %v6031_v37 }
 0x11b   :  { %v5408_v51 = vld [vmem:[#allocation6 + $0x434] sm:$0xf0]  ;;  %2055 = vmatpush.bf16.msra.mxu3 %v4500_v55  ;;  %v3829_v49 = vld [vmem:[#allocation6 + $0x138] sm:$0xf0]  ;;  %v4632_v54 = vor.u32 %v5508_v42, %v4629_v43  ;;  %v1824_v5 = vpop.f32.mrf.mxu1 }
 0x11c   :  { %v4467_v56 = vld [vmem:[#allocation6 + $0x618] sm:$0xf]  ;;  %v4212_v8 = vor.u32 %v5408_v51, %v4211_v50  ;;  %2030 = vmatpush.bf16.msra.mxu1 %v3956_v7  ;;  %v5372_v50 = vld [vmem:[#allocation6 + $0x31c] sm:$0xf]  ;;  %v2228_v52 = vrot.slane %v2215_v44, 4  ;;  %v3832_v0 = vor.u32 %v5308_v45, %v3829_v49  ;;  %v1825_v12 = vadd.f32 %v1824_v5, %v1811_v1 }
 0x11d   :  { %v5472_v58 = vld [vmem:[#allocation6 + $0x634] sm:$0xf0]  ;;  %2018 = vmatmul.bf16.vlgmr.msra.gmra.mxu0 %v5976_v60  ;;  %v4085_v51 = vld [vmem:[#allocation6 + $0x338] sm:$0xf0] }
 0x11e   :  { %v4468_v13 = vor.u32 %v5472_v58, %v4467_v56  ;;  %2043 = vmatpush.bf16.msra.mxu2 %v4212_v8  ;;  %2062 = vmatpush.bf16.msrb.mxu0 %v3928_v14  ;;  %v5436_v55 = vld [vmem:[#allocation6 + $0x51c] sm:$0xf]  ;;  %v6040_v58 = vadd.f32 1e-05, %v2270_v41  ;;  %v2229_v63 = vadd.f32 %v2228_v52, %v2215_v44  ;;  %v4088_v3 = vor.u32 %v5372_v50, %v4085_v51 }
 0x11f   :  { %2031 = vmatmul.bf16.vlgmr.msra.gmra.mxu1 %v5978_v62  ;;  %v4341_v56 = vld [vmem:[#allocation6 + $0x538] sm:$0xf0] }
 0x120   :  { %2056 = vmatpush.bf16.msra.mxu3 %v4468_v13  ;;  %2075 = vmatpush.bf16.msrb.mxu1 %v4184_v15  ;;  %v4597_v61 = vld [vmem:[#allocation6 + $0x738] sm:$0xf0]  ;;  %v4344_v4 = vor.u32 %v5436_v55, %v4341_v56  ;;  %v2230_v9 = vrot.slane %v2229_v63, 2  ;;  %5690 = vrsqrt.f32 %v6040_v58  ;;  %vm2292_vm1 = vweird.f32 %v6040_v58 }
 0x121   :  { %2044 = vmatmul.bf16.vlgmr.msra.gmra.mxu2 %v5972_v53  ;;  %v5300_v2 = vld [vmem:[#allocation6 + $0xdc] sm:$0xf]  ;;  %v4600_v11 = vor.u32 %v5500_v59, %v4597_v61  ;;  %v1813_v40 = vpop.f32.mrf.mxu0 }
 0x122   :  { %2088 = vmatpush.bf16.msrb.mxu2 %v4440_v16  ;;  %2063 = vmatpush.bf16.msrb.mxu0 %v3896_v31  ;;  %v3797_v6 = vld [vmem:[#allocation6 + $0xf8] sm:$0xf0]  ;;  %v2231_v17 = vadd.f32 %v2230_v9, %v2229_v63 }
 0x123   :  { %2057 = vmatmul.bf16.vlgmr.msra.gmra.mxu3 %v5974_v57  ;;  %v5364_v7 = vld [vmem:[#allocation6 + $0x2dc] sm:$0xf]  ;;  %v3800_v18 = vor.u32 %v5300_v2, %v3797_v6  ;;  %v1837_v23 = vpop.f32.mrf.mxu2 }
 0x124   :  { %2101 = vmatpush.bf16.msrb.mxu3 %v4696_v22  ;;  %2076 = vmatpush.bf16.msrb.mxu1 %v4152_v32  ;;  %v4053_v8 = vld [vmem:[#allocation6 + $0x2f8] sm:$0xf0]  ;;  %v2232_v27 = vrot.slane %v2231_v17, 1  ;;  %v1838_v29 = vadd.f32 %v1837_v23, %v1825_v12 }
 0x125   :  { %v5428_v13 = vld [vmem:[#allocation6 + $0x4dc] sm:$0xf]  ;;  %v4056_v21 = vor.u32 %v5364_v7, %v4053_v8  ;;  %v1850_v31 = vpop.f32.mrf.mxu3 }
 0x126   :  { %2089 = vmatpush.bf16.msrb.mxu2 %v4408_v33  ;;  %2064 = vmatpush.bf16.msrb.mxu0 %v3864_v24  ;;  %v4309_v14 = vld [vmem:[#allocation6 + $0x4f8] sm:$0xf0]  ;;  %v2233_v36 = vadd.f32 %v2232_v27, %v2231_v17  ;;  %v6045_v41 = vpop.eup %5690 }
 0x127   :  { %v5492_v15 = vld [vmem:[#allocation6 + $0x6dc] sm:$0xf]  ;;  %v4312_v22 = vor.u32 %v5428_v13, %v4309_v14  ;;  %v2287_v56 = vmul.f32 %v6045_v41, %v6040_v58  ;;  %vm2293_vm2 = vweird.f32 %v6045_v41 }
 0x128   :  { %2102 = vmatpush.bf16.msrb.mxu3 %v4664_v20  ;;  %2077 = vmatpush.bf16.msrb.mxu1 %v4120_v46  ;;  %v4565_v16 = vld [vmem:[#allocation6 + $0x6f8] sm:$0xf0]  ;;  %v6043_v20 = vadd.f32 %v1850_v31, %v1838_v29  ;;  %v1826_v46 = vpop.f32.mrf.mxu1  ;;  %v5576_v29 = vld [vmem:[#allocation11 + $0x174] sm:$0xf0]  ;;  %vm6083_vm5 = vmor %vm2292_vm1, %vm2293_vm2 }
 0x129   :  { %v5292_v19 = vld [vmem:[#allocation6 + $0x9c] sm:$0xf]  ;;  %v4568_v28 = vor.u32 %v5492_v15, %v4565_v16  ;;  %v4755_v15 = vld [vmem:[#allocation11 + $0x70] sm:$0xf]  ;;  %v5544_v16 = vld [vmem:[#allocation11 + $0x74] sm:$0xf0]  ;;  %v2288_v17 = vmul.f32 %v6045_v41, %v2287_v56 }
 0x12a   :  { %2090 = vmatpush.bf16.msrb.mxu2 %v4376_v48  ;;  %2065 = vmatpush.bf16.msrb.mxu0 %v3832_v0  ;;  %v3765_v47 = vld [vmem:[#allocation6 + $0xb8] sm:$0xf0]  ;;  %v2271_v48 = vmul.f32 %v2233_v36, %v6013_v10  ;;  %v2155_v49 = vrot.slane %v6043_v20, 4  ;;  %v4756_v27 = vor.u32 %v5544_v16, %v4755_v15  ;;  %v5530_v15 = vld [vmem:[#allocation11 + $0x4] sm:$0xf0] }
 0x12b   :  { %v5356_v25 = vld [vmem:[#allocation6 + $0x29c] sm:$0xf]  ;;  %v3768_v38 = vor.u32 %v5292_v19, %v3765_v47  ;;  %v1839_v7 = vpop.f32.mrf.mxu2 }
 0x12c   :  { %2103 = vmatpush.bf16.msrb.mxu3 %v4632_v54  ;;  %2078 = vmatpush.bf16.msrb.mxu1 %v4088_v3  ;;  %v4021_v26 = vld [vmem:[#allocation6 + $0x2b8] sm:$0xf0]  ;;  %v6051_v59 = vadd.f32 1e-05, %v2271_v48  ;;  %v2156_v61 = vadd.f32 %v2155_v49, %v6043_v20  ;;  %v4739_v49 = vld [vmem:[#allocation11 + $0x50] sm:$0xf] }
 0x12d   :  { %v5420_v32 = vld [vmem:[#allocation6 + $0x49c] sm:$0xf]  ;;  %v4024_v42 = vor.u32 %v5356_v25, %v4021_v26  ;;  %v1852_v13 = vpop.f32.mrf.mxu3 }
 0x12e   :  { %2091 = vmatpush.bf16.msrb.mxu2 %v4344_v4  ;;  %v4277_v33 = vld [vmem:[#allocation6 + $0x4b8] sm:$0xf0]  ;;  %2066 = vmatpush.bf16.msrb.mxu0 %v3800_v18  ;;  %5692 = vrsqrt.f32 %v6051_v59  ;;  %v2157_v8 = vrot.slane %v2156_v61, 2  ;;  %vm2302_vm3 = vweird.f32 %v6051_v59  ;;  %v4859_v13 = vld [vmem:[#allocation11 + $0x140] sm:$0xf] }
 0x12f   :  { %v5484_v34 = vld [vmem:[#allocation6 + $0x69c] sm:$0xf]  ;;  %v4280_v43 = vor.u32 %v5420_v32, %v4277_v33  ;;  %v4747_v32 = vld [vmem:[#allocation11 + $0x60] sm:$0xf]  ;;  %v5542_v33 = vld [vmem:[#allocation11 + $0x64] sm:$0xf0] }
 0x130   :  { %2104 = vmatpush.bf16.msrb.mxu3 %v4600_v11  ;;  %v4533_v35 = vld [vmem:[#allocation6 + $0x6b8] sm:$0xf0]  ;;  %2079 = vmatpush.bf16.msrb.mxu1 %v4056_v21  ;;  %v2158_v18 = vadd.f32 %v2157_v8, %v2156_v61  ;;  %v4819_v21 = vld [vmem:[#allocation11 + $0xf0] sm:$0xf] }
 0x131   :  { %v5284_v39 = vld [vmem:[#allocation6 + $0x5c] sm:$0xf]  ;;  %v4536_v50 = vor.u32 %v5484_v34, %v4533_v35  ;;  %v2289_v35 = vmul.f32 0.5, %v2288_v17  ;;  %v6077_v8 = vld [vmem:[#allocation8] sm:$0xff] }
 0x132   :  { %2092 = vmatpush.bf16.msrb.mxu2 %v4312_v22  ;;  %v3733_v44 = vld [vmem:[#allocation6 + $0x78] sm:$0xf0]  ;;  %2067 = vmatpush.bf16.msrb.mxu0 %v3768_v38  ;;  %v5560_v22 = vld [vmem:[#allocation11 + $0xf4] sm:$0xf0]  ;;  %v2159_v25 = vrot.slane %v2158_v18, 1 }
 0x133   :  { %v5348_v24 = vld [vmem:[#allocation6 + $0x25c] sm:$0xf]  ;;  %v3736_v63 = vor.u32 %v5284_v39, %v3733_v44  ;;  %v4820_v31 = vor.u32 %v5560_v22, %v4819_v21  ;;  %v4811_v38 = vld [vmem:[#allocation11 + $0xe0] sm:$0xf]  ;;  %v5558_v39 = vld [vmem:[#allocation11 + $0xe4] sm:$0xf0]  ;;  %v4748_v44 = vor.u32 %v5542_v33, %v4747_v32 }
 0x134   :  { %v3989_v45 = vld [vmem:[#allocation6 + $0x278] sm:$0xf0]  ;;  %2105 = vmatpush.bf16.msrb.mxu3 %v4568_v28  ;;  %2080 = vmatpush.bf16.msrb.mxu1 %v4024_v42  ;;  %v4883_v28 = vld [vmem:[#allocation11 + $0x170] sm:$0xf]  ;;  %v6056_v34 = vpop.eup %5692  ;;  %v2160_v36 = vadd.f32 %v2159_v25, %v2158_v18  ;;  %v4812_v48 = vor.u32 %v5558_v39, %v4811_v38  ;;  %v5552_v25 = vld [vmem:[#allocation11 + $0xb4] sm:$0xf0] }
 0x135   :  { %v5412_v51 = vld [vmem:[#allocation6 + $0x45c] sm:$0xf]  ;;  %v3992_v2 = vor.u32 %v5348_v24, %v3989_v45  ;;  %v2297_v40 = vmul.f32 %v6056_v34, %v6051_v59  ;;  %v4884_v42 = vor.u32 %v5576_v29, %v4883_v28  ;;  %v4875_v24 = vld [vmem:[#allocation11 + $0x160] sm:$0xf]  ;;  %v5574_v45 = vld [vmem:[#allocation11 + $0x164] sm:$0xf0]  ;;  %vm2303_vm4 = vweird.f32 %v6056_v34 }
 0x136   :  { %v4245_v52 = vld [vmem:[#allocation6 + $0x478] sm:$0xf0]  ;;  %2093 = vmatpush.bf16.msrb.mxu2 %v4280_v43  ;;  %2068 = vmatpush.bf16.msrb.mxu0 %v3736_v63  ;;  %v2200_v43 = vmul.f32 %v6013_v10, %v2160_v36  ;;  %v4876_v61 = vor.u32 %v5574_v45, %v4875_v24  ;;  %v4723_v18 = vld [vmem:[#allocation11 + $0x30] sm:$0xf]  ;;  %vm6094_vm6 = vmor %vm2302_vm3, %vm2303_vm4  ;;  %v2375_v32 = vperm.slane %v6077_v8, 0 }
 0x137   :  { %v5476_v54 = vld [vmem:[#allocation6 + $0x65c] sm:$0xf]  ;;  %v4248_v3 = vor.u32 %v5412_v51, %v4245_v52  ;;  %v2298_v46 = vmul.f32 %v6056_v34, %v2297_v40  ;;  %v2290_v51 = vsub.f32 1.5, %v2289_v35  ;;  %v4851_v29 = vld [vmem:[#allocation11 + $0x130] sm:$0xf]  ;;  %v6103_v39 = vld [vmem:[#allocation9] sm:$0xff] }
 0x138   :  { %v4501_v55 = vld [vmem:[#allocation6 + $0x678] sm:$0xf0]  ;;  %2106 = vmatpush.bf16.msrb.mxu3 %v4536_v50  ;;  %2081 = vmatpush.bf16.msrb.mxu1 %v3992_v2  ;;  %v5540_v50 = vld [vmem:[#allocation11 + $0x54] sm:$0xf0]  ;;  %v6064_v52 = vsub.f32 %v6043_v20, %v2200_v43  ;;  %v4715_v36 = vld [vmem:[#allocation11 + $0x20] sm:$0xf] }
 0x139   :  { %v5276_v0 = vld [vmem:[#allocation6 + $0x1c] sm:$0xf]  ;;  %v4504_v9 = vor.u32 %v5476_v54, %v4501_v55  ;;  %v4803_v54 = vld [vmem:[#allocation11 + $0xd0] sm:$0xf]  ;;  %v5556_v55 = vld [vmem:[#allocation11 + $0xd4] sm:$0xf0]  ;;  %v4740_v63 = vor.u32 %v5540_v50, %v4739_v49 }
 0x13a   :  { %v3701_v1 = vld [vmem:[#allocation6 + $0x38] sm:$0xf0]  ;;  %2094 = vmatpush.bf16.msrb.mxu2 %v4248_v3  ;;  %v2299_v56 = vmul.f32 0.5, %v2298_v46  ;;  %v4804_v2 = vor.u32 %v5556_v55, %v4803_v54  ;;  %v5538_v3 = vld [vmem:[#allocation11 + $0x44] sm:$0xf0]  ;;  %v2376_v40 = vperm.slane %v6077_v8, 1 }
 0x13b   :  { %v5340_v4 = vld [vmem:[#allocation6 + $0x21c] sm:$0xf]  ;;  %v3704_v19 = vor.u32 %v5276_v0, %v3701_v1  ;;  %v4867_v0 = vld [vmem:[#allocation11 + $0x150] sm:$0xf]  ;;  %v5572_v1 = vld [vmem:[#allocation11 + $0x154] sm:$0xf0]  ;;  %v1876_v17 = vpop.f32.mrf.mxu1 }
 0x13c   :  { %v3957_v5 = vld [vmem:[#allocation6 + $0x238] sm:$0xf0]  ;;  %2107 = vmatpush.bf16.msrb.mxu3 %v4504_v9  ;;  %v2300_v20 = vsub.f32 1.5, %v2299_v56  ;;  %v4868_v7 = vor.u32 %v5572_v1, %v4867_v0  ;;  %v5534_v38 = vld [vmem:[#allocation11 + $0x24] sm:$0xf0] }
 0x13d   :  { %v5404_v6 = vld [vmem:[#allocation6 + $0x41c] sm:$0xf]  ;;  %v3960_v23 = vor.u32 %v5340_v4, %v3957_v5  ;;  %2069 = vmatpush.bf16.msrb.mxu0 %v3704_v19  ;;  %v4795_v4 = vld [vmem:[#allocation11 + $0xc0] sm:$0xf]  ;;  %v5554_v5 = vld [vmem:[#allocation11 + $0xc4] sm:$0xf0]  ;;  %v4716_v49 = vor.u32 %v5534_v38, %v4715_v36 }
 0x13e   :  { %v4213_v11 = vld [vmem:[#allocation6 + $0x438] sm:$0xf0]  ;;  %v4796_v16 = vor.u32 %v5554_v5, %v4795_v4  ;;  %v5536_v19 = vld [vmem:[#allocation11 + $0x34] sm:$0xf0]  ;;  %v4779_v24 = vld [vmem:[#allocation11 + $0xa0] sm:$0xf] }
 0x13f   :  { %v5468_v12 = vld [vmem:[#allocation6 + $0x61c] sm:$0xf]  ;;  %v4216_v47 = vor.u32 %v5404_v6, %v4213_v11  ;;  %2082 = vmatpush.bf16.msrb.mxu1 %v3960_v23  ;;  %v2301_v6 = vmul.f32 %v6056_v34, %v2300_v20  ;;  %v5550_v45 = vld [vmem:[#allocation11 + $0xa4] sm:$0xf0]  ;;  %v4707_v56 = vld [vmem:[#allocation11 + $0x10] sm:$0xf] }
 0x140   :  { %v4469_v14 = vld [vmem:[#allocation6 + $0x638] sm:$0xf0]  ;;  %2070 = vmatmul.bf16.vlgmr.msrb.gmra.mxu0 %v5976_v60  ;;  %v2216_v60 = vmul.f32 %v6064_v52, %v6064_v52  ;;  %v5566_v54 = vld [vmem:[#allocation11 + $0x124] sm:$0xf0]  ;;  %v4947_v4 = vld [vmem:[#allocation11 + $0x1f0] sm:$0xf] }
 0x141   :  { %v4472_v26 = vor.u32 %v5468_v12, %v4469_v14  ;;  %2095 = vmatpush.bf16.msrb.mxu2 %v4216_v47  ;;  %3208 = vmatpush.bf16.msra.mxu0 %v4756_v27  ;;  %v1863_v12 = vpop.f32.mrf.mxu0  ;;  %v5570_v14 = vld [vmem:[#allocation11 + $0x144] sm:$0xf0]  ;;  %v4787_v47 = vld [vmem:[#allocation11 + $0xb0] sm:$0xf]  ;;  %v5592_v5 = vld [vmem:[#allocation11 + $0x1f4] sm:$0xf0] }
 0x142   :  { %2083 = vmatmul.bf16.vlgmr.msrb.gmra.mxu1 %v5978_v62  ;;  %v4731_v62 = vld [vmem:[#allocation11 + $0x40] sm:$0xf]  ;;  %v1877_v23 = vadd.f32 %v1876_v17, %v1863_v12  ;;  %v4860_v27 = vor.u32 %v5570_v14, %v4859_v13  ;;  %v4788_v33 = vor.u32 %v5552_v25, %v4787_v47  ;;  %v5564_v12 = vld [vmem:[#allocation11 + $0x114] sm:$0xf0]  ;;  %v4948_v13 = vor.u32 %v5592_v5, %v4947_v4  ;;  %v5546_v17 = vld [vmem:[#allocation11 + $0x84] sm:$0xf0] }
 0x143   :  { %2108 = vmatpush.bf16.msrb.mxu3 %v4472_v26  ;;  %3221 = vmatpush.bf16.msra.mxu1 %v4820_v31  ;;  %v4732_v11 = vor.u32 %v5538_v3, %v4731_v62  ;;  %v2305_v26 = vsel %vm6094_vm6, %v6056_v34, %v2301_v6  ;;  %v5568_v31 = vld [vmem:[#allocation11 + $0x134] sm:$0xf0]  ;;  %v1889_v35 = vpop.f32.mrf.mxu2  ;;  %v2401_v3 = vperm.slane %v6103_v39, 1 }
 0x144   :  { %2096 = vmatmul.bf16.vlgmr.msrb.gmra.mxu2 %v5972_v53  ;;  %v2291_v53 = vmul.f32 %v6045_v41, %v2290_v51  ;;  %v2367_v34 = vmul.f32 %v2305_v26, %v6031_v37  ;;  %v1890_v43 = vadd.f32 %v1889_v35, %v1877_v23  ;;  %v4843_v51 = vld [vmem:[#allocation11 + $0x120] sm:$0xf]  ;;  %v4780_v37 = vor.u32 %v5550_v45, %v4779_v24  ;;  %v5548_v62 = vld [vmem:[#allocation11 + $0x94] sm:$0xf0]  ;;  %v5011_v23 = vld [vmem:[#allocation11 + $0x270] sm:$0xf] }
 0x145   :  { %3234 = vmatpush.bf16.msra.mxu2 %v4884_v42  ;;  %3209 = vmatpush.bf16.msra.mxu0 %v4748_v44  ;;  %v1902_v44 = vpop.f32.mrf.mxu3  ;;  %v5608_v47 = vld [vmem:[#allocation11 + $0x274] sm:$0xf0]  ;;  %v4939_v26 = vld [vmem:[#allocation11 + $0x1e0] sm:$0xf] }
 0x146   :  { %2109 = vmatmul.bf16.vlgmr.msrb.gmra.mxu3 %v5974_v57  ;;  %v2234_v57 = vrot.slane %v2216_v60, 4  ;;  %v2295_v21 = vsel %vm6083_vm5, %v6045_v41, %v2291_v53  ;;  %v4724_v41 = vor.u32 %v5536_v19, %v4723_v18  ;;  %v2392_v0 = vmul.f32 %v2376_v40, %v2367_v34  ;;  %v4699_v53 = vld [vmem:[#allocation11] sm:$0xf]  ;;  %v5606_v40 = vld [vmem:[#allocation11 + $0x264] sm:$0xf0] }
 0x147   :  { %3222 = vmatpush.bf16.msra.mxu1 %v4812_v48  ;;  %v2366_v59 = vmul.f32 %v2295_v21, %v6017_v30  ;;  %v4852_v30 = vor.u32 %v5568_v31, %v4851_v29  ;;  %v6107_v48 = vadd.f32 %v1902_v44, %v1890_v43  ;;  %3247 = vmatpush.bf16.msra.mxu3 %v4948_v13  ;;  %v4827_v29 = vld [vmem:[#allocation11 + $0x100] sm:$0xf]  ;;  %v5562_v31 = vld [vmem:[#allocation11 + $0x104] sm:$0xf0]  ;;  %v4931_v43 = vld [vmem:[#allocation11 + $0x1d0] sm:$0xf] }
 0x148   :  { %v2235_v9 = vadd.f32 %v2234_v57, %v2216_v60  ;;  %v2400_v60 = vperm.slane %v6103_v39, 0  ;;  %v4844_v57 = vor.u32 %v5566_v54, %v4843_v51  ;;  %v2417_v22 = vadd.f32 %v2401_v3, %v2392_v0  ;;  %v5003_v34 = vld [vmem:[#allocation11 + $0x260] sm:$0xf]  ;;  %v5588_v44 = vld [vmem:[#allocation11 + $0x1d4] sm:$0xf0] }
 0x149   :  { %3235 = vmatpush.bf16.msra.mxu2 %v4876_v61  ;;  %3210 = vmatpush.bf16.msra.mxu0 %v4740_v63  ;;  %v1865_v50 = vpop.f32.mrf.mxu0  ;;  %v2391_v55 = vmul.f32 %v2375_v32, %v2366_v59  ;;  %v5532_v61 = vld [vmem:[#allocation11 + $0x14] sm:$0xf0]  ;;  %v1878_v63 = vpop.f32.mrf.mxu1  ;;  %v2161_v20 = vrot.slane %v6107_v48, 4  ;;  %v5012_v35 = vor.u32 %v5608_v47, %v5011_v23  ;;  %v5602_v3 = vld [vmem:[#allocation11 + $0x244] sm:$0xf0] }
 0x14a   :  { %v2236_v58 = vrot.slane %v2235_v9, 2  ;;  %v2425_v38 = vmax.f32 %v2417_v22, 0.0  ;;  %v5004_v50 = vor.u32 %v5606_v40, %v5003_v34  ;;  %v5584_v4 = vld [vmem:[#allocation11 + $0x1b4] sm:$0xf0] }
 0x14b   :  { %3223 = vmatpush.bf16.msra.mxu1 %v4804_v2  ;;  %v4771_v2 = vld [vmem:[#allocation11 + $0x90] sm:$0xf]  ;;  %v2416_v18 = vadd.f32 %v2400_v60, %v2391_v55  ;;  %v1891_v19 = vpop.f32.mrf.mxu2  ;;  %v5586_v60 = vld [vmem:[#allocation11 + $0x1c4] sm:$0xf0] }
 0x14c   :  { %v2237_v28 = vadd.f32 %v2236_v58, %v2235_v9  ;;  %v4708_v9 = vor.u32 %v5532_v61, %v4707_v56  ;;  %v4772_v14 = vor.u32 %v5548_v62, %v4771_v2  ;;  %v6121_v54 = vpack.c.bf16 %v2425_v38, %v2425_v38  ;;  %v4995_v55 = vld [vmem:[#allocation11 + $0x250] sm:$0xf]  ;;  %v4923_v61 = vld [vmem:[#allocation11 + $0x1c0] sm:$0xf]  ;;  %v5582_v19 = vld [vmem:[#allocation11 + $0x1a4] sm:$0xf0] }
 0x14d   :  { %3236 = vmatpush.bf16.msra.mxu2 %v4868_v7  ;;  %3211 = vmatpush.bf16.msra.mxu0 %v4732_v11  ;;  %v2162_v7 = vadd.f32 %v2161_v20, %v6107_v48  ;;  %v4835_v11 = vld [vmem:[#allocation11 + $0x110] sm:$0xf]  ;;  %v1904_v58 = vpop.f32.mrf.mxu3  ;;  %v4924_v0 = vor.u32 %v5586_v60, %v4923_v61  ;;  %v4987_v62 = vld [vmem:[#allocation11 + $0x240] sm:$0xf] }
 0x14e   :  { %v2238_v42 = vrot.slane %v2237_v28, 1  ;;  %v4836_v25 = vor.u32 %v5564_v12, %v4835_v11  ;;  %v2377_v11 = vperm.slane %v6077_v8, 2  ;;  %v4955_v60 = vld [vmem:[#allocation11 + $0x200] sm:$0xf] }
 0x14f   :  { %3224 = vmatpush.bf16.msra.mxu1 %v4796_v16  ;;  %v4763_v16 = vld [vmem:[#allocation11 + $0x80] sm:$0xf]  ;;  %v2163_v21 = vrot.slane %v2162_v7, 2 }
 0x150   :  { %v2239_v46 = vadd.f32 %v2238_v42, %v2237_v28  ;;  %v4764_v32 = vor.u32 %v5546_v17, %v4763_v16  ;;  %v4828_v42 = vor.u32 %v5562_v31, %v4827_v29  ;;  %v4899_v29 = vld [vmem:[#allocation11 + $0x190] sm:$0xf]  ;;  %v5580_v31 = vld [vmem:[#allocation11 + $0x194] sm:$0xf0] }
 0x151   :  { %3237 = vmatpush.bf16.msra.mxu2 %v4860_v27  ;;  %3212 = vmatpush.bf16.msra.mxu0 %v4724_v41  ;;  %v5590_v27 = vld [vmem:[#allocation11 + $0x1e4] sm:$0xf0]  ;;  %v2164_v28 = vadd.f32 %v2163_v21, %v2162_v7  ;;  %v4700_v41 = vor.u32 %v5530_v15, %v4699_v53  ;;  %v5600_v15 = vld [vmem:[#allocation11 + $0x234] sm:$0xf0] }
 0x152   :  { %v2272_v1 = vmul.f32 %v2239_v46, %v6013_v10  ;;  %v4940_v59 = vor.u32 %v5590_v27, %v4939_v26  ;;  %v4971_v27 = vld [vmem:[#allocation11 + $0x220] sm:$0xf] }
 0x153   :  { %3225 = vmatpush.bf16.msra.mxu1 %v4788_v33  ;;  %v2424_v33 = vmax.f32 %v2416_v18, 0.0  ;;  %v2165_v36 = vrot.slane %v2164_v28, 1  ;;  %v4907_v18 = vld [vmem:[#allocation11 + $0x1a0] sm:$0xf] }
 0x154   :  { %v6113_v6 = vadd.f32 1e-05, %v2272_v1  ;;  %3248 = vmatpush.bf16.msra.mxu3 %v4940_v59  ;;  %v4908_v23 = vor.u32 %v5582_v19, %v4907_v18  ;;  %v5059_v19 = vld [vmem:[#allocation11 + $0x2d0] sm:$0xf] }
 0x155   :  { %3238 = vmatpush.bf16.msra.mxu2 %v4852_v30  ;;  %3213 = vmatpush.bf16.msra.mxu0 %v4716_v49  ;;  %v2166_v45 = vadd.f32 %v2165_v36, %v2164_v28  ;;  %v4932_v30 = vor.u32 %v5588_v44, %v4931_v43  ;;  %v6118_v49 = vpack.c.bf16 %v2424_v33, %v2424_v33  ;;  %v5598_v28 = vld [vmem:[#allocation11 + $0x224] sm:$0xf0]  ;;  %v4963_v43 = vld [vmem:[#allocation11 + $0x210] sm:$0xf]  ;;  %v5596_v44 = vld [vmem:[#allocation11 + $0x214] sm:$0xf0] }
 0x156   :  { %5694 = vrsqrt.f32 %v6113_v6  ;;  %vm2312_vm7 = vweird.f32 %v6113_v6  ;;  %v4900_v36 = vor.u32 %v5580_v31, %v4899_v29  ;;  %v5618_v29 = vld [vmem:[#allocation11 + $0x2c4] sm:$0xf0] }
 0x157   :  { %3226 = vmatpush.bf16.msra.mxu1 %v4780_v37  ;;  %v2201_v51 = vmul.f32 %v6013_v10, %v2166_v45  ;;  %v5604_v37 = vld [vmem:[#allocation11 + $0x254] sm:$0xf0]  ;;  %v4891_v45 = vld [vmem:[#allocation11 + $0x180] sm:$0xf] }
 0x158   :  { %3249 = vmatpush.bf16.msra.mxu3 %v4932_v30  ;;  %v4996_v20 = vor.u32 %v5604_v37, %v4995_v55  ;;  %v5578_v30 = vld [vmem:[#allocation11 + $0x184] sm:$0xf0]  ;;  %v4964_v37 = vor.u32 %v5596_v44, %v4963_v43  ;;  %v2378_v43 = vperm.slane %v6077_v8, 3 }
 0x159   :  { %3239 = vmatpush.bf16.msra.mxu2 %v4844_v57  ;;  %3214 = vmatpush.bf16.msra.mxu0 %v4708_v9  ;;  %v6125_v63 = vsub.f32 %v6107_v48, %v2201_v51  ;;  %v4915_v57 = vld [vmem:[#allocation11 + $0x1b0] sm:$0xf]  ;;  %v4988_v9 = vor.u32 %v5602_v3, %v4987_v62  ;;  %v1915_v13 = vpop.f32.mrf.mxu0  ;;  %v4892_v55 = vor.u32 %v5578_v30, %v4891_v45  ;;  %v5543_v62 = vld [vmem:[#allocation11 + $0x74] sm:$0xf]  ;;  %v4725_v30 = vld [vmem:[#allocation11 + $0x38] sm:$0xf0] }
 0x15a   :  { %v4916_v5 = vor.u32 %v5584_v4, %v4915_v57  ;;  %v4757_v4 = vld [vmem:[#allocation11 + $0x78] sm:$0xf0] }
 0x15b   :  { %3227 = vmatpush.bf16.msra.mxu1 %v4772_v14  ;;  %v2217_v2 = vmul.f32 %v6125_v63, %v6125_v63  ;;  %v4979_v14 = vld [vmem:[#allocation11 + $0x230] sm:$0xf]  ;;  %v1928_v17 = vpop.f32.mrf.mxu1 }
 0x15c   :  { %v5695_v24 = vpop.eup %5694  ;;  %3250 = vmatpush.bf16.msra.mxu3 %v4924_v0  ;;  %v1929_v58 = vadd.f32 %v1928_v17, %v1915_v13  ;;  %v4980_v47 = vor.u32 %v5600_v15, %v4979_v14  ;;  %v5594_v0 = vld [vmem:[#allocation11 + $0x204] sm:$0xf0]  ;;  %v4749_v15 = vld [vmem:[#allocation11 + $0x68] sm:$0xf0] }
 0x15d   :  { %3240 = vmatpush.bf16.msra.mxu2 %v4836_v25  ;;  %3215 = vmatpush.bf16.msra.mxu0 %v4700_v41  ;;  %v2307_v46 = vmul.f32 %v5695_v24, %v6113_v6  ;;  %vm2313_vm8 = vweird.f32 %v5695_v24  ;;  %v2240_v48 = vrot.slane %v2217_v2, 4  ;;  %v2402_v6 = vperm.slane %v6103_v39, 2 }
 0x15e   :  { %vm2314_vm9 = vmor %vm2312_vm7, %vm2313_vm8 }
 0x15f   :  { %3228 = vmatpush.bf16.msra.mxu1 %v4764_v32  ;;  %v2308_v56 = vmul.f32 %v5695_v24, %v2307_v46  ;;  %v2241_v12 = vadd.f32 %v2240_v48, %v2217_v2  ;;  %v5624_v2 = vld [vmem:[#allocation11 + $0x2f4] sm:$0xf0]  ;;  %v4956_v48 = vor.u32 %v5594_v0, %v4955_v60  ;;  %v5035_v0 = vld [vmem:[#allocation11 + $0x2a0] sm:$0xf] }
 0x160   :  { %3216 = vmatmul.bf16.vlgmr.msra.gmra.mxu0 %v6118_v49  ;;  %3251 = vmatpush.bf16.msra.mxu3 %v4916_v5 }
 0x161   :  { %3260 = vmatpush.bf16.msrb.mxu0 %v5012_v35  ;;  %3241 = vmatpush.bf16.msra.mxu2 %v4828_v42  ;;  %v2309_v1 = vmul.f32 0.5, %v2308_v56  ;;  %v2242_v22 = vrot.slane %v2241_v12, 2  ;;  %v1917_v42 = vpop.f32.mrf.mxu0 }
 0x162   :  { %3229 = vmatmul.bf16.vlgmr.msra.gmra.mxu1 %v6121_v54  ;;  %v5535_v42 = vld [vmem:[#allocation11 + $0x34] sm:$0xf] }
 0x163   :  { %v2310_v53 = vsub.f32 1.5, %v2309_v1  ;;  %v2243_v26 = vadd.f32 %v2242_v22, %v2241_v12  ;;  %v1941_v41 = vpop.f32.mrf.mxu2  ;;  %v5541_v12 = vld [vmem:[#allocation11 + $0x64] sm:$0xf]  ;;  %v5539_v22 = vld [vmem:[#allocation11 + $0x54] sm:$0xf]  ;;  %v4728_v60 = vor.u32 %v5535_v42, %v4725_v30 }
 0x164   :  { %3252 = vmatpush.bf16.msra.mxu3 %v4908_v23  ;;  %v1942_v32 = vadd.f32 %v1941_v41, %v1929_v58  ;;  %v5051_v41 = vld [vmem:[#allocation11 + $0x2c0] sm:$0xf]  ;;  %v4813_v30 = vld [vmem:[#allocation11 + $0xe8] sm:$0xf0] }
 0x165   :  { %3261 = vmatpush.bf16.msrb.mxu0 %v5004_v50  ;;  %v2311_v7 = vmul.f32 %v5695_v24, %v2310_v53  ;;  %v2244_v59 = vrot.slane %v2243_v26, 1  ;;  %v1954_v33 = vpop.f32.mrf.mxu3 }
 0x166   :  { %v1955_v34 = vadd.f32 %v1954_v33, %v1942_v32  ;;  %v5537_v32 = vld [vmem:[#allocation11 + $0x44] sm:$0xf]  ;;  %v4733_v33 = vld [vmem:[#allocation11 + $0x48] sm:$0xf0] }
 0x167   :  { %v2315_v16 = vsel %vm2314_vm9, %v5695_v24, %v2311_v7  ;;  %v2245_v38 = vadd.f32 %v2244_v59, %v2243_v26  ;;  %v1930_v24 = vpop.f32.mrf.mxu1  ;;  %v4760_v7 = vor.u32 %v5543_v62, %v4757_v4  ;;  %v5052_v59 = vor.u32 %v5618_v29, %v5051_v41  ;;  %v4701_v29 = vld [vmem:[#allocation11 + $0x8] sm:$0xf0] }
 0x168   :  { %v2368_v21 = vmul.f32 %v2315_v16, %v6064_v52  ;;  %v4972_v52 = vor.u32 %v5598_v28, %v4971_v27  ;;  %3253 = vmatpush.bf16.msra.mxu3 %v4900_v36  ;;  %v2167_v50 = vrot.slane %v1955_v34, 4 }
 0x169   :  { %3262 = vmatpush.bf16.msrb.mxu0 %v4996_v20  ;;  %v2273_v46 = vmul.f32 %v2245_v38, %v6013_v10  ;;  %v5075_v20 = vld [vmem:[#allocation11 + $0x2f0] sm:$0xf] }
 0x16a   :  { %v2393_v25 = vmul.f32 %v2377_v11, %v2368_v21  ;;  %v2168_v61 = vadd.f32 %v2167_v50, %v1955_v34  ;;  %v5076_v57 = vor.u32 %v5624_v2, %v5075_v20  ;;  %v5622_v11 = vld [vmem:[#allocation11 + $0x2e4] sm:$0xf0]  ;;  %v5620_v21 = vld [vmem:[#allocation11 + $0x2d4] sm:$0xf0]  ;;  %v5533_v20 = vld [vmem:[#allocation11 + $0x24] sm:$0xf] }
 0x16b   :  { %v2281_v56 = vadd.f32 1e-05, %v2273_v46  ;;  %v1943_v1 = vpop.f32.mrf.mxu2  ;;  %v5060_v23 = vor.u32 %v5620_v21, %v5059_v19 }
 0x16c   :  { %v2418_v35 = vadd.f32 %v2402_v6, %v2393_v25  ;;  %3254 = vmatpush.bf16.msra.mxu3 %v4892_v55  ;;  %v2169_v3 = vrot.slane %v2168_v61, 2  ;;  %3273 = vmatpush.bf16.msrb.mxu1 %v5076_v57  ;;  %v4752_v6 = vor.u32 %v5541_v12, %v4749_v15  ;;  %v2403_v55 = vperm.slane %v6103_v39, 3  ;;  %v5614_v1 = vld [vmem:[#allocation11 + $0x2a4] sm:$0xf0]  ;;  %v5531_v12 = vld [vmem:[#allocation11 + $0x14] sm:$0xf] }
 0x16d   :  { %3263 = vmatpush.bf16.msrb.mxu0 %v4988_v9  ;;  %5696 = vrsqrt.f32 %v2281_v56  ;;  %v1956_v53 = vpop.f32.mrf.mxu3  ;;  %v5067_v9 = vld [vmem:[#allocation11 + $0x2e0] sm:$0xf]  ;;  %vm2322_vm10 = vweird.f32 %v2281_v56 }
 0x16e   :  { %v2426_v40 = vmax.f32 %v2418_v35, 0.0  ;;  %v2170_v5 = vadd.f32 %v2169_v3, %v2168_v61  ;;  %v5068_v14 = vor.u32 %v5622_v11, %v5067_v9  ;;  %v5036_v3 = vor.u32 %v5614_v1, %v5035_v0  ;;  %v4717_v53 = vld [vmem:[#allocation11 + $0x28] sm:$0xf0]  ;;  %v5027_v9 = vld [vmem:[#allocation11 + $0x290] sm:$0xf] }
 0x16f   :  { %v5612_v11 = vld [vmem:[#allocation11 + $0x294] sm:$0xf0] }
 0x170   :  { %v6135_v51 = vpack.c.bf16 %v2426_v40, %v2426_v40  ;;  %v2171_v13 = vrot.slane %v2170_v5, 1  ;;  %3274 = vmatpush.bf16.msrb.mxu1 %v5068_v14  ;;  %v5616_v40 = vld [vmem:[#allocation11 + $0x2b4] sm:$0xf0] }
 0x171   :  { %3264 = vmatpush.bf16.msrb.mxu0 %v4980_v47  ;;  %v4741_v47 = vld [vmem:[#allocation11 + $0x58] sm:$0xf0] }
 0x172   :  { %3242 = vmatmul.bf16.vlgmr.msra.gmra.mxu2 %v6135_v51  ;;  %v2172_v17 = vadd.f32 %v2171_v13, %v2170_v5  ;;  %v4744_v27 = vor.u32 %v5539_v22, %v4741_v47  ;;  %v5610_v47 = vld [vmem:[#allocation11 + $0x284] sm:$0xf0] }
 0x173   :  { %v5697_v16 = vpop.eup %5696 }
 0x174   :  { %v2317_v18 = vmul.f32 %v5697_v16, %v2281_v56  ;;  %v2202_v58 = vmul.f32 %v6013_v10, %v2172_v17  ;;  %3275 = vmatpush.bf16.msrb.mxu1 %v5060_v23  ;;  %vm2323_vm11 = vweird.f32 %v5697_v16  ;;  %v5028_v17 = vor.u32 %v5612_v11, %v5027_v9  ;;  %v5019_v23 = vld [vmem:[#allocation11 + $0x280] sm:$0xf] }
 0x175   :  { %3265 = vmatpush.bf16.msrb.mxu0 %v4972_v52  ;;  %v4736_v52 = vor.u32 %v5537_v32, %v4733_v33  ;;  %vm2324_vm12 = vmor %vm2322_vm10, %vm2323_vm11  ;;  %v5020_v41 = vor.u32 %v5610_v47, %v5019_v23  ;;  %v5640_v32 = vld [vmem:[#allocation11 + $0x374] sm:$0xf0]  ;;  %v5559_v33 = vld [vmem:[#allocation11 + $0xf4] sm:$0xf] }
 0x176   :  { %v2318_v25 = vmul.f32 %v5697_v16, %v2317_v18  ;;  %v6139_v26 = vsub.f32 %v1955_v34, %v2202_v58  ;;  %v5043_v34 = vld [vmem:[#allocation11 + $0x2b0] sm:$0xf] }
 0x177   :  { %v5044_v45 = vor.u32 %v5616_v40, %v5043_v34 }
 0x178   :  { %v2319_v28 = vmul.f32 0.5, %v2318_v25  ;;  %v2218_v31 = vmul.f32 %v6139_v26, %v6139_v26  ;;  %3276 = vmatpush.bf16.msrb.mxu1 %v5052_v59  ;;  %v5529_v25 = vld [vmem:[#allocation11 + $0x4] sm:$0xf] }
 0x179   :  { %3266 = vmatpush.bf16.msrb.mxu0 %v4964_v37  ;;  %v1967_v24 = vpop.f32.mrf.mxu0 }
 0x17a   :  { %v2320_v35 = vsub.f32 1.5, %v2319_v28  ;;  %v2246_v36 = vrot.slane %v2218_v31, 4 }
 0x17b   :  { %v1980_v50 = vpop.f32.mrf.mxu1 }
 0x17c   :  { %v2321_v38 = vmul.f32 %v5697_v16, %v2320_v35  ;;  %v2247_v44 = vadd.f32 %v2246_v36, %v2218_v31  ;;  %v1981_v61 = vadd.f32 %v1980_v50, %v1967_v24  ;;  %3277 = vmatpush.bf16.msrb.mxu1 %v5044_v45  ;;  %v5139_v31 = vld [vmem:[#allocation11 + $0x370] sm:$0xf]  ;;  %v4821_v35 = vld [vmem:[#allocation11 + $0xf8] sm:$0xf0]  ;;  %v5557_v24 = vld [vmem:[#allocation11 + $0xe4] sm:$0xf] }
 0x17d   :  { %3267 = vmatpush.bf16.msrb.mxu0 %v4956_v48  ;;  %v5140_v34 = vor.u32 %v5640_v32, %v5139_v31  ;;  %v4824_v40 = vor.u32 %v5559_v33, %v4821_v35  ;;  %v4816_v50 = vor.u32 %v5557_v24, %v4813_v30  ;;  %v5099_v31 = vld [vmem:[#allocation11 + $0x320] sm:$0xf]  ;;  %v5549_v33 = vld [vmem:[#allocation11 + $0xa4] sm:$0xf]  ;;  %v4781_v35 = vld [vmem:[#allocation11 + $0xa8] sm:$0xf0] }
 0x17e   :  { %v2325_v46 = vsel %vm2324_vm12, %v5697_v16, %v2321_v38  ;;  %v2248_v56 = vrot.slane %v2247_v44, 2  ;;  %v4704_v38 = vor.u32 %v5529_v25, %v4701_v29  ;;  %v2404_v29 = vperm.slane %v6103_v39, 4  ;;  %v5091_v24 = vld [vmem:[#allocation11 + $0x310] sm:$0xf] }
 0x17f   :  { %v2369_v37 = vmul.f32 %v2325_v46, %v6125_v63  ;;  %v4720_v63 = vor.u32 %v5533_v20, %v4717_v53  ;;  %3286 = vmatpush.bf16.msrb.mxu2 %v5140_v34  ;;  %v4805_v20 = vld [vmem:[#allocation11 + $0xd8] sm:$0xf0]  ;;  %v5607_v34 = vld [vmem:[#allocation11 + $0x274] sm:$0xf] }
 0x180   :  { %v2249_v62 = vadd.f32 %v2248_v56, %v2247_v44  ;;  %3278 = vmatpush.bf16.msrb.mxu1 %v5036_v3  ;;  %v5638_v44 = vld [vmem:[#allocation11 + $0x364] sm:$0xf0]  ;;  %v5123_v56 = vld [vmem:[#allocation11 + $0x350] sm:$0xf] }
 0x181   :  { %3312 = vmatpush.bf16.msra.mxu0 %v4760_v7  ;;  %v2394_v2 = vmul.f32 %v2378_v43, %v2369_v37  ;;  %v1969_v16 = vpop.f32.mrf.mxu0  ;;  %v5131_v43 = vld [vmem:[#allocation11 + $0x360] sm:$0xf] }
 0x182   :  { %v2250_v4 = vrot.slane %v2249_v62, 1  ;;  %v5132_v45 = vor.u32 %v5638_v44, %v5131_v43 }
 0x183   :  { %v1993_v57 = vpop.f32.mrf.mxu2  ;;  %v2419_v7 = vadd.f32 %v2403_v55, %v2394_v2  ;;  %v1982_v18 = vpop.f32.mrf.mxu1 }
 0x184   :  { %v1994_v48 = vadd.f32 %v1993_v57, %v1981_v61  ;;  %v2251_v13 = vadd.f32 %v2250_v4, %v2249_v62  ;;  %3279 = vmatpush.bf16.msrb.mxu1 %v5028_v17  ;;  %3287 = vmatpush.bf16.msrb.mxu2 %v5132_v45  ;;  %v5636_v61 = vld [vmem:[#allocation11 + $0x354] sm:$0xf0]  ;;  %v5115_v57 = vld [vmem:[#allocation11 + $0x340] sm:$0xf]  ;;  %v5634_v4 = vld [vmem:[#allocation11 + $0x344] sm:$0xf0] }
 0x185   :  { %3313 = vmatpush.bf16.msra.mxu0 %v4752_v6  ;;  %v2006_v5 = vpop.f32.mrf.mxu3  ;;  %v2427_v15 = vmax.f32 %v2419_v7, 0.0  ;;  %v4709_v6 = vld [vmem:[#allocation11 + $0x18] sm:$0xf0]  ;;  %v5124_v1 = vor.u32 %v5636_v61, %v5123_v56  ;;  %v5116_v7 = vor.u32 %v5634_v4, %v5115_v57  ;;  %v5628_v45 = vld [vmem:[#allocation11 + $0x314] sm:$0xf0] }
 0x186   :  { %v2007_v14 = vadd.f32 %v2006_v5, %v1994_v48  ;;  %v2274_v19 = vmul.f32 %v2251_v13, %v6013_v10  ;;  %v4712_v58 = vor.u32 %v5531_v12, %v4709_v6  ;;  %v5553_v48 = vld [vmem:[#allocation11 + $0xc4] sm:$0xf]  ;;  %v5551_v6 = vld [vmem:[#allocation11 + $0xb4] sm:$0xf]  ;;  %v4789_v18 = vld [vmem:[#allocation11 + $0xb8] sm:$0xf0]  ;;  %v5092_v30 = vor.u32 %v5628_v45, %v5091_v24 }
 0x187   :  { %v6147_v22 = vpack.c.bf16 %v2427_v15, %v2427_v15  ;;  %v5632_v15 = vld [vmem:[#allocation11 + $0x334] sm:$0xf0]  ;;  %v4792_v23 = vor.u32 %v5551_v6, %v4789_v18  ;;  %v5083_v4 = vld [vmem:[#allocation11 + $0x300] sm:$0xf]  ;;  %v4885_v6 = vld [vmem:[#allocation11 + $0x178] sm:$0xf0] }
 0x188   :  { %v2173_v21 = vrot.slane %v2007_v14, 4  ;;  %3280 = vmatpush.bf16.msrb.mxu1 %v5020_v41  ;;  %3288 = vmatpush.bf16.msrb.mxu2 %v5124_v1 }
 0x189   :  { %3314 = vmatpush.bf16.msra.mxu0 %v4744_v27  ;;  %v6149_v27 = vadd.f32 1e-05, %v2274_v19  ;;  %3255 = vmatmul.bf16.vlgmr.msra.gmra.mxu3 %v6147_v22  ;;  %v2379_v19 = vperm.slane %v6077_v8, 4 }
 0x18a   :  { %v2174_v28 = vadd.f32 %v2173_v21, %v2007_v14 }
 0x18b   :  { %v1995_v59 = vpop.f32.mrf.mxu2  ;;  %5698 = vrsqrt.f32 %v6149_v27  ;;  %vm2332_vm13 = vweird.f32 %v6149_v27 }
 0x18c   :  { %v2175_v36 = vrot.slane %v2174_v28, 2  ;;  %3325 = vmatpush.bf16.msra.mxu1 %v4824_v40  ;;  %3289 = vmatpush.bf16.msrb.mxu2 %v5116_v7  ;;  %v5630_v59 = vld [vmem:[#allocation11 + $0x324] sm:$0xf0]  ;;  %v5013_v40 = vld [vmem:[#allocation11 + $0x278] sm:$0xf0] }
 0x18d   :  { %3315 = vmatpush.bf16.msra.mxu0 %v4736_v52  ;;  %v2008_v52 = vpop.f32.mrf.mxu3  ;;  %v5100_v32 = vor.u32 %v5630_v59, %v5099_v31  ;;  %v5545_v7 = vld [vmem:[#allocation11 + $0x84] sm:$0xf]  ;;  %v4877_v31 = vld [vmem:[#allocation11 + $0x168] sm:$0xf0] }
 0x18e   :  { %v2176_v42 = vadd.f32 %v2175_v36, %v2174_v28  ;;  %v4784_v52 = vor.u32 %v5549_v33, %v4781_v35  ;;  %v5601_v35 = vld [vmem:[#allocation11 + $0x244] sm:$0xf] }
 0x190   :  { %v2177_v46 = vrot.slane %v2176_v42, 1  ;;  %3326 = vmatpush.bf16.msra.mxu1 %v4816_v50  ;;  %v4773_v50 = vld [vmem:[#allocation11 + $0x98] sm:$0xf0] }
 0x191   :  { %3316 = vmatpush.bf16.msra.mxu0 %v4728_v60  ;;  %v5699_v55 = vpop.eup %5698  ;;  %v5555_v60 = vld [vmem:[#allocation11 + $0xd4] sm:$0xf] }
 0x192   :  { %v2178_v37 = vadd.f32 %v2177_v46, %v2176_v42  ;;  %v2327_v0 = vmul.f32 %v5699_v55, %v6149_v27  ;;  %v4808_v62 = vor.u32 %v5555_v60, %v4805_v20  ;;  %vm2333_vm14 = vweird.f32 %v5699_v55  ;;  %v5547_v46 = vld [vmem:[#allocation11 + $0x94] sm:$0xf]  ;;  %v5605_v20 = vld [vmem:[#allocation11 + $0x264] sm:$0xf] }
 0x193   :  { %vm2334_vm15 = vmor %vm2332_vm13, %vm2333_vm14  ;;  %v4776_v60 = vor.u32 %v5547_v46, %v4773_v50  ;;  %v4981_v46 = vld [vmem:[#allocation11 + $0x238] sm:$0xf0] }
 0x194   :  { %v2203_v2 = vmul.f32 %v6013_v10, %v2178_v37  ;;  %v2328_v3 = vmul.f32 %v5699_v55, %v2327_v0  ;;  %3327 = vmatpush.bf16.msra.mxu1 %v4808_v62  ;;  %v5016_v0 = vor.u32 %v5607_v34, %v5013_v40 }
 0x195   :  { %3317 = vmatpush.bf16.msra.mxu0 %v4720_v63  ;;  %v4797_v63 = vld [vmem:[#allocation11 + $0xc8] sm:$0xf0] }
 0x196   :  { %v6155_v53 = vsub.f32 %v2007_v14, %v2203_v2  ;;  %v2329_v5 = vmul.f32 0.5, %v2328_v3  ;;  %v4800_v11 = vor.u32 %v5553_v48, %v4797_v63  ;;  %v5107_v14 = vld [vmem:[#allocation11 + $0x330] sm:$0xf]  ;;  %v5005_v2 = vld [vmem:[#allocation11 + $0x268] sm:$0xf0] }
 0x197   :  { %v5108_v17 = vor.u32 %v5632_v15, %v5107_v14  ;;  %v5626_v48 = vld [vmem:[#allocation11 + $0x304] sm:$0xf0]  ;;  %v4765_v63 = vld [vmem:[#allocation11 + $0x88] sm:$0xf0]  ;;  %v5008_v15 = vor.u32 %v5605_v20, %v5005_v2 }
 0x198   :  { %v2219_v9 = vmul.f32 %v6155_v53, %v6155_v53  ;;  %v2330_v12 = vsub.f32 1.5, %v2329_v5  ;;  %3328 = vmatpush.bf16.msra.mxu1 %v4800_v11  ;;  %v5084_v5 = vor.u32 %v5626_v48, %v5083_v4  ;;  %v5597_v4 = vld [vmem:[#allocation11 + $0x224] sm:$0xf]  ;;  %v4973_v48 = vld [vmem:[#allocation11 + $0x228] sm:$0xf0] }
 0x199   :  { %3318 = vmatpush.bf16.msra.mxu0 %v4712_v58  ;;  %3290 = vmatpush.bf16.msrb.mxu2 %v5108_v17  ;;  %v5575_v17 = vld [vmem:[#allocation11 + $0x174] sm:$0xf] }
 0x19a   :  { %v2252_v13 = vrot.slane %v2219_v9, 4  ;;  %v2331_v16 = vmul.f32 %v5699_v55, %v2330_v12  ;;  %v2019_v58 = vpop.f32.mrf.mxu0  ;;  %v4768_v12 = vor.u32 %v5545_v7, %v4765_v63  ;;  %v5171_v7 = vld [vmem:[#allocation11 + $0x3b0] sm:$0xf] }
 0x19c   :  { %v2253_v21 = vadd.f32 %v2252_v13, %v2219_v9  ;;  %v2335_v47 = vsel %vm2334_vm15, %v5699_v55, %v2331_v16  ;;  %v2032_v25 = vpop.f32.mrf.mxu1  ;;  %3329 = vmatpush.bf16.msra.mxu1 %v4792_v23  ;;  %v5203_v13 = vld [vmem:[#allocation11 + $0x3f0] sm:$0xf]  ;;  %v5656_v16 = vld [vmem:[#allocation11 + $0x3f4] sm:$0xf0] }
 0x19d   :  { %3319 = vmatpush.bf16.msra.mxu0 %v4704_v38  ;;  %v2370_v27 = vmul.f32 %v2335_v47, %v6139_v26  ;;  %v2033_v41 = vadd.f32 %v2032_v25, %v2019_v58  ;;  %3291 = vmatpush.bf16.msrb.mxu2 %v5100_v32  ;;  %v4997_v58 = vld [vmem:[#allocation11 + $0x258] sm:$0xf0]  ;;  %v5204_v23 = vor.u32 %v5656_v16, %v5203_v13  ;;  %v5195_v25 = vld [vmem:[#allocation11 + $0x3e0] sm:$0xf]  ;;  %v5567_v13 = vld [vmem:[#allocation11 + $0x134] sm:$0xf] }
 0x19e   :  { %v2254_v28 = vrot.slane %v2253_v21, 2  ;;  %v4888_v47 = vor.u32 %v5575_v17, %v4885_v6  ;;  %v4976_v17 = vor.u32 %v5597_v4, %v4973_v48  ;;  %v5561_v4 = vld [vmem:[#allocation11 + $0x104] sm:$0xf] }
 0x19f   :  { %v2395_v36 = vmul.f32 %v2379_v19, %v2370_v27  ;;  %v5654_v27 = vld [vmem:[#allocation11 + $0x3e4] sm:$0xf0]  ;;  %3299 = vmatpush.bf16.msrb.mxu3 %v5204_v23  ;;  %v2405_v23 = vperm.slane %v6103_v39, 5  ;;  %v5623_v39 = vld [vmem:[#allocation11 + $0x2f4] sm:$0xf] }
 0x1a0   :  { %v2255_v8 = vadd.f32 %v2254_v28, %v2253_v21  ;;  %3330 = vmatpush.bf16.msra.mxu1 %v4784_v52  ;;  %v5603_v21 = vld [vmem:[#allocation11 + $0x254] sm:$0xf]  ;;  %v5573_v28 = vld [vmem:[#allocation11 + $0x164] sm:$0xf]  ;;  %v5652_v52 = vld [vmem:[#allocation11 + $0x3d4] sm:$0xf0] }
 0x1a1   :  { %v2420_v44 = vadd.f32 %v2404_v29, %v2395_v36  ;;  %3292 = vmatpush.bf16.msrb.mxu2 %v5092_v30  ;;  %v5196_v29 = vor.u32 %v5654_v27, %v5195_v25  ;;  %v5000_v59 = vor.u32 %v5603_v21, %v4997_v58  ;;  %v4880_v32 = vor.u32 %v5573_v28, %v4877_v31  ;;  %v4989_v36 = vld [vmem:[#allocation11 + $0x248] sm:$0xf0]  ;;  %v5599_v30 = vld [vmem:[#allocation11 + $0x234] sm:$0xf]  ;;  %v4965_v58 = vld [vmem:[#allocation11 + $0x218] sm:$0xf0] }
 0x1a2   :  { %v2256_v42 = vrot.slane %v2255_v8, 1  ;;  %v2021_v61 = vpop.f32.mrf.mxu0  ;;  %v4984_v2 = vor.u32 %v5599_v30, %v4981_v46  ;;  %v5163_v25 = vld [vmem:[#allocation11 + $0x3a0] sm:$0xf]  ;;  %v5646_v27 = vld [vmem:[#allocation11 + $0x3a4] sm:$0xf0] }
 0x1a3   :  { %v2428_v56 = vmax.f32 %v2420_v44, 0.0  ;;  %3300 = vmatpush.bf16.msrb.mxu3 %v5196_v29  ;;  %v4992_v44 = vor.u32 %v5601_v35, %v4989_v36  ;;  %v5569_v61 = vld [vmem:[#allocation11 + $0x144] sm:$0xf]  ;;  %v4837_v46 = vld [vmem:[#allocation11 + $0x118] sm:$0xf0] }
 0x1a4   :  { %v2045_v38 = vpop.f32.mrf.mxu2  ;;  %v2257_v55 = vadd.f32 %v2256_v42, %v2255_v8  ;;  %v2034_v1 = vpop.f32.mrf.mxu1  ;;  %3331 = vmatpush.bf16.msra.mxu1 %v4776_v60  ;;  %v5187_v8 = vld [vmem:[#allocation11 + $0x3d0] sm:$0xf]  ;;  %v5565_v28 = vld [vmem:[#allocation11 + $0x124] sm:$0xf] }
 0x1a5   :  { %v2046_v43 = vadd.f32 %v2045_v38, %v2033_v41  ;;  %v6167_v57 = vpack.c.bf16 %v2428_v56, %v2428_v56  ;;  %3293 = vmatpush.bf16.msrb.mxu2 %v5084_v5  ;;  %v5571_v38 = vld [vmem:[#allocation11 + $0x154] sm:$0xf]  ;;  %v5188_v42 = vor.u32 %v5652_v52, %v5187_v8  ;;  %v5650_v56 = vld [vmem:[#allocation11 + $0x3c4] sm:$0xf0]  ;;  %v4861_v1 = vld [vmem:[#allocation11 + $0x148] sm:$0xf0] }
 0x1a6   :  { %v2058_v26 = vpop.f32.mrf.mxu3  ;;  %v2275_v62 = vmul.f32 %v2257_v55, %v6013_v10  ;;  %v5179_v55 = vld [vmem:[#allocation11 + $0x3c0] sm:$0xf]  ;;  %v5593_v8 = vld [vmem:[#allocation11 + $0x204] sm:$0xf]  ;;  %v4957_v52 = vld [vmem:[#allocation11 + $0x208] sm:$0xf0] }
 0x1a7   :  { %v6163_v37 = vadd.f32 %v2058_v26, %v2046_v43  ;;  %3268 = vmatmul.bf16.vlgmr.msrb.gmra.mxu0 %v6167_v57  ;;  %v4869_v43 = vld [vmem:[#allocation11 + $0x158] sm:$0xf0]  ;;  %3301 = vmatpush.bf16.msrb.mxu3 %v5188_v42  ;;  %v5563_v42 = vld [vmem:[#allocation11 + $0x114] sm:$0xf] }
 0x1a8   :  { %v6169_v9 = vadd.f32 1e-05, %v2275_v62  ;;  %3364 = vmatpush.bf16.msrb.mxu0 %v5016_v0  ;;  %3332 = vmatpush.bf16.msra.mxu1 %v4768_v12  ;;  %v4872_v24 = vor.u32 %v5571_v38, %v4869_v43  ;;  %v5180_v0 = vor.u32 %v5650_v56, %v5179_v55  ;;  %v4864_v62 = vor.u32 %v5569_v61, %v4861_v1 }
 0x1a9   :  { %v2179_v3 = vrot.slane %v6163_v37, 4  ;;  %3338 = vmatpush.bf16.msra.mxu2 %v4888_v47  ;;  %v4960_v55 = vor.u32 %v5593_v8, %v4957_v52  ;;  %v4840_v56 = vor.u32 %v5563_v42, %v4837_v46  ;;  %v5615_v52 = vld [vmem:[#allocation11 + $0x2b4] sm:$0xf] }
 0x1aa   :  { %5700 = vrsqrt.f32 %v6169_v9  ;;  %vm2342_vm0 = vweird.f32 %v6169_v9  ;;  %v5583_v46 = vld [vmem:[#allocation11 + $0x1b4] sm:$0xf] }
 0x1ab   :  { %v2180_v11 = vadd.f32 %v2179_v3, %v6163_v37  ;;  %3302 = vmatpush.bf16.msrb.mxu3 %v5180_v0 }
 0x1ac   :  { %v2047_v14 = vpop.f32.mrf.mxu2  ;;  %3365 = vmatpush.bf16.msrb.mxu0 %v5008_v15 }
 0x1ad   :  { %v2181_v18 = vrot.slane %v2180_v11, 2  ;;  %3339 = vmatpush.bf16.msra.mxu2 %v4880_v32  ;;  %v4853_v14 = vld [vmem:[#allocation11 + $0x138] sm:$0xf0] }
 0x1ae   :  { %v2060_v19 = vpop.f32.mrf.mxu3  ;;  %v4856_v6 = vor.u32 %v5567_v13, %v4853_v14  ;;  %v5591_v13 = vld [vmem:[#allocation11 + $0x1f4] sm:$0xf]  ;;  %v4949_v14 = vld [vmem:[#allocation11 + $0x1f8] sm:$0xf0] }
 0x1af   :  { %v2182_v41 = vadd.f32 %v2181_v18, %v2180_v11  ;;  %v6186_v18 = vld [vmem:[#allocation8] sm:$0xff] }
 0x1b0   :  { %v5701_v34 = vpop.eup %5700  ;;  %3366 = vmatpush.bf16.msrb.mxu0 %v5000_v59  ;;  %v2380_v19 = vperm.slane %v6186_v18, 5  ;;  %v4845_v59 = vld [vmem:[#allocation11 + $0x128] sm:$0xf0] }
 0x1b1   :  { %v2183_v33 = vrot.slane %v2182_v41, 1  ;;  %v2337_v26 = vmul.f32 %v5701_v34, %v6169_v9  ;;  %3340 = vmatpush.bf16.msra.mxu2 %v4872_v24  ;;  %vm2343_vm1 = vweird.f32 %v5701_v34  ;;  %v5164_v9 = vor.u32 %v5646_v27, %v5163_v25  ;;  %v4941_v25 = vld [vmem:[#allocation11 + $0x1e8] sm:$0xf0] }
 0x1b2   :  { %vm2344_vm2 = vmor %vm2342_vm0, %vm2343_vm1 }
 0x1b3   :  { %v2184_v40 = vadd.f32 %v2183_v33, %v2182_v41  ;;  %v2338_v50 = vmul.f32 %v5701_v34, %v2337_v26  ;;  %v4848_v33 = vor.u32 %v5565_v28, %v4845_v59  ;;  %v5587_v59 = vld [vmem:[#allocation11 + $0x1d4] sm:$0xf] }
 0x1b4   :  { %3367 = vmatpush.bf16.msrb.mxu0 %v4992_v44 }
 0x1b5   :  { %v2204_v45 = vmul.f32 %v6013_v10, %v2184_v40  ;;  %v2339_v20 = vmul.f32 0.5, %v2338_v50  ;;  %3341 = vmatpush.bf16.msra.mxu2 %v4864_v62  ;;  %v5644_v40 = vld [vmem:[#allocation11 + $0x394] sm:$0xf0]  ;;  %v5147_v62 = vld [vmem:[#allocation11 + $0x380] sm:$0xf] }
 0x1b7   :  { %v6177_v60 = vsub.f32 %v6163_v37, %v2204_v45  ;;  %v2340_v5 = vsub.f32 1.5, %v2339_v20  ;;  %v5648_v37 = vld [vmem:[#allocation11 + $0x3b4] sm:$0xf0]  ;;  %3320 = vmatmul.bf16.vlgmr.msra.gmra.mxu0 %v6118_v49  ;;  %v5595_v49 = vld [vmem:[#allocation11 + $0x214] sm:$0xf] }
 0x1b8   :  { %v5172_v12 = vor.u32 %v5648_v37, %v5171_v7  ;;  %3368 = vmatpush.bf16.msrb.mxu0 %v4984_v2  ;;  %v4968_v32 = vor.u32 %v5595_v49, %v4965_v58  ;;  %v5077_v45 = vld [vmem:[#allocation11 + $0x2f8] sm:$0xf0]  ;;  %v5621_v20 = vld [vmem:[#allocation11 + $0x2e4] sm:$0xf]  ;;  %v5069_v37 = vld [vmem:[#allocation11 + $0x2e8] sm:$0xf0] }
 0x1b9   :  { %v2220_v3 = vmul.f32 %v6177_v60, %v6177_v60  ;;  %v2341_v15 = vmul.f32 %v5701_v34, %v2340_v5  ;;  %3342 = vmatpush.bf16.msra.mxu2 %v4856_v6  ;;  %v5080_v2 = vor.u32 %v5623_v39, %v5077_v45  ;;  %v5061_v49 = vld [vmem:[#allocation11 + $0x2d8] sm:$0xf0] }
 0x1ba   :  { %3303 = vmatpush.bf16.msrb.mxu3 %v5172_v12 }
 0x1bb   :  { %v2258_v63 = vrot.slane %v2220_v3, 4  ;;  %v2345_v47 = vsel %vm2344_vm2, %v5701_v34, %v2341_v15  ;;  %v5155_v34 = vld [vmem:[#allocation11 + $0x390] sm:$0xf] }
 0x1bc   :  { %v2371_v41 = vmul.f32 %v2345_v47, %v6155_v53  ;;  %3369 = vmatpush.bf16.msrb.mxu0 %v4976_v17  ;;  %v5156_v30 = vor.u32 %v5644_v40, %v5155_v34  ;;  %v4952_v17 = vor.u32 %v5591_v13, %v4949_v14  ;;  %v5589_v47 = vld [vmem:[#allocation11 + $0x1e4] sm:$0xf]  ;;  %v4925_v40 = vld [vmem:[#allocation11 + $0x1c8] sm:$0xf0]  ;;  %v6209_v14 = vld [vmem:[#allocation9] sm:$0xff] }
 0x1bd   :  { %v2071_v11 = vpop.f32.mrf.mxu0  ;;  %v2259_v21 = vadd.f32 %v2258_v63, %v2220_v3  ;;  %3343 = vmatpush.bf16.msra.mxu2 %v4848_v33  ;;  %v5642_v3 = vld [vmem:[#allocation11 + $0x384] sm:$0xf0]  ;;  %v4944_v27 = vor.u32 %v5589_v47, %v4941_v25  ;;  %v5585_v34 = vld [vmem:[#allocation11 + $0x1c4] sm:$0xf] }
 0x1be   :  { %v2396_v35 = vmul.f32 %v2380_v19, %v2371_v41  ;;  %3304 = vmatpush.bf16.msrb.mxu3 %v5164_v9  ;;  %v5148_v63 = vor.u32 %v5642_v3, %v5147_v62  ;;  %v5072_v19 = vor.u32 %v5621_v20, %v5069_v37  ;;  %v5611_v62 = vld [vmem:[#allocation11 + $0x294] sm:$0xf]  ;;  %v5029_v3 = vld [vmem:[#allocation11 + $0x298] sm:$0xf0]  ;;  %v5581_v37 = vld [vmem:[#allocation11 + $0x1a4] sm:$0xf] }
 0x1bf   :  { %v2084_v16 = vpop.f32.mrf.mxu1  ;;  %v2260_v29 = vrot.slane %v2259_v21, 2 }
 0x1c0   :  { %v2085_v31 = vadd.f32 %v2084_v16, %v2071_v11  ;;  %v2421_v24 = vadd.f32 %v2405_v23, %v2396_v35  ;;  %3370 = vmatpush.bf16.msrb.mxu0 %v4968_v32  ;;  %v4829_v11 = vld [vmem:[#allocation11 + $0x108] sm:$0xf0]  ;;  %v4933_v32 = vld [vmem:[#allocation11 + $0x1d8] sm:$0xf0] }
 0x1c1   :  { %v2261_v36 = vadd.f32 %v2260_v29, %v2259_v21  ;;  %3344 = vmatpush.bf16.msra.mxu2 %v4840_v56  ;;  %v4832_v12 = vor.u32 %v5561_v4, %v4829_v11  ;;  %v5619_v21 = vld [vmem:[#allocation11 + $0x2d4] sm:$0xf]  ;;  %v5617_v29 = vld [vmem:[#allocation11 + $0x2c4] sm:$0xf]  ;;  %v4936_v33 = vor.u32 %v5587_v59, %v4933_v32  ;;  %v2381_v4 = vperm.slane %v6186_v18, 6 }
 0x1c2   :  { %v2429_v1 = vmax.f32 %v2421_v24, 0.0  ;;  %3305 = vmatpush.bf16.msrb.mxu3 %v5156_v30  ;;  %v5064_v41 = vor.u32 %v5619_v21, %v5061_v49  ;;  %v5613_v24 = vld [vmem:[#allocation11 + $0x2a4] sm:$0xf]  ;;  %v5037_v30 = vld [vmem:[#allocation11 + $0x2a8] sm:$0xf0] }
 0x1c3   :  { %v2262_v43 = vrot.slane %v2261_v36, 1  ;;  %v5609_v49 = vld [vmem:[#allocation11 + $0x284] sm:$0xf]  ;;  %v4893_v32 = vld [vmem:[#allocation11 + $0x188] sm:$0xf0] }
 0x1c4   :  { %v6192_v7 = vpack.c.bf16 %v2429_v1, %v2429_v1  ;;  %3371 = vmatpush.bf16.msrb.mxu0 %v4960_v55  ;;  %v5577_v59 = vld [vmem:[#allocation11 + $0x184] sm:$0xf] }
 0x1c5   :  { %v2073_v44 = vpop.f32.mrf.mxu0  ;;  %v2263_v61 = vadd.f32 %v2262_v43, %v2261_v36  ;;  %3345 = vmatpush.bf16.msra.mxu2 %v4832_v12  ;;  %v4928_v43 = vor.u32 %v5585_v34, %v4925_v40  ;;  %v5635_v34 = vld [vmem:[#allocation11 + $0x354] sm:$0xf]  ;;  %v5125_v40 = vld [vmem:[#allocation11 + $0x358] sm:$0xf0] }
 0x1c6   :  { %3281 = vmatmul.bf16.vlgmr.msrb.gmra.mxu1 %v6192_v7  ;;  %3306 = vmatpush.bf16.msrb.mxu3 %v5148_v63  ;;  %v4909_v63 = vld [vmem:[#allocation11 + $0x1a8] sm:$0xf0] }
 0x1c7   :  { %v2097_v38 = vpop.f32.mrf.mxu2  ;;  %v2086_v50 = vpop.f32.mrf.mxu1  ;;  %v2276_v48 = vmul.f32 %v2263_v61, %v6013_v10  ;;  %3377 = vmatpush.bf16.msrb.mxu1 %v5080_v2  ;;  %3372 = vmatmul.bf16.vlgmr.msrb.gmra.mxu0 %v6167_v57  ;;  %v5040_v2 = vor.u32 %v5613_v24, %v5037_v30  ;;  %v4912_v12 = vor.u32 %v5581_v37, %v4909_v63  ;;  %v5631_v30 = vld [vmem:[#allocation11 + $0x334] sm:$0xf] }
 0x1c8   :  { %v2098_v53 = vadd.f32 %v2097_v38, %v2085_v31  ;;  %v5053_v31 = vld [vmem:[#allocation11 + $0x2c8] sm:$0xf0]  ;;  %v5045_v38 = vld [vmem:[#allocation11 + $0x2b8] sm:$0xf0] }
 0x1c9   :  { %v2110_v26 = vpop.f32.mrf.mxu3  ;;  %v6194_v15 = vadd.f32 1e-05, %v2276_v48  ;;  %v5056_v8 = vor.u32 %v5617_v29, %v5053_v31  ;;  %v5048_v44 = vor.u32 %v5615_v52, %v5045_v38  ;;  %v4917_v50 = vld [vmem:[#allocation11 + $0x1b8] sm:$0xf0]  ;;  %v5133_v52 = vld [vmem:[#allocation11 + $0x368] sm:$0xf0] }
 0x1ca   :  { %v2111_v0 = vadd.f32 %v2110_v26, %v2098_v53  ;;  %3351 = vmatpush.bf16.msra.mxu3 %v4952_v17  ;;  %v4920_v56 = vor.u32 %v5583_v46, %v4917_v50  ;;  %v4901_v17 = vld [vmem:[#allocation11 + $0x198] sm:$0xf0] }
 0x1cb   :  { %5702 = vrsqrt.f32 %v6194_v15  ;;  %3378 = vmatpush.bf16.msrb.mxu1 %v5072_v19  ;;  %vm2352_vm4 = vweird.f32 %v6194_v15  ;;  %v5109_v46 = vld [vmem:[#allocation11 + $0x338] sm:$0xf0] }
 0x1cc   :  { %v2185_v5 = vrot.slane %v2111_v0, 4 }
 0x1ce   :  { %v2186_v16 = vadd.f32 %v2185_v5, %v2111_v0  ;;  %3352 = vmatpush.bf16.msra.mxu3 %v4944_v27 }
 0x1cf   :  { %v2099_v6 = vpop.f32.mrf.mxu2  ;;  %3379 = vmatpush.bf16.msrb.mxu1 %v5064_v41 }
 0x1d0   :  { %v2187_v58 = vrot.slane %v2186_v16, 2  ;;  %v5032_v6 = vor.u32 %v5611_v62, %v5029_v3  ;;  %v2382_v3 = vperm.slane %v6186_v18, 7 }
 0x1d1   :  { %v2112_v23 = vpop.f32.mrf.mxu3  ;;  %v5703_v35 = vpop.eup %5702 }
 0x1d2   :  { %v2188_v28 = vadd.f32 %v2187_v58, %v2186_v16  ;;  %v2347_v57 = vmul.f32 %v5703_v35, %v6194_v15  ;;  %3353 = vmatpush.bf16.msra.mxu3 %v4936_v33  ;;  %vm2353_vm3 = vweird.f32 %v5703_v35  ;;  %v2406_v15 = vperm.slane %v6209_v14, 6  ;;  %v5579_v16 = vld [vmem:[#allocation11 + $0x194] sm:$0xf]  ;;  %v5021_v58 = vld [vmem:[#allocation11 + $0x288] sm:$0xf0] }
 0x1d3   :  { %3380 = vmatpush.bf16.msrb.mxu1 %v5056_v8  ;;  %vm2354_vm5 = vmor %vm2352_vm4, %vm2353_vm3  ;;  %v4904_v23 = vor.u32 %v5579_v16, %v4901_v17  ;;  %v5024_v29 = vor.u32 %v5609_v49, %v5021_v58  ;;  %v5637_v8 = vld [vmem:[#allocation11 + $0x364] sm:$0xf]  ;;  %v5655_v16 = vld [vmem:[#allocation11 + $0x3f4] sm:$0xf] }
 0x1d4   :  { %v2189_v9 = vrot.slane %v2188_v28, 1  ;;  %v2348_v42 = vmul.f32 %v5703_v35, %v2347_v57  ;;  %v5136_v38 = vor.u32 %v5637_v8, %v5133_v52  ;;  %v5205_v17 = vld [vmem:[#allocation11 + $0x3f8] sm:$0xf0]  ;;  %v5653_v49 = vld [vmem:[#allocation11 + $0x3e4] sm:$0xf] }
 0x1d5   :  { %v5208_v18 = vor.u32 %v5655_v16, %v5205_v17  ;;  %v5197_v58 = vld [vmem:[#allocation11 + $0x3e8] sm:$0xf0]  ;;  %v5641_v52 = vld [vmem:[#allocation11 + $0x384] sm:$0xf] }
 0x1d6   :  { %v2190_v36 = vadd.f32 %v2189_v9, %v2188_v28  ;;  %v2349_v26 = vmul.f32 0.5, %v2348_v42  ;;  %3354 = vmatpush.bf16.msra.mxu3 %v4928_v43  ;;  %3333 = vmatmul.bf16.vlgmr.msra.gmra.mxu1 %v6121_v54  ;;  %v5639_v28 = vld [vmem:[#allocation11 + $0x374] sm:$0xf]  ;;  %v5128_v42 = vor.u32 %v5635_v34, %v5125_v40  ;;  %v5633_v43 = vld [vmem:[#allocation11 + $0x344] sm:$0xf] }
 0x1d7   :  { %3381 = vmatpush.bf16.msrb.mxu1 %v5048_v44  ;;  %v5661_v17 = vld [vmem:[#allocation12 + $0x20] sm:$0xff] }
 0x1d8   :  { %v2205_v39 = vmul.f32 %v6013_v10, %v2190_v36  ;;  %v2350_v55 = vsub.f32 1.5, %v2349_v26  ;;  %v5117_v26 = vld [vmem:[#allocation11 + $0x348] sm:$0xf0] }
 0x1da   :  { %v6201_v53 = vsub.f32 %v2111_v0, %v2205_v39  ;;  %v2351_v0 = vmul.f32 %v5703_v35, %v2350_v55  ;;  %3355 = vmatpush.bf16.msra.mxu3 %v4920_v56 }
 0x1db   :  { %3382 = vmatpush.bf16.msrb.mxu1 %v5040_v2 }
 0x1dc   :  { %v2221_v45 = vmul.f32 %v6201_v53, %v6201_v53  ;;  %v2355_v11 = vsel %vm2354_vm5, %v5703_v35, %v2351_v0  ;;  %v4896_v35 = vor.u32 %v5577_v59, %v4893_v32  ;;  %v5629_v0 = vld [vmem:[#allocation11 + $0x324] sm:$0xf]  ;;  %v5165_v32 = vld [vmem:[#allocation11 + $0x3a8] sm:$0xf0] }
 0x1dd   :  { %v3217_v1 = vpop.f32.mrf.mxu0  ;;  %v2372_v54 = vmul.f32 %v2355_v11, %v6177_v60  ;;  %v5141_v60 = vld [vmem:[#allocation11 + $0x378] sm:$0xf0]  ;;  %v2407_v11 = vperm.slane %v6209_v14, 7  ;;  %v5651_v14 = vld [vmem:[#allocation11 + $0x3d4] sm:$0xf] }
 0x1de   :  { %v2264_v61 = vrot.slane %v2221_v45, 4  ;;  %3356 = vmatpush.bf16.msra.mxu3 %v4912_v12  ;;  %v5144_v33 = vor.u32 %v5639_v28, %v5141_v60  ;;  %v5647_v60 = vld [vmem:[#allocation11 + $0x3b4] sm:$0xf]  ;;  %v5645_v59 = vld [vmem:[#allocation11 + $0x3a4] sm:$0xf] }
 0x1df   :  { %v3230_v20 = vpop.f32.mrf.mxu1  ;;  %v2397_v19 = vmul.f32 %v2381_v4, %v2372_v54  ;;  %3383 = vmatpush.bf16.msrb.mxu1 %v5032_v6  ;;  %v5627_v4 = vld [vmem:[#allocation11 + $0x314] sm:$0xf] }
 0x1e0   :  { %v2265_v48 = vadd.f32 %v2264_v61, %v2221_v45  ;;  %v3231_v5 = vadd.f32 %v3230_v20, %v3217_v1  ;;  %v5120_v45 = vor.u32 %v5633_v43, %v5117_v26  ;;  %v5112_v1 = vor.u32 %v5631_v30, %v5109_v46 }
 0x1e1   :  { %v2422_v27 = vadd.f32 %v2406_v15, %v2397_v19 }
 0x1e2   :  { %v2266_v13 = vrot.slane %v2265_v48, 2  ;;  %3357 = vmatpush.bf16.msra.mxu3 %v4904_v23  ;;  %v5189_v23 = vld [vmem:[#allocation11 + $0x3d8] sm:$0xf0] }
 0x1e3   :  { %v2430_v9 = vmax.f32 %v2422_v27, 0.0  ;;  %3384 = vmatpush.bf16.msrb.mxu1 %v5024_v29  ;;  %v5181_v27 = vld [vmem:[#allocation11 + $0x3c8] sm:$0xf0] }
 0x1e4   :  { %v2267_v21 = vadd.f32 %v2266_v13, %v2265_v48  ;;  %v5093_v48 = vld [vmem:[#allocation11 + $0x318] sm:$0xf0]  ;;  %v5625_v13 = vld [vmem:[#allocation11 + $0x304] sm:$0xf] }
 0x1e5   :  { %v3219_v25 = vpop.f32.mrf.mxu0  ;;  %v6213_v57 = vpack.c.bf16 %v2430_v9, %v2430_v9  ;;  %v5096_v12 = vor.u32 %v5627_v4, %v5093_v48  ;;  %v5664_v4 = vld [vmem:[#allocation12 + $0x38] sm:$0xff] }
 0x1e6   :  { %v2268_v47 = vrot.slane %v2267_v21, 1  ;;  %3358 = vmatpush.bf16.msra.mxu3 %v4896_v35  ;;  %3385 = vmatmul.bf16.vlgmr.msrb.gmra.mxu1 %v6192_v7  ;;  %v5101_v7 = vld [vmem:[#allocation11 + $0x328] sm:$0xf0]  ;;  %v5649_v25 = vld [vmem:[#allocation11 + $0x3c4] sm:$0xf] }
 0x1e7   :  { %v3232_v41 = vpop.f32.mrf.mxu1  ;;  %3294 = vmatmul.bf16.vlgmr.msrb.gmra.mxu2 %v6213_v57  ;;  %v5104_v62 = vor.u32 %v5629_v0, %v5101_v7  ;;  %v5184_v28 = vor.u32 %v5649_v25, %v5181_v27  ;;  %v5643_v35 = vld [vmem:[#allocation11 + $0x394] sm:$0xf]  ;;  %3624 = vmatpush.bf16.msra.mxu0 %v5664_v4 }
 0x1e8   :  { %v2269_v31 = vadd.f32 %v2268_v47, %v2267_v21  ;;  %3390 = vmatpush.bf16.msrb.mxu2 %v5144_v33  ;;  %v5192_v47 = vor.u32 %v5651_v14, %v5189_v23  ;;  %v5173_v41 = vld [vmem:[#allocation11 + $0x3b8] sm:$0xf0]  ;;  %v5168_v33 = vor.u32 %v5645_v59, %v5165_v32  ;;  %v5659_v23 = vld [vmem:[#allocation12 + $0x10] sm:$0xff] }
 0x1e9   :  { %v5176_v9 = vor.u32 %v5647_v60, %v5173_v41  ;;  %v5658_v60 = vld [vmem:[#allocation12 + $0x8] sm:$0xff] }
 0x1ea   :  { %v2277_v36 = vmul.f32 %v2269_v31, %v6013_v10 }
 0x1ec   :  { %v2285_v39 = vadd.f32 1e-05, %v2277_v36  ;;  %3391 = vmatpush.bf16.msrb.mxu2 %v5136_v38  ;;  %v5157_v36 = vld [vmem:[#allocation11 + $0x398] sm:$0xf0] }
 0x1ed   :  { %v5160_v8 = vor.u32 %v5643_v35, %v5157_v36 }
 0x1ee   :  { %5704 = vrsqrt.f32 %v2285_v39  ;;  %vm2362_vm7 = vweird.f32 %v2285_v39 }
 0x1f0   :  { %3392 = vmatpush.bf16.msrb.mxu2 %v5128_v42 }
 0x1f4   :  { %v5705_v44 = vpop.eup %5704  ;;  %3393 = vmatpush.bf16.msrb.mxu2 %v5120_v45 }
 0x1f5   :  { %v2357_v24 = vmul.f32 %v5705_v44, %v2285_v39  ;;  %v3243_v55 = vpop.f32.mrf.mxu2  ;;  %vm2363_vm6 = vweird.f32 %v5705_v44  ;;  %v5149_v39 = vld [vmem:[#allocation11 + $0x388] sm:$0xf0] }
 0x1f6   :  { %v3244_v56 = vadd.f32 %v3243_v55, %v3231_v5  ;;  %vm2364_vm8 = vmor %vm2362_vm7, %vm2363_vm6  ;;  %v5152_v38 = vor.u32 %v5641_v52, %v5149_v39 }
 0x1f7   :  { %v2358_v50 = vmul.f32 %v5705_v44, %v2357_v24  ;;  %3346 = vmatmul.bf16.vlgmr.msra.gmra.mxu2 %v6135_v51  ;;  %v5085_v51 = vld [vmem:[#allocation11 + $0x308] sm:$0xf0] }
 0x1f8   :  { %3394 = vmatpush.bf16.msrb.mxu2 %v5112_v1  ;;  %v5088_v6 = vor.u32 %v5625_v13, %v5085_v51  ;;  %v5662_v13 = vld [vmem:[#allocation12 + $0x28] sm:$0xff] }
 0x1f9   :  { %v2359_v61 = vmul.f32 0.5, %v2358_v50 }
 0x1fb   :  { %v2360_v20 = vsub.f32 1.5, %v2359_v61 }
 0x1fc   :  { %3395 = vmatpush.bf16.msrb.mxu2 %v5104_v62 }
 0x1fd   :  { %v2361_v2 = vmul.f32 %v5705_v44, %v2360_v20  ;;  %v3245_v5 = vpop.f32.mrf.mxu2 }
 0x1ff   :  { %v2365_v37 = vsel %vm2364_vm8, %v5705_v44, %v2361_v2 }
 0x200   :  { %v2373_v63 = vmul.f32 %v2365_v37, %v6201_v53  ;;  %3396 = vmatpush.bf16.msrb.mxu2 %v5096_v12  ;;  %v5200_v53 = vor.u32 %v5653_v49, %v5197_v58  ;;  %v5660_v49 = vld [vmem:[#allocation12 + $0x18] sm:$0xff] }
 0x202   :  { %v2398_v54 = vmul.f32 %v2382_v3, %v2373_v63  ;;  %v5663_v63 = vld [vmem:[#allocation12 + $0x30] sm:$0xff] }
 0x203   :  { %3625 = vmatpush.bf16.msra.mxu0 %v5663_v63 }
 0x204   :  { %v2423_v15 = vadd.f32 %v2407_v11, %v2398_v54  ;;  %3397 = vmatpush.bf16.msrb.mxu2 %v5088_v6 }
 0x206   :  { %v2431_v19 = vmax.f32 %v2423_v15, 0.0 }
 0x207   :  { %3398 = vmatmul.bf16.vlgmr.msrb.gmra.mxu2 %v6213_v57  ;;  %3626 = vmatpush.bf16.msra.mxu0 %v5662_v13 }
 0x208   :  { %v2439_v21 = vpack.c.bf16 %v2431_v19, %v2431_v19 }
 0x20a   :  { %3307 = vmatmul.bf16.vlgmr.msrb.gmra.mxu3 %v2439_v21 }
 0x20b   :  { %3403 = vmatpush.bf16.msrb.mxu3 %v5208_v18  ;;  %3627 = vmatpush.bf16.msra.mxu0 %v5661_v17 }
 0x20c   :  { %v3256_v29 = vpop.f32.mrf.mxu3 }
 0x20d   :  { %v3257_v31 = vadd.f32 %v3256_v29, %v3244_v56 }
 0x20f   :  { %3404 = vmatpush.bf16.msrb.mxu3 %v5200_v53  ;;  %3628 = vmatpush.bf16.msra.mxu0 %v5660_v49 }
 0x213   :  { %3405 = vmatpush.bf16.msrb.mxu3 %v5192_v47  ;;  %3629 = vmatpush.bf16.msra.mxu0 %v5659_v23 }
 0x214   :  { %v3258_v57 = vpop.f32.mrf.mxu3 }
 0x215   :  { %v5672_v57 = vld [vmem:[#allocation12 + $0x78] sm:$0xff] }
 0x216   :  { %3637 = vmatpush.bf16.msra.mxu1 %v5672_v57 }
 0x217   :  { %3406 = vmatpush.bf16.msrb.mxu3 %v5184_v28  ;;  %3630 = vmatpush.bf16.msra.mxu0 %v5658_v60 }
 0x21a   :  { %3359 = vmatmul.bf16.vlgmr.msra.gmra.mxu3 %v6147_v22 }
 0x21b   :  { %3407 = vmatpush.bf16.msrb.mxu3 %v5176_v9  ;;  %v5657_v9 = vld [vmem:[#allocation12] sm:$0xff] }
 0x21c   :  { %3631 = vmatpush.bf16.msra.mxu0 %v5657_v9 }
 0x21f   :  { %3408 = vmatpush.bf16.msrb.mxu3 %v5168_v33 }
 0x223   :  { %3409 = vmatpush.bf16.msrb.mxu3 %v5160_v8 }
 0x224   :  { %v3269_v34 = vpop.f32.mrf.mxu0 }
 0x225   :  { %v3270_v40 = vadd.f32 %v3269_v34, %v3257_v31 }
 0x227   :  { %3410 = vmatpush.bf16.msrb.mxu3 %v5152_v38  ;;  %v5671_v38 = vld [vmem:[#allocation12 + $0x70] sm:$0xff] }
 0x228   :  { %3638 = vmatpush.bf16.msra.mxu1 %v5671_v38 }
 0x22a   :  { %3411 = vmatmul.bf16.vlgmr.msrb.gmra.mxu3 %v2439_v21 }
 0x22c   :  { %v3271_v42 = vpop.f32.mrf.mxu0 }
 0x234   :  { %v3321_v43 = vpop.f32.mrf.mxu0 }
 0x23c   :  { %v3323_v26 = vpop.f32.mrf.mxu0 }
 0x243   :  { %v3282_v44 = vpop.f32.mrf.mxu1 }
 0x244   :  { %v3373_v22 = vpop.f32.mrf.mxu0  ;;  %v3283_v20 = vadd.f32 %v3282_v44, %v3270_v40 }
 0x24b   :  { %v3284_v24 = vpop.f32.mrf.mxu1 }
 0x24c   :  { %v3375_v45 = vpop.f32.mrf.mxu0 }
 0x24d   :  { %v5669_v45 = vld [vmem:[#allocation12 + $0x60] sm:$0xff] }
 0x253   :  { %v3334_v30 = vpop.f32.mrf.mxu1 }
 0x254   :  { %v3335_v46 = vadd.f32 %v3334_v30, %v3321_v43  ;;  %v5670_v43 = vld [vmem:[#allocation12 + $0x68] sm:$0xff] }
 0x255   :  { %3639 = vmatpush.bf16.msra.mxu1 %v5670_v43 }
 0x259   :  { %3640 = vmatpush.bf16.msra.mxu1 %v5669_v45 }
 0x25b   :  { %v3336_v50 = vpop.f32.mrf.mxu1 }
 0x263   :  { %v3386_v55 = vpop.f32.mrf.mxu1 }
 0x26a   :  { %v3295_v56 = vpop.f32.mrf.mxu2 }
 0x26b   :  { %v3388_v61 = vpop.f32.mrf.mxu1  ;;  %v3296_v2 = vadd.f32 %v3295_v56, %v3283_v20  ;;  %v5668_v56 = vld [vmem:[#allocation12 + $0x58] sm:$0xff] }
 0x26c   :  { %v3416_v61 = vld [vmem:[%s6244_s5] sm:$0x3]  ;;  %3641 = vmatpush.bf16.msra.mxu1 %v5668_v56 }
 0x272   :  { %v3297_v1 = vpop.f32.mrf.mxu2 }
 0x27a   :  { %v3347_v0 = vpop.f32.mrf.mxu2 }
 0x27b   :  { %v3348_v18 = vadd.f32 %v3347_v0, %v3335_v46 }
 0x282   :  { %v3349_v7 = vpop.f32.mrf.mxu2 }
 0x283   :  { %v3417_v7 = vld [vmem:[%s6245_s6] sm:$0x3] }
 0x28a   :  { %v3399_v48 = vpop.f32.mrf.mxu2 }
 0x28d   :  { %v3308_v62 = vpop.f32.mrf.mxu3 }
 0x28e   :  { %v3309_v3 = vadd.f32 %v3308_v62, %v3296_v2  ;;  %v3475_v2 = vperm.slane %v3416_v61, 0 }
 0x290   :  { %v3418_v37 = vrot.slane %v3309_v3, 4 }
 0x292   :  { %v3419_v5 = vadd.f32 %v3418_v37, %v3309_v3  ;;  %v3401_v51 = vpop.f32.mrf.mxu2  ;;  %v3482_v37 = vperm.slane %v3417_v7, 0 }
 0x294   :  { %v3420_v11 = vrot.slane %v3419_v5, 2 }
 0x295   :  { %v3310_v12 = vpop.f32.mrf.mxu3 }
 0x296   :  { %v3421_v54 = vadd.f32 %v3420_v11, %v3419_v5  ;;  %v5666_v12 = vld [vmem:[#allocation12 + $0x48] sm:$0xff] }
 0x298   :  { %v3422_v15 = vrot.slane %v3421_v54, 1 }
 0x29a   :  { %v3423_v16 = vadd.f32 %v3422_v15, %v3421_v54 }
 0x29c   :  { %v3430_v6 = vmul.f32 %v3423_v16, %v6013_v10  ;;  %v5665_v16 = vld [vmem:[#allocation12 + $0x40] sm:$0xff] }
 0x29d   :  { %v3360_v19 = vpop.f32.mrf.mxu3 }
 0x29e   :  { %v3432_v21 = vsub.f32 %v3309_v3, %v3430_v6  ;;  %v3361_v53 = vadd.f32 %v3360_v19, %v3348_v18  ;;  %v5667_v3 = vld [vmem:[#allocation12 + $0x50] sm:$0xff] }
 0x29f   :  { %3642 = vmatpush.bf16.msra.mxu1 %v5667_v3 }
 0x2a0   :  { %v3434_v58 = vmul.f32 %v3432_v21, %v3432_v21  ;;  %v3374_v25 = vadd.f32 %v3373_v22, %v3361_v53 }
 0x2a2   :  { %v3436_v14 = vrot.slane %v3434_v58, 4  ;;  %v3387_v29 = vadd.f32 %v3386_v55, %v3374_v25 }
 0x2a3   :  { %3643 = vmatpush.bf16.msra.mxu1 %v5666_v12 }
 0x2a4   :  { %v3437_v47 = vadd.f32 %v3436_v14, %v3434_v58  ;;  %v3400_v32 = vadd.f32 %v3399_v48, %v3387_v29 }
 0x2a5   :  { %v3362_v27 = vpop.f32.mrf.mxu3 }
 0x2a6   :  { %v3438_v28 = vrot.slane %v3437_v47, 2 }
 0x2a7   :  { %3644 = vmatpush.bf16.msra.mxu1 %v5665_v16 }
 0x2a8   :  { %v3439_v41 = vadd.f32 %v3438_v28, %v3437_v47  ;;  %v3476_v47 = vperm.slane %v3416_v61, 1  ;;  %v3483_v28 = vperm.slane %v3417_v7, 1 }
 0x2aa   :  { %v3440_v31 = vrot.slane %v3439_v41, 1 }
 0x2ac   :  { %v3441_v59 = vadd.f32 %v3440_v31, %v3439_v41 }
 0x2ad   :  { %v3412_v33 = vpop.f32.mrf.mxu3 }
 0x2ae   :  { %v3448_v35 = vmul.f32 %v3441_v59, %v6013_v10  ;;  %v3413_v36 = vadd.f32 %v3412_v33, %v3400_v32  ;;  %v5687_v59 = vld [vmem:[%s6247_s8] ss:$0 sm:$0xff] }
 0x2b0   :  { %v3450_v8 = vadd.f32 1e-05, %v3448_v35  ;;  %v3424_v52 = vrot.slane %v3413_v36, 4 }
 0x2b2   :  { %5706 = vrsqrt.f32 %v3450_v8  ;;  %v3425_v39 = vadd.f32 %v3424_v52, %v3413_v36  ;;  %vm3458_vm10 = vweird.f32 %v3450_v8 }
 0x2b4   :  { %v3426_v34 = vrot.slane %v3425_v39, 2 }
 0x2b5   :  { %v3414_v40 = vpop.f32.mrf.mxu3 }
 0x2b6   :  { %v3427_v42 = vadd.f32 %v3426_v34, %v3425_v39 }
 0x2b8   :  { %v5707_v26 = vpop.eup %5706  ;;  %v3428_v44 = vrot.slane %v3427_v42, 1 }
 0x2b9   :  { %v3453_v22 = vmul.f32 %v5707_v26, %v3450_v8  ;;  %vm3459_vm9 = vweird.f32 %v5707_v26 }
 0x2ba   :  { %v3429_v24 = vadd.f32 %v3428_v44, %v3427_v42  ;;  %vm3460_vm11 = vmor %vm3458_vm10, %vm3459_vm9 }
 0x2bb   :  { %v3454_v30 = vmul.f32 %v5707_v26, %v3453_v22 }
 0x2bc   :  { %v3431_v46 = vmul.f32 %v3429_v24, %v6013_v10 }
 0x2bd   :  { %v3455_v50 = vmul.f32 0.5, %v3454_v30 }
 0x2be   :  { %v3433_v55 = vsub.f32 %v3413_v36, %v3431_v46 }
 0x2bf   :  { %v3456_v1 = vsub.f32 1.5, %v3455_v50 }
 0x2c0   :  { %v3435_v0 = vmul.f32 %v3433_v55, %v3433_v55 }
 0x2c1   :  { %v3457_v20 = vmul.f32 %v5707_v26, %v3456_v1 }
 0x2c2   :  { %v3442_v62 = vrot.slane %v3435_v0, 4 }
 0x2c3   :  { %v3461_v4 = vsel %vm3460_vm11, %v5707_v26, %v3457_v20 }
 0x2c4   :  { %v3472_v48 = vmul.f32 %v3461_v4, %v3432_v21  ;;  %v3443_v5 = vadd.f32 %v3442_v62, %v3435_v0 }
 0x2c6   :  { %v3479_v63 = vmul.f32 %v3475_v2, %v3472_v48  ;;  %v3444_v11 = vrot.slane %v3443_v5, 2 }
 0x2c8   :  { %v3486_v54 = vadd.f32 %v3482_v37, %v3479_v63  ;;  %v3445_v13 = vadd.f32 %v3444_v11, %v3443_v5 }
 0x2ca   :  { %v3488_v51 = vmax.f32 %v3486_v54, 0.0  ;;  %v3446_v15 = vrot.slane %v3445_v13, 1 }
 0x2cc   :  { %v3447_v17 = vadd.f32 %v3446_v15, %v3445_v13  ;;  %v3490_v6 = vpack.c.bf16 %v3488_v51, %v3488_v51 }
 0x2ce   :  { %v3449_v19 = vmul.f32 %v3447_v17, %v6013_v10  ;;  %3632 = vmatmul.bf16.vlgmr.msra.gmra.mxu0 %v3490_v6 }
 0x2d0   :  { %v3451_v18 = vadd.f32 1e-05, %v3449_v19 }
 0x2d2   :  { %5708 = vrsqrt.f32 %v3451_v18  ;;  %vm3468_vm13 = vweird.f32 %v3451_v18 }
 0x2d8   :  { %v5709_v21 = vpop.eup %5708 }
 0x2d9   :  { %v3463_v49 = vmul.f32 %v5709_v21, %v3451_v18  ;;  %vm3469_vm12 = vweird.f32 %v5709_v21 }
 0x2da   :  { %vm3470_vm14 = vmor %vm3468_vm13, %vm3469_vm12 }
 0x2db   :  { %v3464_v58 = vmul.f32 %v5709_v21, %v3463_v49 }
 0x2dd   :  { %v3465_v53 = vmul.f32 0.5, %v3464_v58 }
 0x2df   :  { %v3466_v14 = vsub.f32 1.5, %v3465_v53 }
 0x2e1   :  { %v3467_v23 = vmul.f32 %v5709_v21, %v3466_v14 }
 0x2e3   :  { %v3471_v25 = vsel %vm3470_vm14, %v5709_v21, %v3467_v23 }
 0x2e4   :  { %v3473_v27 = vmul.f32 %v3471_v25, %v3433_v55 }
 0x2e6   :  { %v3480_v60 = vmul.f32 %v3476_v47, %v3473_v27 }
 0x2e8   :  { %v3487_v41 = vadd.f32 %v3483_v28, %v3480_v60 }
 0x2ea   :  { %v3489_v29 = vmax.f32 %v3487_v41, 0.0 }
 0x2ec   :  { %v3491_v10 = vpack.c.bf16 %v3489_v29, %v3489_v29 }
 0x2ee   :  { %3645 = vmatmul.bf16.vlgmr.msra.gmra.mxu1 %v3491_v10 }
 0x34b   :  { %v3633_v31 = vpop.f32.mrf.mxu0 }
 0x34c   :  { %v3634_v32 = vadd.f32 %v5687_v59, %v3633_v31 }
 0x353   :  { %v3635_v9 = vpop.f32.mrf.mxu0 }
 0x36b   :  { %v3646_v33 = vpop.f32.mrf.mxu1 }
 0x36c   :  { %v3647_v35 = vadd.f32 %v3646_v33, %v3634_v32 }
 0x36e   :  { %3650 = vst [vmem:[#allocation14] sm:$0xff] %v3647_v35 }
 0x36f   :  { %3661 = dma.vmem_to_hbm [thread:$0]  %s3657_s23, 128, %s3659_s25, [#allocation5]  }
 0x373   :  { %v3648_v36 = vpop.f32.mrf.mxu1 }
 0x374   :  { %5888 = dma.done.wait [#allocation5], 128  }
 0x375   :  { %5889 = vsyncadd [#allocation5], 4294967168 }
 0x376   :  { %3666 = vsyncpa [#allocation4], 1 }
 0x377   :  { %3667 = vsyncpa [#allocation7], 1 }
 0x378   :  { %3668 = vsyncpa [#allocation10], 1 }
 0x379   :  { %3669 = vsyncpa [#allocation13], 1 }
 0x37a   :  { %3670 = vsyncpa [#allocation5], 1 }

</bundles_post_ra>
